<compile_context>
chip_gen: v5e
topology: v5e:2x2
jax: 0.10.0
libtpu: 0.0.40
codegen_flags: <defaults>
</compile_context>

<pallas_src>
import functools
import math

import jax
import jax.numpy as jnp
from jax.experimental import pallas as pl
from jax.experimental.pallas import tpu as pltpu


# ---------------------------------------------------------------------------
# Fused conv + maxpool Pallas kernel (one batch image per grid step)
# ---------------------------------------------------------------------------

def _fused_conv_pool_kernel(x_ref, w_ref, o_ref, cpad_ref, *,
                            K, conv_stride, OH, OW,
                            pool_k, pool_s, pool_p, PH, PW):
    """x_ref: (1, Hp, Wp, Cin) bf16 padded image, w_ref: (K, K, Cin, Cout) bf16,
    o_ref: (1, PH, PW, Cout), cpad_ref: (OH+2*pool_p, OW+2*pool_p, Cout) f32 scratch."""
    Cin = x_ref.shape[-1]
    Cout = o_ref.shape[-1]

    # Padded conv scratch: -inf so pool-window padding never wins (PyTorch MaxPool2d).
    cpad_ref[...] = jnp.full(cpad_ref.shape, -jnp.inf, dtype=cpad_ref.dtype)

    # Conv as K*K shifted matmuls (bf16 operands, f32 accumulation on the MXU).
    acc = jnp.zeros((OH * OW, Cout), jnp.float32)
    for kh in range(K):
        for kw in range(K):
            if conv_stride == 1:
                patch = x_ref[0, pl.ds(kh, OH), pl.ds(kw, OW), :]
            else:
                patch = x_ref[0, pl.ds(kh, OH, stride=conv_stride),
                              pl.ds(kw, OW, stride=conv_stride), :]
            acc = acc + jnp.dot(patch.reshape(OH * OW, Cin), w_ref[kh, kw],
                                preferred_element_type=jnp.float32)

    # Write the conv result into the scratch interior (offset = pool padding).
    cpad_ref[pl.ds(pool_p, OH), pl.ds(pool_p, OW), :] = acc.reshape(OH, OW, Cout)

    # MaxPool: running max over the pool_k*pool_k strided shifted views (VPU).
    pooled = None
    for kh in range(pool_k):
        for kw in range(pool_k):
            if pool_s == 1:
                v = cpad_ref[pl.ds(kh, PH), pl.ds(kw, PW), :]
            else:
                v = cpad_ref[pl.ds(kh, PH, stride=pool_s),
                             pl.ds(kw, PW, stride=pool_s), :]
            pooled = v if pooled is None else jnp.maximum(pooled, v)

    o_ref[0] = pooled.astype(o_ref.dtype)


def _conv_pool_fused(x_nhwc, w_oihw, kernel_size, conv_stride, conv_pad,
                     pool_k, pool_s, pool_p, out_dtype=jnp.float32):
    """One Tokenizer layer (Conv2d no-bias + MaxPool2d) as a single pallas_call.
    Input NHWC, returns (B, PH, PW, Cout) in `out_dtype`."""
    B, H, W, Cin = x_nhwc.shape
    Cout = w_oihw.shape[0]
    K = kernel_size
    OH = (H + 2 * conv_pad - K) // conv_stride + 1
    OW = (W + 2 * conv_pad - K) // conv_stride + 1
    PH = (OH + 2 * pool_p - pool_k) // pool_s + 1
    PW = (OW + 2 * pool_p - pool_k) // pool_s + 1
    CH, CW = OH + 2 * pool_p, OW + 2 * pool_p

    xp = jnp.pad(x_nhwc.astype(jnp.bfloat16),
                 ((0, 0), (conv_pad, conv_pad), (conv_pad, conv_pad), (0, 0)))
    # PyTorch (Cout, Cin, kh, kw) -> (kh, kw, Cin, Cout), bf16 for the MXU.
    w = jnp.transpose(w_oihw, (2, 3, 1, 0)).astype(jnp.bfloat16)

    kernel = functools.partial(
        _fused_conv_pool_kernel, K=K, conv_stride=conv_stride, OH=OH, OW=OW,
        pool_k=pool_k, pool_s=pool_s, pool_p=pool_p, PH=PH, PW=PW)

    Hp, Wp = xp.shape[1], xp.shape[2]
    return pl.pallas_call(
        kernel,
        out_shape=jax.ShapeDtypeStruct((B, PH, PW, Cout), out_dtype),
        grid_spec=pltpu.PrefetchScalarGridSpec(
            num_scalar_prefetch=0,
            grid=(B,),
            in_specs=[pl.BlockSpec((1, Hp, Wp, Cin), lambda b: (b, 0, 0, 0)),
                      pl.BlockSpec((K, K, Cin, Cout), lambda b: (0, 0, 0, 0))],
            out_specs=pl.BlockSpec((1, PH, PW, Cout), lambda b: (b, 0, 0, 0)),
            scratch_shapes=[pltpu.VMEM((CH, CW, Cout), jnp.float32)]),
        compiler_params=pltpu.CompilerParams(
            dimension_semantics=("parallel",),
            vmem_limit_bytes=32 * 1024 * 1024),
    )(xp, w)


# ---------------------------------------------------------------------------
# Tokenizer forward (matches the PyTorch module)
# ---------------------------------------------------------------------------

def tokenizer_forward(x_nchw, conv_weights, kernel_size, stride, padding,
                      pooling_kernel_size=3, pooling_stride=2, pooling_padding=1,
                      max_pool=True):
    """Replicates Tokenizer.forward: returns (B, seq_len, C_out) float32."""
    y = jnp.transpose(x_nchw, (0, 2, 3, 1))           # NCHW -> NHWC (C on lanes)
    if max_pool:
        pk, ps, pp = pooling_kernel_size, pooling_stride, pooling_padding
    else:
        pk, ps, pp = 1, 1, 0                          # 1x1 / stride-1 pool == Identity
    n = len(conv_weights)
    for li, w in enumerate(conv_weights):
        out_dtype = jnp.float32 if li == n - 1 else jnp.bfloat16
        y = _conv_pool_fused(y, w, kernel_size, stride, padding, pk, ps, pp, out_dtype)
    B, PH, PW, C = y.shape
    # flatten(2,3) + transpose(-2,-1) in NCHW  ==  row-major (B, H*W, C) in NHWC.
    return y.reshape(B, PH * PW, C)


# ---------------------------------------------------------------------------
# Reference (pure JAX).  Mimics the kernel's bf16 input/weight/intermediate
# rounding so the comparison isolates the Pallas implementation itself.
# ---------------------------------------------------------------------------

def _reference(x_nchw, conv_weights, kernel_size, stride, padding,
               pool_k=3, pool_s=2, pool_p=1, max_pool=True):
    y = x_nchw
    for w in conv_weights:
        y = y.astype(jnp.bfloat16).astype(jnp.float32)
        w = w.astype(jnp.bfloat16).astype(jnp.float32)
        y = jax.lax.conv_general_dilated(
            y, w, window_strides=(stride, stride),
            padding=[(padding, padding), (padding, padding)],
            dimension_numbers=("NCHW", "OIHW", "NCHW"),
            precision=jax.lax.Precision.HIGHEST)
        if max_pool:
            y = jax.lax.reduce_window(
                y, -jnp.inf, jax.lax.max,
                window_dimensions=(1, 1, pool_k, pool_k),
                window_strides=(1, 1, pool_s, pool_s),
                padding=[(0, 0), (0, 0), (pool_p, pool_p), (pool_p, pool_p)])
    B, C, Hh, Ww = y.shape
    return jnp.transpose(y.reshape(B, C, Hh * Ww), (0, 2, 1))


# ---------------------------------------------------------------------------
# Main
# ---------------------------------------------------------------------------

if __name__ == "__main__":
    # Module config (small, consistent with the Tokenizer defaults; 2 layers to
    # exercise the multi-layer path that the previous version handled fragilely).
    kernel_size, stride, padding = 3, 1, 1
    pool_k, pool_s, pool_p = 3, 2, 1
    n_conv_layers = 2
    n_input_channels = 3
    in_planes = 32
    n_output_channels = 64
    B, H, W = 2, 16, 16

    key = jax.random.PRNGKey(0)
    kx, kw_key = jax.random.split(key)
    x = jax.random.normal(kx, (B, n_input_channels, H, W), dtype=jnp.float32)

    # Kaiming-normal init (fan_in, gain sqrt(2)), deterministic in-script.
    n_filter_list = ([n_input_channels]
                     + [in_planes] * (n_conv_layers - 1)
                     + [n_output_channels])
    conv_weights = []
    for i in range(n_conv_layers):
        cin, cout = n_filter_list[i], n_filter_list[i + 1]
        fan_in = cin * kernel_size * kernel_size
        std = math.sqrt(2.0 / fan_in)
        kw_key, sub = jax.random.split(kw_key)
        conv_weights.append(
            std * jax.random.normal(sub, (cout, cin, kernel_size, kernel_size),
                                    dtype=jnp.float32))

    out = tokenizer_forward(x, conv_weights, kernel_size, stride, padding,
                            pool_k, pool_s, pool_p)
    out = jax.block_until_ready(out)

    ref = _reference(x, conv_weights, kernel_size, stride, padding,
                     pool_k, pool_s, pool_p)
    assert out.shape == ref.shape, (out.shape, ref.shape)
    max_err = float(jnp.max(jnp.abs(out - ref)))
    assert jnp.allclose(out, ref, atol=1e-2, rtol=1e-2), max_err

    print("KERNEL_OK")
</pallas_src>

<mosaic_0001>
module attributes {stable_mosaic.version = 11 : i64} {
  func.func @_fused_conv_pool_kernel(%arg0: i32, %arg1: memref<1x18x18x3xbf16, #tpu.memory_space<vmem>>, %arg2: memref<3x3x3x32xbf16, #tpu.memory_space<vmem>>, %arg3: memref<1x8x8x32xbf16, #tpu.memory_space<vmem>>, %arg4: memref<18x18x32xf32, #tpu.memory_space<vmem>>) attributes {dimension_semantics = [#tpu.dimension_semantics<parallel>], iteration_bounds = array<i64: 2>, scalar_prefetch = 0 : i64, scratch_operands = 1 : i64, tpu.core_type = #tpu.core_type<tc>, window_params = [{transform_indices = @transform_0, window_bounds = array<i64: 1, 18, 18, 3>}, {pipeline_mode = #tpu.pipeline_mode<synchronous>, transform_indices = @transform_1, window_bounds = array<i64: 3, 3, 3, 32>}, {transform_indices = @transform_2, window_bounds = array<i64: 1, 8, 8, 32>}]} {
    %cst = arith.constant 0xFF800000 : f32
    %0 = vector.broadcast %cst : f32 to vector<18x18x32xf32>
    %c0 = arith.constant 0 : index
    %c0_0 = arith.constant 0 : index
    %c0_1 = arith.constant 0 : index
    %1 = vector.load %arg4[%c0, %c0_0, %c0_1] : memref<18x18x32xf32, #tpu.memory_space<vmem>>, vector<18x18x32xf32>
    tpu.vector_store %arg4[%c0, %c0_0, %c0_1], %0 {strides = array<i32>} : memref<18x18x32xf32, #tpu.memory_space<vmem>>, vector<18x18x32xf32>,
    %cst_2 = arith.constant 0.000000e+00 : f32
    %2 = vector.broadcast %cst_2 : f32 to vector<256x32xf32>
    %c0_3 = arith.constant 0 : index
    %c0_4 = arith.constant 0 : index
    %c0_5 = arith.constant 0 : index
    %c0_6 = arith.constant 0 : index
    %3 = vector.load %arg1[%c0_3, %c0_4, %c0_5, %c0_6] : memref<1x18x18x3xbf16, #tpu.memory_space<vmem>>, vector<1x16x16x3xbf16>
    %4 = vector.shape_cast %3 : vector<1x16x16x3xbf16> to vector<16x16x3xbf16>
    %5 = vector.shape_cast %4 : vector<16x16x3xbf16> to vector<256x3xbf16>
    %c0_7 = arith.constant 0 : index
    %c0_8 = arith.constant 0 : index
    %c0_9 = arith.constant 0 : index
    %c0_10 = arith.constant 0 : index
    %6 = vector.load %arg2[%c0_7, %c0_8, %c0_9, %c0_10] : memref<3x3x3x32xbf16, #tpu.memory_space<vmem>>, vector<1x1x3x32xbf16>
    %7 = vector.shape_cast %6 : vector<1x1x3x32xbf16> to vector<3x32xbf16>
    %cst_11 = arith.constant dense<0.000000e+00> : vector<256x32xf32>
    %8 = tpu.matmul %5, %7, %cst_11 {dimension_numbers = #tpu.dot_dimension_numbers<[1], [0], [0], [1], [0, 0, 1, 1], [], []>} : vector<256x3xbf16>, vector<3x32xbf16>, vector<256x32xf32> -> vector<256x32xf32>
    %9 = arith.addf %2, %8 : vector<256x32xf32>
    %c0_12 = arith.constant 0 : index
    %c0_13 = arith.constant 0 : index
    %c1 = arith.constant 1 : index
    %c0_14 = arith.constant 0 : index
    %10 = vector.load %arg1[%c0_12, %c0_13, %c1, %c0_14] : memref<1x18x18x3xbf16, #tpu.memory_space<vmem>>, vector<1x16x16x3xbf16>
    %11 = vector.shape_cast %10 : vector<1x16x16x3xbf16> to vector<16x16x3xbf16>
    %12 = vector.shape_cast %11 : vector<16x16x3xbf16> to vector<256x3xbf16>
    %c0_15 = arith.constant 0 : index
    %c1_16 = arith.constant 1 : index
    %c0_17 = arith.constant 0 : index
    %c0_18 = arith.constant 0 : index
    %13 = vector.load %arg2[%c0_15, %c1_16, %c0_17, %c0_18] : memref<3x3x3x32xbf16, #tpu.memory_space<vmem>>, vector<1x1x3x32xbf16>
    %14 = vector.shape_cast %13 : vector<1x1x3x32xbf16> to vector<3x32xbf16>
    %cst_19 = arith.constant dense<0.000000e+00> : vector<256x32xf32>
    %15 = tpu.matmul %12, %14, %cst_19 {dimension_numbers = #tpu.dot_dimension_numbers<[1], [0], [0], [1], [0, 0, 1, 1], [], []>} : vector<256x3xbf16>, vector<3x32xbf16>, vector<256x32xf32> -> vector<256x32xf32>
    %16 = arith.addf %9, %15 : vector<256x32xf32>
    %c0_20 = arith.constant 0 : index
    %c0_21 = arith.constant 0 : index
    %c2 = arith.constant 2 : index
    %c0_22 = arith.constant 0 : index
    %17 = vector.load %arg1[%c0_20, %c0_21, %c2, %c0_22] : memref<1x18x18x3xbf16, #tpu.memory_space<vmem>>, vector<1x16x16x3xbf16>
    %18 = vector.shape_cast %17 : vector<1x16x16x3xbf16> to vector<16x16x3xbf16>
    %19 = vector.shape_cast %18 : vector<16x16x3xbf16> to vector<256x3xbf16>
    %c0_23 = arith.constant 0 : index
    %c2_24 = arith.constant 2 : index
    %c0_25 = arith.constant 0 : index
    %c0_26 = arith.constant 0 : index
    %20 = vector.load %arg2[%c0_23, %c2_24, %c0_25, %c0_26] : memref<3x3x3x32xbf16, #tpu.memory_space<vmem>>, vector<1x1x3x32xbf16>
    %21 = vector.shape_cast %20 : vector<1x1x3x32xbf16> to vector<3x32xbf16>
    %cst_27 = arith.constant dense<0.000000e+00> : vector<256x32xf32>
    %22 = tpu.matmul %19, %21, %cst_27 {dimension_numbers = #tpu.dot_dimension_numbers<[1], [0], [0], [1], [0, 0, 1, 1], [], []>} : vector<256x3xbf16>, vector<3x32xbf16>, vector<256x32xf32> -> vector<256x32xf32>
    %23 = arith.addf %16, %22 : vector<256x32xf32>
    %c0_28 = arith.constant 0 : index
    %c1_29 = arith.constant 1 : index
    %c0_30 = arith.constant 0 : index
    %c0_31 = arith.constant 0 : index
    %24 = vector.load %arg1[%c0_28, %c1_29, %c0_30, %c0_31] : memref<1x18x18x3xbf16, #tpu.memory_space<vmem>>, vector<1x16x16x3xbf16>
    %25 = vector.shape_cast %24 : vector<1x16x16x3xbf16> to vector<16x16x3xbf16>
    %26 = vector.shape_cast %25 : vector<16x16x3xbf16> to vector<256x3xbf16>
    %c1_32 = arith.constant 1 : index
    %c0_33 = arith.constant 0 : index
    %c0_34 = arith.constant 0 : index
    %c0_35 = arith.constant 0 : index
    %27 = vector.load %arg2[%c1_32, %c0_33, %c0_34, %c0_35] : memref<3x3x3x32xbf16, #tpu.memory_space<vmem>>, vector<1x1x3x32xbf16>
    %28 = vector.shape_cast %27 : vector<1x1x3x32xbf16> to vector<3x32xbf16>
    %cst_36 = arith.constant dense<0.000000e+00> : vector<256x32xf32>
    %29 = tpu.matmul %26, %28, %cst_36 {dimension_numbers = #tpu.dot_dimension_numbers<[1], [0], [0], [1], [0, 0, 1, 1], [], []>} : vector<256x3xbf16>, vector<3x32xbf16>, vector<256x32xf32> -> vector<256x32xf32>
    %30 = arith.addf %23, %29 : vector<256x32xf32>
    %c0_37 = arith.constant 0 : index
    %c1_38 = arith.constant 1 : index
    %c1_39 = arith.constant 1 : index
    %c0_40 = arith.constant 0 : index
    %31 = vector.load %arg1[%c0_37, %c1_38, %c1_39, %c0_40] : memref<1x18x18x3xbf16, #tpu.memory_space<vmem>>, vector<1x16x16x3xbf16>
    %32 = vector.shape_cast %31 : vector<1x16x16x3xbf16> to vector<16x16x3xbf16>
    %33 = vector.shape_cast %32 : vector<16x16x3xbf16> to vector<256x3xbf16>
    %c1_41 = arith.constant 1 : index
    %c1_42 = arith.constant 1 : index
    %c0_43 = arith.constant 0 : index
    %c0_44 = arith.constant 0 : index
    %34 = vector.load %arg2[%c1_41, %c1_42, %c0_43, %c0_44] : memref<3x3x3x32xbf16, #tpu.memory_space<vmem>>, vector<1x1x3x32xbf16>
    %35 = vector.shape_cast %34 : vector<1x1x3x32xbf16> to vector<3x32xbf16>
    %cst_45 = arith.constant dense<0.000000e+00> : vector<256x32xf32>
    %36 = tpu.matmul %33, %35, %cst_45 {dimension_numbers = #tpu.dot_dimension_numbers<[1], [0], [0], [1], [0, 0, 1, 1], [], []>} : vector<256x3xbf16>, vector<3x32xbf16>, vector<256x32xf32> -> vector<256x32xf32>
    %37 = arith.addf %30, %36 : vector<256x32xf32>
    %c0_46 = arith.constant 0 : index
    %c1_47 = arith.constant 1 : index
    %c2_48 = arith.constant 2 : index
    %c0_49 = arith.constant 0 : index
    %38 = vector.load %arg1[%c0_46, %c1_47, %c2_48, %c0_49] : memref<1x18x18x3xbf16, #tpu.memory_space<vmem>>, vector<1x16x16x3xbf16>
    %39 = vector.shape_cast %38 : vector<1x16x16x3xbf16> to vector<16x16x3xbf16>
    %40 = vector.shape_cast %39 : vector<16x16x3xbf16> to vector<256x3xbf16>
    %c1_50 = arith.constant 1 : index
    %c2_51 = arith.constant 2 : index
    %c0_52 = arith.constant 0 : index
    %c0_53 = arith.constant 0 : index
    %41 = vector.load %arg2[%c1_50, %c2_51, %c0_52, %c0_53] : memref<3x3x3x32xbf16, #tpu.memory_space<vmem>>, vector<1x1x3x32xbf16>
    %42 = vector.shape_cast %41 : vector<1x1x3x32xbf16> to vector<3x32xbf16>
    %cst_54 = arith.constant dense<0.000000e+00> : vector<256x32xf32>
    %43 = tpu.matmul %40, %42, %cst_54 {dimension_numbers = #tpu.dot_dimension_numbers<[1], [0], [0], [1], [0, 0, 1, 1], [], []>} : vector<256x3xbf16>, vector<3x32xbf16>, vector<256x32xf32> -> vector<256x32xf32>
    %44 = arith.addf %37, %43 : vector<256x32xf32>
    %c0_55 = arith.constant 0 : index
    %c2_56 = arith.constant 2 : index
    %c0_57 = arith.constant 0 : index
    %c0_58 = arith.constant 0 : index
    %45 = vector.load %arg1[%c0_55, %c2_56, %c0_57, %c0_58] : memref<1x18x18x3xbf16, #tpu.memory_space<vmem>>, vector<1x16x16x3xbf16>
    %46 = vector.shape_cast %45 : vector<1x16x16x3xbf16> to vector<16x16x3xbf16>
    %47 = vector.shape_cast %46 : vector<16x16x3xbf16> to vector<256x3xbf16>
    %c2_59 = arith.constant 2 : index
    %c0_60 = arith.constant 0 : index
    %c0_61 = arith.constant 0 : index
    %c0_62 = arith.constant 0 : index
    %48 = vector.load %arg2[%c2_59, %c0_60, %c0_61, %c0_62] : memref<3x3x3x32xbf16, #tpu.memory_space<vmem>>, vector<1x1x3x32xbf16>
    %49 = vector.shape_cast %48 : vector<1x1x3x32xbf16> to vector<3x32xbf16>
    %cst_63 = arith.constant dense<0.000000e+00> : vector<256x32xf32>
    %50 = tpu.matmul %47, %49, %cst_63 {dimension_numbers = #tpu.dot_dimension_numbers<[1], [0], [0], [1], [0, 0, 1, 1], [], []>} : vector<256x3xbf16>, vector<3x32xbf16>, vector<256x32xf32> -> vector<256x32xf32>
    %51 = arith.addf %44, %50 : vector<256x32xf32>
    %c0_64 = arith.constant 0 : index
    %c2_65 = arith.constant 2 : index
    %c1_66 = arith.constant 1 : index
    %c0_67 = arith.constant 0 : index
    %52 = vector.load %arg1[%c0_64, %c2_65, %c1_66, %c0_67] : memref<1x18x18x3xbf16, #tpu.memory_space<vmem>>, vector<1x16x16x3xbf16>
    %53 = vector.shape_cast %52 : vector<1x16x16x3xbf16> to vector<16x16x3xbf16>
    %54 = vector.shape_cast %53 : vector<16x16x3xbf16> to vector<256x3xbf16>
    %c2_68 = arith.constant 2 : index
    %c1_69 = arith.constant 1 : index
    %c0_70 = arith.constant 0 : index
    %c0_71 = arith.constant 0 : index
    %55 = vector.load %arg2[%c2_68, %c1_69, %c0_70, %c0_71] : memref<3x3x3x32xbf16, #tpu.memory_space<vmem>>, vector<1x1x3x32xbf16>
    %56 = vector.shape_cast %55 : vector<1x1x3x32xbf16> to vector<3x32xbf16>
    %cst_72 = arith.constant dense<0.000000e+00> : vector<256x32xf32>
    %57 = tpu.matmul %54, %56, %cst_72 {dimension_numbers = #tpu.dot_dimension_numbers<[1], [0], [0], [1], [0, 0, 1, 1], [], []>} : vector<256x3xbf16>, vector<3x32xbf16>, vector<256x32xf32> -> vector<256x32xf32>
    %58 = arith.addf %51, %57 : vector<256x32xf32>
    %c0_73 = arith.constant 0 : index
    %c2_74 = arith.constant 2 : index
    %c2_75 = arith.constant 2 : index
    %c0_76 = arith.constant 0 : index
    %59 = vector.load %arg1[%c0_73, %c2_74, %c2_75, %c0_76] : memref<1x18x18x3xbf16, #tpu.memory_space<vmem>>, vector<1x16x16x3xbf16>
    %60 = vector.shape_cast %59 : vector<1x16x16x3xbf16> to vector<16x16x3xbf16>
    %61 = vector.shape_cast %60 : vector<16x16x3xbf16> to vector<256x3xbf16>
    %c2_77 = arith.constant 2 : index
    %c2_78 = arith.constant 2 : index
    %c0_79 = arith.constant 0 : index
    %c0_80 = arith.constant 0 : index
    %62 = vector.load %arg2[%c2_77, %c2_78, %c0_79, %c0_80] : memref<3x3x3x32xbf16, #tpu.memory_space<vmem>>, vector<1x1x3x32xbf16>
    %63 = vector.shape_cast %62 : vector<1x1x3x32xbf16> to vector<3x32xbf16>
    %cst_81 = arith.constant dense<0.000000e+00> : vector<256x32xf32>
    %64 = tpu.matmul %61, %63, %cst_81 {dimension_numbers = #tpu.dot_dimension_numbers<[1], [0], [0], [1], [0, 0, 1, 1], [], []>} : vector<256x3xbf16>, vector<3x32xbf16>, vector<256x32xf32> -> vector<256x32xf32>
    %65 = arith.addf %58, %64 : vector<256x32xf32>
    %66 = vector.shape_cast %65 : vector<256x32xf32> to vector<16x16x32xf32>
    %c1_82 = arith.constant 1 : index
    %c1_83 = arith.constant 1 : index
    %c0_84 = arith.constant 0 : index
    %67 = vector.load %arg4[%c1_82, %c1_83, %c0_84] : memref<18x18x32xf32, #tpu.memory_space<vmem>>, vector<16x16x32xf32>
    tpu.vector_store %arg4[%c1_82, %c1_83, %c0_84], %66 {strides = array<i32>} : memref<18x18x32xf32, #tpu.memory_space<vmem>>, vector<16x16x32xf32>,
    %c0_85 = arith.constant 0 : index
    %c0_86 = arith.constant 0 : index
    %c0_87 = arith.constant 0 : index
    %68 = tpu.strided_load %arg4[%c0_85, %c0_86, %c0_87] {strides = array<i32: 2, 2, 1>} : memref<18x18x32xf32, #tpu.memory_space<vmem>>, vector<8x8x32xf32>
    %c0_88 = arith.constant 0 : index
    %c1_89 = arith.constant 1 : index
    %c0_90 = arith.constant 0 : index
    %69 = tpu.strided_load %arg4[%c0_88, %c1_89, %c0_90] {strides = array<i32: 2, 2, 1>} : memref<18x18x32xf32, #tpu.memory_space<vmem>>, vector<8x8x32xf32>
    %70 = arith.maximumf %68, %69 : vector<8x8x32xf32>
    %c0_91 = arith.constant 0 : index
    %c2_92 = arith.constant 2 : index
    %c0_93 = arith.constant 0 : index
    %71 = tpu.strided_load %arg4[%c0_91, %c2_92, %c0_93] {strides = array<i32: 2, 2, 1>} : memref<18x18x32xf32, #tpu.memory_space<vmem>>, vector<8x8x32xf32>
    %72 = arith.maximumf %70, %71 : vector<8x8x32xf32>
    %c1_94 = arith.constant 1 : index
    %c0_95 = arith.constant 0 : index
    %c0_96 = arith.constant 0 : index
    %73 = tpu.strided_load %arg4[%c1_94, %c0_95, %c0_96] {strides = array<i32: 2, 2, 1>} : memref<18x18x32xf32, #tpu.memory_space<vmem>>, vector<8x8x32xf32>
    %74 = arith.maximumf %72, %73 : vector<8x8x32xf32>
    %c1_97 = arith.constant 1 : index
    %c1_98 = arith.constant 1 : index
    %c0_99 = arith.constant 0 : index
    %75 = tpu.strided_load %arg4[%c1_97, %c1_98, %c0_99] {strides = array<i32: 2, 2, 1>} : memref<18x18x32xf32, #tpu.memory_space<vmem>>, vector<8x8x32xf32>
    %76 = arith.maximumf %74, %75 : vector<8x8x32xf32>
    %c1_100 = arith.constant 1 : index
    %c2_101 = arith.constant 2 : index
    %c0_102 = arith.constant 0 : index
    %77 = tpu.strided_load %arg4[%c1_100, %c2_101, %c0_102] {strides = array<i32: 2, 2, 1>} : memref<18x18x32xf32, #tpu.memory_space<vmem>>, vector<8x8x32xf32>
    %78 = arith.maximumf %76, %77 : vector<8x8x32xf32>
    %c2_103 = arith.constant 2 : index
    %c0_104 = arith.constant 0 : index
    %c0_105 = arith.constant 0 : index
    %79 = tpu.strided_load %arg4[%c2_103, %c0_104, %c0_105] {strides = array<i32: 2, 2, 1>} : memref<18x18x32xf32, #tpu.memory_space<vmem>>, vector<8x8x32xf32>
    %80 = arith.maximumf %78, %79 : vector<8x8x32xf32>
    %c2_106 = arith.constant 2 : index
    %c1_107 = arith.constant 1 : index
    %c0_108 = arith.constant 0 : index
    %81 = tpu.strided_load %arg4[%c2_106, %c1_107, %c0_108] {strides = array<i32: 2, 2, 1>} : memref<18x18x32xf32, #tpu.memory_space<vmem>>, vector<8x8x32xf32>
    %82 = arith.maximumf %80, %81 : vector<8x8x32xf32>
    %c2_109 = arith.constant 2 : index
    %c2_110 = arith.constant 2 : index
    %c0_111 = arith.constant 0 : index
    %83 = tpu.strided_load %arg4[%c2_109, %c2_110, %c0_111] {strides = array<i32: 2, 2, 1>} : memref<18x18x32xf32, #tpu.memory_space<vmem>>, vector<8x8x32xf32>
    %84 = arith.maximumf %82, %83 : vector<8x8x32xf32>
    %85 = arith.truncf %84 : vector<8x8x32xf32> to vector<8x8x32xbf16>
    %c0_112 = arith.constant 0 : index
    %c0_113 = arith.constant 0 : index
    %c0_114 = arith.constant 0 : index
    %c0_115 = arith.constant 0 : index
    %86 = vector.load %arg3[%c0_112, %c0_113, %c0_114, %c0_115] : memref<1x8x8x32xbf16, #tpu.memory_space<vmem>>, vector<1x8x8x32xbf16>
    %87 = vector.shape_cast %86 : vector<1x8x8x32xbf16> to vector<8x8x32xbf16>
    %88 = vector.shape_cast %85 : vector<8x8x32xbf16> to vector<1x8x8x32xbf16>
    tpu.vector_store %arg3[%c0_112, %c0_113, %c0_114, %c0_115], %88 {strides = array<i32>} : memref<1x8x8x32xbf16, #tpu.memory_space<vmem>>, vector<1x8x8x32xbf16>,
    return
  }
  func.func @transform_0(%arg0: i32) -> (i32, i32, i32, i32) {
    %c0_i32 = arith.constant 0 : i32
    %c0_i32_0 = arith.constant 0 : i32
    %c0_i32_1 = arith.constant 0 : i32
    %c0_i32_2 = arith.constant 0 : i32
    return %arg0, %c0_i32, %c0_i32_0, %c0_i32_1 : i32, i32, i32, i32
  }
  func.func @transform_1(%arg0: i32) -> (i32, i32, i32, i32) {
    %c0_i32 = arith.constant 0 : i32
    %c0_i32_0 = arith.constant 0 : i32
    %c0_i32_1 = arith.constant 0 : i32
    %c0_i32_2 = arith.constant 0 : i32
    %c0_i32_3 = arith.constant 0 : i32
    return %c0_i32, %c0_i32_0, %c0_i32_1, %c0_i32_2 : i32, i32, i32, i32
  }
  func.func @transform_2(%arg0: i32) -> (i32, i32, i32, i32) {
    %c0_i32 = arith.constant 0 : i32
    %c0_i32_0 = arith.constant 0 : i32
    %c0_i32_1 = arith.constant 0 : i32
    %c0_i32_2 = arith.constant 0 : i32
    return %arg0, %c0_i32, %c0_i32_0, %c0_i32_1 : i32, i32, i32, i32
  }
}

</mosaic_0001>

<bundles_post_ra>
// kernel: tpu_custom_call.1
= control target key start
LH: loop header
LB: loop body
LE: loop exit
PB: predicated region body
PF: predicated region fallthrough
CT: control target
= control target key end

     0   :  { %7 = vsyncpa [#allocation4], 0  ;;  %s6880_s0 = inlined_call_operand.vmem [shape: bf16[2,18,18,3], index: 0, kind: input, shape index: {}]   ;;  %s6881_s1 = inlined_call_operand.vmem [shape: bf16[3,3,3,32], index: 1, kind: input, shape index: {}]   ;;  %s6882_s2 = inlined_call_operand.hbm [shape: bf16[2,8,8,32], index: 2, kind: output, shape index: {}]  }
   0x1   :  { %9 = vsyncpa [#allocation4 + $0x1], 0  ;;  %s5317_s9 = smov 0   ;;  %s5319_s10 = smov 0  }
   0x2   :  { %s5321_s11 = smov 0   ;;  %s5323_s12 = smov 0  }
   0x3 LB: > { %s5338_s13 = sadd.s32 4294967295, %s5296_s12   ;;  %s4493_s14 = sadd.s32 4294967294, %s5296_s12   ;;  %s5296_s12 = sphi %s5323_s12, %s6898_s12   ;;  %s5292_s11 = sphi %s5321_s11, %s6897_s11   ;;  %s5288_s10 = sphi %s5319_s10, %s6896_s10   ;;  %s5284_s9 = sphi %s5317_s9, %s6895_s9  }
   0x4   : > { %s5342_s15 = sadd.s32 1, %s5296_s12   ;;  %s69_s16 = sadd.s32 1, %s5292_s11 }
   0x5   : > { %s66_s17 = ssub.s32 %s5296_s12, %s5342_s15  ;;  %p79_p0 = scmp.ne.s32.totalorder %s5292_s11, %s5288_s10 }
   0x6   : > { %p67_p1 = scmp.eq.s32.totalorder %s66_s17, 0  ;;  %p80_p2 = scmp.eq.s32.totalorder %s5338_s13, 1 }
   0x7   : > { %p85_p3 = scmp.ne.s32.totalorder %s5288_s10, %s5284_s9  ;;  %p86_p4 = scmp.eq.s32.totalorder %s4493_s14, 1 }
   0x8   : > { %s5353_s18 = scalar_select %p67_p1, %s5292_s11, %s69_s16  }
   0x9   : > { %p5355_p5 = por %p80_p2, %p79_p0  ;;  %p5359_p6 = por %p86_p4, %p85_p3 }
   0xa   : > { %p4496_p7 = scmp.ge.s32.totalorder %s5296_s12, 1  ;;  %p115_p8 = scmp.lt.s32.totalorder %s5296_s12, 3 }
   0xc   : > { %p116_p9 = pnand %p4496_p7, %p115_p8 }
   0xe   : > { %119 = sbr.rel (%p116_p9) target bundleno = 782 (0x30e), region = 28 }
  0x13   : > { %v4499_v0 = vld [vmem:[%s6881_s1 + $0x2] sm:$0x3]  ;;  %vm734_vm0 = vcmask 1040384   ;;  %vm735_vm1 = vcmask 1041408   ;;  %p137_p10 = scmp.lt.s32.totalorder %s5338_s13, 1  ;;  %v5298_v1 = vmov 65535  }
  0x14   : > { %v736_v2 = vsel %vm734_vm0, 4294967295, %v5298_v1  ;;  %v4612_v4 = vld [vmem:[%s6881_s1 + $0x4] sm:$0x3]  ;;  %v4661_v7 = vld [vmem:[%s6881_s1 + $0x6] sm:$0x3]  ;;  %vm685_vm5 = vcmask 23552  }
  0x15   : > { %v5369_v3 = vsel %vm735_vm1, %v736_v2, 0  ;;  %s138_s23 = scalar_select %p137_p10, %s5338_s13, 1  ;;  %v231_v8 = vld [vmem:[%s6881_s1] sm:$0x3]  ;;  %v4790_v9 = vld [vmem:[%s6881_s1 + $0x8] sm:$0x3] }
  0x16   : > { %v739_v5 = vand.u32 %v4499_v0, %v5369_v3  ;;  %v1312_v6 = vand.u32 %v4612_v4, %v5369_v3  ;;  %v1599_v10 = vand.u32 %v4661_v7, %v5369_v3  ;;  %v959_v11 = vand.u32 %v5369_v3, %v231_v8  ;;  %s134_s25 = sand.u32 1, %s5288_s10   ;;  %s5136_s28 = sshll.u32 %s5338_s13, 5 }
  0x17   : > { %s5140_s4 = smul.u32 216, %s138_s23  ;;  %v2253_v12 = vand.u32 %v4790_v9, %v5369_v3  ;;  %vm248_vm2 = vsmask.f32 3328  ;;  %vm249_vm3 = vsmask.f32 7440  ;;  %vm1098_vm6 = vcmask 1042432   ;;  %s4381_s3 = scalar_lea.hbm %s6882_s2, %s5136_s28 }
  0x18   : > { %5137 = vmatpush.bf16.msra.mxu1 %v739_v5  ;;  %5138 = vmatpush.bf16.msra.mxu2 %v739_v5  ;;  %vm5404_vm4 = vmor %vm248_vm2, %vm249_vm3  ;;  %vm1099_vm7 = vcmask 1046532   ;;  %vm143_vm9 = vcmask 261120   ;;  %vm146_vm10 = vcmask 254976   ;;  %s4497_s26 = sshll.u32 %s134_s25, 5  ;;  %vm4360_vm11 = vcmask 257024   ;;  %s4384_s5 = sshll.u32 %s4381_s3, 4  ;;  %s4385_s5 = int_to_ptr.hbm [resolvable:$true] %s4384_s5 }
  0x19   : > { %5139 = vmatpush.bf16.msra.mxu3 %v739_v5  ;;  %748 = vmatpush.bf16.msra.mxu0 %v739_v5  ;;  %s5392_s7 = scalar_lea.vmem %s6880_s0, %s5140_s4  ;;  %vm5578_vm8 = vmor %vm1098_vm6, %vm1099_vm7  ;;  %s6663_s27 = scalar_lea.vmem [#allocation3], %s4497_s26 }
  0x1a   : > { %v207_v13 = vld [vmem:[%s5392_s7 + $0x30] sm:$0xf]  ;;  %v208_v14 = vld [vmem:[%s5392_s7 + $0x34] sm:$0xf]  ;;  %v236_v15 = vld [vmem:[%s5392_s7 + $0x38] sm:$0x1] }
  0x1b   : > { %v348_v16 = vshrl.u32 %v207_v13, 16  ;;  %v351_v17 = vshll.u32 %v207_v13, 16  ;;  %v357_v18 = vshll.u32 %v208_v14, 16  ;;  %v361_v19 = vshrl.u32 %v208_v14, 16  ;;  %v215_v20 = vld [vmem:[%s5392_s7 + $0x60] sm:$0xf] }
  0x1c   : > { %1321 = vmatpush.bf16.msrb.mxu2 %v1312_v6  ;;  %968 = vmatpush.bf16.msrb.mxu1 %v959_v11  ;;  %v367_v21 = vshll.u32 %v236_v15, 16  ;;  %v216_v22 = vld [vmem:[%s5392_s7 + $0x64] sm:$0xf]  ;;  %v240_v23 = vld [vmem:[%s5392_s7 + $0x68] sm:$0x1]  ;;  %v444_v24 = vshrl.u32 %v215_v20, 16 }
  0x1d   : > { %1608 = vmatpush.bf16.msrb.mxu3 %v1599_v10  ;;  %2262 = vmatpush.bf16.msrb.mxu0 %v2253_v12  ;;  %v350_v25 = vrot.slane %v348_v16, 4  ;;  %v353_v26 = vrot.slane %v351_v17, 5  ;;  %v359_v27 = vrot.slane %v357_v18, 5  ;;  %v363_v28 = vrot.slane %v361_v19, 4  ;;  %v223_v29 = vld [vmem:[%s5392_s7 + $0x90] sm:$0xf] }
  0x1e   : > { %v369_v30 = vrot.slane %v367_v21, 5  ;;  %v446_v31 = vrot.slane %v444_v24, 4  ;;  %v447_v32 = vshll.u32 %v215_v20, 16  ;;  %v453_v33 = vshll.u32 %v216_v22, 16  ;;  %v224_v38 = vld [vmem:[%s5392_s7 + $0x94] sm:$0xf] }
  0x1f   : > { %v354_v34 = vor.u32 %v353_v26, %v350_v25  ;;  %v364_v35 = vor.u32 %v363_v28, %v359_v27  ;;  %v457_v36 = vshrl.u32 %v216_v22, 16  ;;  %v463_v37 = vshll.u32 %v240_v23, 16  ;;  %v244_v48 = vld [vmem:[%s5392_s7 + $0x98] sm:$0x1]  ;;  %v199_v0 = vld [vmem:[%s5392_s7] sm:$0xf] }
  0x20   : > { %v449_v40 = vrot.slane %v447_v32, 5  ;;  %v455_v41 = vrot.slane %v453_v33, 5  ;;  %v540_v42 = vshrl.u32 %v223_v29, 16  ;;  %v543_v50 = vshll.u32 %v223_v29, 16  ;;  %v5417_v5 = vld [vmem:[%s5392_s7 + $0x4] sm:$0xf] }
  0x21   : > { %v355_v43 = vrot.slane %v354_v34, 4  ;;  %v365_v44 = vrot.slane %v364_v35, 4  ;;  %v459_v45 = vrot.slane %v457_v36, 4  ;;  %v465_v46 = vrot.slane %v463_v37, 5  ;;  %v5420_v6 = vld [vmem:[%s5392_s7 + $0x8] sm:$0x1] }
  0x22   : > { %v450_v47 = vor.u32 %v449_v40, %v446_v31  ;;  %v542_v49 = vrot.slane %v540_v42, 4  ;;  %v549_v51 = vshll.u32 %v224_v38, 16  ;;  %v553_v55 = vshrl.u32 %v224_v38, 16  ;;  %v209_v23 = vld [vmem:[%s5392_s7 + $0x3c] sm:$0xf]  ;;  %s4382_s4 = sshll.u32 %s6663_s27, 4  ;;  %s4383_s4 = int_to_ptr.vmem [resolvable:$true] %s4382_s4 }
  0x23   : > { %v360_v52 = vsel %vm5404_vm4, %v355_v43, %v359_v27  ;;  %v370_v53 = vsel %vm5404_vm4, %v365_v44, %v369_v30  ;;  %v460_v54 = vor.u32 %v459_v45, %v455_v41  ;;  %v545_v59 = vrot.slane %v543_v50, 5  ;;  %v5432_v24 = vld [vmem:[%s5392_s7 + $0x40] sm:$0xf]  ;;  %v5437_v29 = vld [vmem:[%s5392_s7 + $0x44] sm:$0x1]  ;;  %s4370_s13 = scalar_lea.sflag [#allocation4], %s134_s25 }
  0x24   : > { %v645_v56 = vunpack.c.l.b16 %v360_v52  ;;  %v646_v57 = vunpack.c.l.b16 %v370_v53  ;;  %v451_v58 = vrot.slane %v450_v47, 4  ;;  %v551_v61 = vrot.slane %v549_v51, 5  ;;  %v217_v37 = vld [vmem:[%s5392_s7 + $0x6c] sm:$0xf]  ;;  %v218_v47 = vld [vmem:[%s5392_s7 + $0x70] sm:$0xf] }
  0x25   : > { %v461_v60 = vrot.slane %v460_v54, 4  ;;  %v555_v62 = vrot.slane %v553_v55, 4  ;;  %v559_v63 = vshll.u32 %v244_v48, 16  ;;  %v546_v4 = vor.u32 %v545_v59, %v542_v49  ;;  %v241_v51 = vld [vmem:[%s5392_s7 + $0x74] sm:$0x1]  ;;  %s5248_s6 = sshra.s32 %s4385_s5, 4  ;;  %s5249_s6 = int_to_ptr.hbm [resolvable:$true] %s5248_s6 }
  0x26   : > { %v673_v1 = vpack.c.b16 %v646_v57, %v645_v56  ;;  %v456_v2 = vsel %vm5404_vm4, %v451_v58, %v455_v41  ;;  %v252_v13 = vshrl.u32 %v199_v0, 16  ;;  %v255_v14 = vshll.u32 %v199_v0, 16  ;;  %s5254_s16 = scalar_lea.hbm %s6882_s2, 64  ;;  %p5255_p0 = scmp.lt.s32.totalorder %s5249_s6, %s6882_s2 }
  0x27   : > { %v466_v7 = vsel %vm5404_vm4, %v461_v60, %v465_v46  ;;  %v653_v8 = vunpack.c.l.b16 %v456_v2  ;;  %v556_v9 = vor.u32 %v555_v62, %v551_v61  ;;  %v561_v10 = vrot.slane %v559_v63, 5 }
  0x28   : > { %4504 = vmatmul.msk.bf16.vlgmr.msra.gmra.mxu1 %vm685_vm5, %v673_v1  ;;  %v654_v11 = vunpack.c.l.b16 %v466_v7  ;;  %v547_v12 = vrot.slane %v546_v4, 4  ;;  %v261_v16 = vshll.u32 %v5417_v5, 16  ;;  %v265_v17 = vshrl.u32 %v5417_v5, 16  ;;  %v225_v1 = vld [vmem:[%s5392_s7 + $0x9c] sm:$0xf] }
  0x29   : > { %v557_v15 = vrot.slane %v556_v9, 4  ;;  %v271_v18 = vshll.u32 %v5420_v6, 16  ;;  %v254_v21 = vrot.slane %v252_v13, 4  ;;  %v257_v22 = vrot.slane %v255_v14, 5  ;;  %v245_v13 = vld [vmem:[%s5392_s7 + $0xa4] sm:$0x1] }
  0x2a   : > { %v677_v19 = vpack.c.b16 %v654_v11, %v653_v8  ;;  %v552_v20 = vsel %vm5404_vm4, %v547_v12, %v551_v61  ;;  %v263_v27 = vrot.slane %v261_v16, 5  ;;  %v267_v28 = vrot.slane %v265_v17, 4  ;;  %v226_v8 = vld [vmem:[%s5392_s7 + $0xa0] sm:$0xf] }
  0x2b   : > { %v562_v25 = vsel %vm5404_vm4, %v557_v15, %v561_v10  ;;  %v661_v26 = vunpack.c.l.b16 %v552_v20  ;;  %v258_v31 = vor.u32 %v257_v22, %v254_v21  ;;  %v273_v32 = vrot.slane %v271_v18, 5 }
  0x2c   : > { %4508 = vmatmul.msk.bf16.vlgmr.msra.gmra.mxu2 %vm685_vm5, %v677_v19  ;;  %v662_v30 = vunpack.c.l.b16 %v562_v25  ;;  %v268_v33 = vor.u32 %v267_v28, %v263_v27  ;;  %v372_v34 = vshrl.u32 %v209_v23, 16  ;;  %v375_v35 = vshll.u32 %v209_v23, 16 }
  0x2d   : > { %v381_v36 = vshll.u32 %v5432_v24, 16  ;;  %v259_v40 = vrot.slane %v258_v31, 4  ;;  %v385_v41 = vshrl.u32 %v5432_v24, 16  ;;  %v391_v42 = vshll.u32 %v5437_v29, 16 }
  0x2e   : > { %v681_v38 = vpack.c.b16 %v662_v30, %v661_v26  ;;  %v269_v43 = vrot.slane %v268_v33, 4  ;;  %v374_v44 = vrot.slane %v372_v34, 4  ;;  %v377_v45 = vrot.slane %v375_v35, 5  ;;  %v5463_v33 = vld [vmem:[%s5392_s7 + $0x10] sm:$0xf] }
  0x2f   : > { %v383_v46 = vrot.slane %v381_v36, 5  ;;  %v264_v48 = vsel %vm5404_vm4, %v259_v40, %v263_v27  ;;  %v387_v49 = vrot.slane %v385_v41, 4  ;;  %v393_v50 = vrot.slane %v391_v42, 5  ;;  %v201_v27 = vld [vmem:[%s5392_s7 + $0xc] sm:$0xf] }
  0x30   : > { %4512 = vmatmul.msk.bf16.vlgmr.msra.gmra.mxu3 %vm685_vm5, %v681_v38  ;;  %v468_v52 = vshrl.u32 %v217_v37, 16  ;;  %v274_v53 = vsel %vm5404_vm4, %v269_v43, %v273_v32  ;;  %v637_v54 = vunpack.c.l.b16 %v264_v48  ;;  %v378_v55 = vor.u32 %v377_v45, %v374_v44 }
  0x31   : > { %v471_v56 = vshll.u32 %v217_v37, 16  ;;  %v638_v57 = vunpack.c.l.b16 %v274_v53  ;;  %v388_v58 = vor.u32 %v387_v49, %v383_v46  ;;  %v477_v60 = vshll.u32 %v218_v47, 16  ;;  %v5466_v37 = vld [vmem:[%s5392_s7 + $0x14] sm:$0x1] }
  0x32   : > { %v470_v59 = vrot.slane %v468_v52, 4  ;;  %v379_v61 = vrot.slane %v378_v55, 4  ;;  %v481_v63 = vshrl.u32 %v218_v47, 16  ;;  %v487_v0 = vshll.u32 %v241_v51, 16  ;;  %v211_v47 = vld [vmem:[%s5392_s7 + $0x48] sm:$0xf] }
  0x33   : > { %v473_v62 = vrot.slane %v471_v56, 5  ;;  %v669_v2 = vpack.c.b16 %v638_v57, %v637_v54  ;;  %v389_v4 = vrot.slane %v388_v58, 4  ;;  %v479_v7 = vrot.slane %v477_v60, 5  ;;  %v5476_v52 = vld [vmem:[%s5392_s7 + $0x4c] sm:$0xf] }
  0x34   : > { %v384_v9 = vsel %vm5404_vm4, %v379_v61, %v383_v46  ;;  %v483_v11 = vrot.slane %v481_v63, 4  ;;  %v489_v12 = vrot.slane %v487_v0, 5  ;;  %v564_v16 = vshrl.u32 %v225_v1, 16  ;;  %v5481_v61 = vld [vmem:[%s5392_s7 + $0x50] sm:$0x1] }
  0x35   : > { %v474_v10 = vor.u32 %v473_v62, %v470_v59  ;;  %4500 = vmatmul.msk.bf16.vlgmr.msra.gmra.mxu0 %vm685_vm5, %v669_v2  ;;  %v394_v14 = vsel %vm5404_vm4, %v389_v4, %v393_v50  ;;  %v647_v15 = vunpack.c.l.b16 %v384_v9  ;;  %v567_v17 = vshll.u32 %v225_v1, 16  ;;  %v219_v9 = vld [vmem:[%s5392_s7 + $0x78] sm:$0xf] }
  0x36   : > { %v648_v18 = vunpack.c.l.b16 %v394_v14  ;;  %v484_v20 = vor.u32 %v483_v11, %v479_v7  ;;  %v573_v21 = vshll.u32 %v226_v8, 16  ;;  %v566_v22 = vrot.slane %v564_v16, 4  ;;  %v220_v14 = vld [vmem:[%s5392_s7 + $0x7c] sm:$0xf] }
  0x37   : > { %v475_v19 = vrot.slane %v474_v10, 4  ;;  %v569_v23 = vrot.slane %v567_v17, 5  ;;  %v577_v25 = vshrl.u32 %v226_v8, 16  ;;  %v583_v26 = vshll.u32 %v245_v13, 16 }
  0x38   : > { %v674_v28 = vpack.c.b16 %v648_v18, %v647_v15  ;;  %v485_v31 = vrot.slane %v484_v20, 4  ;;  %v575_v32 = vrot.slane %v573_v21, 5  ;;  %v276_v41 = vshrl.u32 %v201_v27, 16 }
  0x39   : > { %v480_v30 = vsel %vm5404_vm4, %v475_v19, %v479_v7  ;;  %v570_v35 = vor.u32 %v569_v23, %v566_v22  ;;  %v579_v36 = vrot.slane %v577_v25, 4  ;;  %v585_v40 = vrot.slane %v583_v26, 5  ;;  %v242_v22 = vld [vmem:[%s5392_s7 + $0x80] sm:$0x1] }
  0x3a   : > { %v655_v34 = vunpack.c.l.b16 %v480_v30  ;;  %4505 = vmatmul.msk.bf16.gmra.mxu1 %vm685_vm5, %v674_v28  ;;  %v490_v38 = vsel %vm5404_vm4, %v485_v31, %v489_v12  ;;  %v279_v42 = vshll.u32 %v201_v27, 16  ;;  %v285_v46 = vshll.u32 %v5463_v33, 16 }
  0x3b   : > { %v656_v43 = vunpack.c.l.b16 %v490_v38  ;;  %v571_v44 = vrot.slane %v570_v35, 4  ;;  %v580_v45 = vor.u32 %v579_v36, %v575_v32  ;;  %v278_v48 = vrot.slane %v276_v41, 4  ;;  %v227_v41 = vld [vmem:[%s5392_s7 + $0xa8] sm:$0xf] }
  0x3c   : > { %v281_v49 = vrot.slane %v279_v42, 5  ;;  %v289_v50 = vshrl.u32 %v5463_v33, 16  ;;  %v295_v51 = vshll.u32 %v5466_v37, 16  ;;  %v287_v56 = vrot.slane %v285_v46, 5  ;;  %v246_v46 = vld [vmem:[%s5392_s7 + $0xb0] sm:$0x1] }
  0x3d   : > { %v678_v53 = vpack.c.b16 %v656_v43, %v655_v34  ;;  %v576_v54 = vsel %vm5404_vm4, %v571_v44, %v575_v32  ;;  %v581_v55 = vrot.slane %v580_v45, 4  ;;  %v396_v63 = vshrl.u32 %v211_v47, 16  ;;  %v228_v45 = vld [vmem:[%s5392_s7 + $0xac] sm:$0xf] }
  0x3e   : > { %v663_v57 = vunpack.c.l.b16 %v576_v54  ;;  %v282_v58 = vor.u32 %v281_v49, %v278_v48  ;;  %v291_v59 = vrot.slane %v289_v50, 4  ;;  %v297_v60 = vrot.slane %v295_v51, 5 }
  0x3f   : > { %4509 = vmatmul.msk.bf16.gmra.mxu2 %vm685_vm5, %v678_v53  ;;  %v586_v62 = vsel %vm5404_vm4, %v581_v55, %v585_v40  ;;  %v399_v0 = vshll.u32 %v211_v47, 16  ;;  %v405_v1 = vshll.u32 %v5476_v52, 16  ;;  %v409_v8 = vshrl.u32 %v5476_v52, 16 }
  0x40   : > { %v664_v2 = vunpack.c.l.b16 %v586_v62  ;;  %v283_v4 = vrot.slane %v282_v58, 4  ;;  %v292_v7 = vor.u32 %v291_v59, %v287_v56  ;;  %v398_v10 = vrot.slane %v396_v63, 4 }
  0x41   : > { %v401_v11 = vrot.slane %v399_v0, 5  ;;  %v407_v12 = vrot.slane %v405_v1, 5  ;;  %v415_v13 = vshll.u32 %v5481_v61, 16  ;;  %v411_v18 = vrot.slane %v409_v8, 4  ;;  %v203_v1 = vld [vmem:[%s5392_s7 + $0x18] sm:$0xf] }
  0x42   : > { %v682_v15 = vpack.c.b16 %v664_v2, %v663_v57  ;;  %v288_v16 = vsel %vm5404_vm4, %v283_v4, %v287_v56  ;;  %v293_v17 = vrot.slane %v292_v7, 4  ;;  %v492_v23 = vshrl.u32 %v219_v9, 16  ;;  %v5509_v8 = vld [vmem:[%s5392_s7 + $0x1c] sm:$0xf] }
  0x43   : > { %v639_v19 = vunpack.c.l.b16 %v288_v16  ;;  %v402_v20 = vor.u32 %v401_v11, %v398_v10  ;;  %v417_v21 = vrot.slane %v415_v13, 5  ;;  %v412_v26 = vor.u32 %v411_v18, %v407_v12 }
  0x44   : > { %4513 = vmatmul.msk.bf16.gmra.mxu3 %vm685_vm5, %v682_v15  ;;  %v298_v25 = vsel %vm5404_vm4, %v293_v17, %v297_v60  ;;  %v495_v27 = vshll.u32 %v219_v9, 16  ;;  %v501_v28 = vshll.u32 %v220_v14, 16  ;;  %v494_v32 = vrot.slane %v492_v23, 4  ;;  %v5512_v9 = vld [vmem:[%s5392_s7 + $0x20] sm:$0x1] }
  0x45   : > { %v640_v30 = vunpack.c.l.b16 %v298_v25  ;;  %v403_v31 = vrot.slane %v402_v20, 4  ;;  %v505_v34 = vshrl.u32 %v220_v14, 16  ;;  %v413_v35 = vrot.slane %v412_v26, 4 }
  0x46   : > { %v497_v36 = vrot.slane %v495_v27, 5  ;;  %v503_v38 = vrot.slane %v501_v28, 5  ;;  %v511_v40 = vshll.u32 %v242_v22, 16  ;;  %v588_v54 = vshrl.u32 %v227_v41, 16  ;;  %v213_v22 = vld [vmem:[%s5392_s7 + $0x54] sm:$0xf] }
  0x47   : > { %v670_v42 = vpack.c.b16 %v640_v30, %v639_v19  ;;  %v408_v43 = vsel %vm5404_vm4, %v403_v31, %v407_v12  ;;  %v507_v44 = vrot.slane %v505_v34, 4  ;;  %v418_v47 = vsel %vm5404_vm4, %v413_v35, %v417_v21  ;;  %v5522_v28 = vld [vmem:[%s5392_s7 + $0x58] sm:$0xf]  ;;  %v5527_v35 = vld [vmem:[%s5392_s7 + $0x5c] sm:$0x1] }
  0x48   : > { %v649_v48 = vunpack.c.l.b16 %v408_v43  ;;  %v498_v49 = vor.u32 %v497_v36, %v494_v32  ;;  %v513_v50 = vrot.slane %v511_v40, 5  ;;  %v650_v51 = vunpack.c.l.b16 %v418_v47 }
  0x49   : > { %4501 = vmatmul.msk.bf16.gmra.mxu0 %vm685_vm5, %v670_v42  ;;  %v508_v53 = vor.u32 %v507_v44, %v503_v38  ;;  %v591_v55 = vshll.u32 %v227_v41, 16  ;;  %v597_v57 = vshll.u32 %v228_v45, 16  ;;  %v601_v58 = vshrl.u32 %v228_v45, 16 }
  0x4a   : > { %v499_v56 = vrot.slane %v498_v49, 4  ;;  %v607_v59 = vshll.u32 %v246_v46, 16  ;;  %v675_v60 = vpack.c.b16 %v650_v51, %v649_v48  ;;  %v590_v63 = vrot.slane %v588_v54, 4  ;;  %v221_v46 = vld [vmem:[%s5392_s7 + $0x84] sm:$0xf] }
  0x4b   : > { %v509_v62 = vrot.slane %v508_v53, 4  ;;  %v593_v0 = vrot.slane %v591_v55, 5  ;;  %v599_v4 = vrot.slane %v597_v57, 5  ;;  %v603_v7 = vrot.slane %v601_v58, 4 }
  0x4c   : > { %v504_v2 = vsel %vm5404_vm4, %v499_v56, %v503_v38  ;;  %4506 = vmatmul.msk.bf16.gmra.mxu1 %vm685_vm5, %v675_v60  ;;  %v609_v13 = vrot.slane %v607_v59, 5  ;;  %v300_v16 = vshrl.u32 %v203_v1, 16  ;;  %v303_v17 = vshll.u32 %v203_v1, 16  ;;  %v222_v56 = vld [vmem:[%s5392_s7 + $0x88] sm:$0xf] }
  0x4d   : > { %v514_v10 = vsel %vm5404_vm4, %v509_v62, %v513_v50  ;;  %v657_v11 = vunpack.c.l.b16 %v504_v2  ;;  %v594_v12 = vor.u32 %v593_v0, %v590_v63  ;;  %v604_v15 = vor.u32 %v603_v7, %v599_v4  ;;  %v243_v60 = vld [vmem:[%s5392_s7 + $0x8c] sm:$0x1] }
  0x4e   : > { %v658_v14 = vunpack.c.l.b16 %v514_v10  ;;  %v309_v19 = vshll.u32 %v5509_v8, 16  ;;  %v313_v20 = vshrl.u32 %v5509_v8, 16  ;;  %v319_v21 = vshll.u32 %v5512_v9, 16 }
  0x4f   : > { %v595_v18 = vrot.slane %v594_v12, 4  ;;  %v605_v25 = vrot.slane %v604_v15, 4  ;;  %v302_v26 = vrot.slane %v300_v16, 4  ;;  %v305_v27 = vrot.slane %v303_v17, 5  ;;  %v229_v16 = vld [vmem:[%s5392_s7 + $0xb4] sm:$0xf] }
  0x50   : > { %v679_v23 = vpack.c.b16 %v658_v14, %v657_v11  ;;  %v311_v31 = vrot.slane %v309_v19, 5  ;;  %v315_v32 = vrot.slane %v313_v20, 4  ;;  %v321_v34 = vrot.slane %v319_v21, 5  ;;  %v230_v20 = vld [vmem:[%s5392_s7 + $0xb8] sm:$0xf] }
  0x51   : > { %v600_v30 = vsel %vm5404_vm4, %v595_v18, %v599_v4  ;;  %v610_v36 = vsel %vm5404_vm4, %v605_v25, %v609_v13  ;;  %v306_v40 = vor.u32 %v305_v27, %v302_v26  ;;  %v420_v41 = vshrl.u32 %v213_v22, 16  ;;  %v247_v26 = vld [vmem:[%s5392_s7 + $0xbc] sm:$0x1] }
  0x52   : > { %4510 = vmatmul.msk.bf16.gmra.mxu2 %vm685_vm5, %v679_v23  ;;  %v665_v38 = vunpack.c.l.b16 %v600_v30  ;;  %v666_v42 = vunpack.c.l.b16 %v610_v36  ;;  %v316_v43 = vor.u32 %v315_v32, %v311_v31  ;;  %v423_v44 = vshll.u32 %v213_v22, 16 }
  0x53   : > { %v429_v45 = vshll.u32 %v5522_v28, 16  ;;  %v307_v47 = vrot.slane %v306_v40, 4  ;;  %v422_v48 = vrot.slane %v420_v41, 4  ;;  %v433_v49 = vshrl.u32 %v5522_v28, 16 }
  0x54   : > { %v439_v50 = vshll.u32 %v5527_v35, 16  ;;  %v683_v51 = vpack.c.b16 %v666_v42, %v665_v38  ;;  %v317_v53 = vrot.slane %v316_v43, 4  ;;  %v425_v54 = vrot.slane %v423_v44, 5 }
  0x55   : > { %v431_v55 = vrot.slane %v429_v45, 5  ;;  %v312_v57 = vsel %vm5404_vm4, %v307_v47, %v311_v31  ;;  %v435_v58 = vrot.slane %v433_v49, 4  ;;  %v516_v62 = vshrl.u32 %v221_v46, 16  ;;  %v205_v45 = vld [vmem:[%s5392_s7 + $0x24] sm:$0xf] }
  0x56   : > { %v441_v59 = vrot.slane %v439_v50, 5  ;;  %4514 = vmatmul.msk.bf16.gmra.mxu3 %vm685_vm5, %v683_v51  ;;  %v322_v63 = vsel %vm5404_vm4, %v317_v53, %v321_v34  ;;  %v641_v0 = vunpack.c.l.b16 %v312_v57  ;;  %v426_v1 = vor.u32 %v425_v54, %v422_v48  ;;  %v5555_v50 = vld [vmem:[%s5392_s7 + $0x28] sm:$0xf] }
  0x57   : > { %v519_v2 = vshll.u32 %v221_v46, 16  ;;  %v642_v4 = vunpack.c.l.b16 %v322_v63  ;;  %v436_v7 = vor.u32 %v435_v58, %v431_v55  ;;  %v518_v10 = vrot.slane %v516_v62, 4 }
  0x58   : > { %v525_v11 = vshll.u32 %v222_v56, 16  ;;  %v427_v12 = vrot.slane %v426_v1, 4  ;;  %v529_v14 = vshrl.u32 %v222_v56, 16  ;;  %v535_v15 = vshll.u32 %v243_v60, 16  ;;  %v5559_v56 = vld [vmem:[%s5392_s7 + $0x2c] sm:$0x1] }
  0x59   : > { %v521_v13 = vrot.slane %v519_v2, 5  ;;  %v671_v17 = vpack.c.b16 %v642_v4, %v641_v0  ;;  %v437_v18 = vrot.slane %v436_v7, 4  ;;  %v612_v31 = vshrl.u32 %v229_v16, 16 }
  0x5a   : > { %v527_v19 = vrot.slane %v525_v11, 5  ;;  %v432_v21 = vsel %vm5404_vm4, %v427_v12, %v431_v55  ;;  %v531_v23 = vrot.slane %v529_v14, 4  ;;  %v537_v25 = vrot.slane %v535_v15, 5  ;;  %v4742_v15 = vld [vmem:[%s5392_s7 + $0xc] sm:$0xf] }
  0x5b   : > { %v522_v22 = vor.u32 %v521_v13, %v518_v10  ;;  %4502 = vmatmul.msk.bf16.gmra.mxu0 %vm685_vm5, %v671_v17  ;;  %v442_v27 = vsel %vm5404_vm4, %v437_v18, %v441_v59  ;;  %v651_v30 = vunpack.c.l.b16 %v432_v21  ;;  %v615_v32 = vshll.u32 %v229_v16, 16  ;;  %v1050_v10 = vld [vmem:[%s5392_s7] sm:$0xe]  ;;  %v4743_v21 = vld [vmem:[%s5392_s7 + $0x10] sm:$0xf] }
  0x5c   : > { %v652_v34 = vunpack.c.l.b16 %v442_v27  ;;  %v532_v38 = vor.u32 %v531_v23, %v527_v19  ;;  %v621_v40 = vshll.u32 %v230_v20, 16  ;;  %v614_v41 = vrot.slane %v612_v31, 4 }
  0x5d   : > { %v523_v36 = vrot.slane %v522_v22, 4  ;;  %v617_v42 = vrot.slane %v615_v32, 5  ;;  %v625_v43 = vshrl.u32 %v230_v20, 16  ;;  %v631_v44 = vshll.u32 %v247_v26, 16  ;;  %v4888_v20 = vld [vmem:[%s6881_s1 + $0xc] sm:$0x3] }
  0x5e   : > { %v676_v46 = vpack.c.b16 %v652_v34, %v651_v30  ;;  %v533_v48 = vrot.slane %v532_v38, 4  ;;  %v623_v49 = vrot.slane %v621_v40, 5  ;;  %v1106_v51 = vrot.slane %v5420_v6, 5 }
  0x5f   : > { %v528_v47 = vsel %vm5404_vm4, %v523_v36, %v527_v19  ;;  %v618_v54 = vor.u32 %v617_v42, %v614_v41  ;;  %v627_v55 = vrot.slane %v625_v43, 4  ;;  %v633_v58 = vrot.slane %v631_v44, 5 }
  0x60   : > { %v659_v53 = vunpack.c.l.b16 %v528_v47  ;;  %4507 = vmatmul.msk.bf16.gmra.mxu1 %vm685_vm5, %v676_v46  ;;  %v538_v57 = vsel %vm5404_vm4, %v533_v48, %v537_v25  ;;  %v324_v59 = vshrl.u32 %v205_v45, 16  ;;  %v327_v60 = vshll.u32 %v205_v45, 16  ;;  %v4744_v47 = vld [vmem:[%s5392_s7 + $0x14] sm:$0x1] }
  0x61   : > { %v660_v62 = vunpack.c.l.b16 %v538_v57  ;;  %v619_v63 = vrot.slane %v618_v54, 4  ;;  %v628_v0 = vor.u32 %v627_v55, %v623_v49  ;;  %v333_v6 = vshll.u32 %v5555_v50, 16  ;;  %v5017_v55 = vld [vmem:[%s6881_s1 + $0xe] sm:$0x3] }
  0x62   : > { %v326_v1 = vrot.slane %v324_v59, 4  ;;  %v329_v2 = vrot.slane %v327_v60, 5  ;;  %v337_v4 = vshrl.u32 %v5555_v50, 16  ;;  %v343_v7 = vshll.u32 %v5559_v56, 16  ;;  %v4839_v59 = vld [vmem:[%s6881_s1 + $0xa] sm:$0x3] }
  0x63   : > { %v680_v11 = vpack.c.b16 %v660_v62, %v659_v53  ;;  %v624_v12 = vsel %vm5404_vm4, %v619_v63, %v623_v49  ;;  %v629_v13 = vrot.slane %v628_v0, 4  ;;  %v335_v14 = vrot.slane %v333_v6, 5  ;;  %v5088_v60 = vld [vmem:[%s5392_s7] sm:$0xff] }
  0x64   : > { %v667_v16 = vunpack.c.l.b16 %v624_v12  ;;  %v330_v17 = vor.u32 %v329_v2, %v326_v1  ;;  %v339_v18 = vrot.slane %v337_v4, 4  ;;  %v345_v19 = vrot.slane %v343_v7, 5  ;;  %v5066_v1 = vld [vmem:[%s6881_s1 + $0x10] sm:$0x3] }
  0x65   : > { %4511 = vmatmul.msk.bf16.gmra.mxu2 %vm685_vm5, %v680_v11  ;;  %v634_v22 = vsel %vm5404_vm4, %v629_v13, %v633_v58  ;;  %v4596_v23 = vrot.slane %v1050_v10, 9  ;;  %v1103_v31 = vrot.slane %v5417_v5, 5  ;;  %v2938_v32 = vand.u32 %v4888_v20, %v5369_v3 }
  0x66   : > { %v668_v25 = vunpack.c.l.b16 %v634_v22  ;;  %v331_v26 = vrot.slane %v330_v17, 4  ;;  %v340_v27 = vor.u32 %v339_v18, %v335_v14  ;;  %v1771_v34 = vshrl.u32 %v4742_v15, 16  ;;  %v1051_v18 = vld [vmem:[%s5392_s7 + $0xc] sm:$0xe] }
  0x67   : > { %v1774_v36 = vshll.u32 %v4742_v15, 16  ;;  %v1780_v38 = vshll.u32 %v4743_v21, 16  ;;  %v1104_v43 = vsel %vm5578_vm8, %v4596_v23, %v1103_v31  ;;  %v1105_v45 = vrot.slane %v1103_v31, 4  ;;  %2947 = vmatpush.bf16.msra.mxu2 %v2938_v32  ;;  %v4745_v15 = vld [vmem:[%s5392_s7 + $0x18] sm:$0xf] }
  0x68   : > { %v684_v40 = vpack.c.b16 %v668_v25, %v667_v16  ;;  %v336_v41 = vsel %vm5404_vm4, %v331_v26, %v335_v14  ;;  %v341_v42 = vrot.slane %v340_v27, 4  ;;  %v1215_v46 = vunpack.c.l.b16 %v1104_v43  ;;  %v4746_v16 = vld [vmem:[%s5392_s7 + $0x1c] sm:$0xf]  ;;  %v5104_v25 = vld [vmem:[%s5392_s7 + $0xc] sm:$0xff] }
  0x69   : > { %v643_v44 = vunpack.c.l.b16 %v336_v41  ;;  %v1773_v5 = vrot.slane %v1771_v34, 4  ;;  %v1776_v49 = vrot.slane %v1774_v36, 5  ;;  %v1782_v53 = vrot.slane %v1780_v38, 5  ;;  %v4747_v41 = vld [vmem:[%s5392_s7 + $0x20] sm:$0x1] }
  0x6a   : > { %4515 = vmatmul.msk.bf16.gmra.mxu3 %vm685_vm5, %v684_v40  ;;  %v346_v48 = vsel %vm5404_vm4, %v341_v42, %v345_v19  ;;  %v1784_v54 = vshrl.u32 %v4743_v21, 16  ;;  %v1107_v58 = vsel %vm5578_vm8, %v1105_v45, %v1106_v51  ;;  %v1790_v6 = vshll.u32 %v4744_v47, 16  ;;  %v5089_v45 = vld [vmem:[%s5392_s7 + $0xc] sm:$0xff] }
  0x6b   : > { %v644_v57 = vunpack.c.l.b16 %v346_v48  ;;  %v1216_v62 = vunpack.c.l.b16 %v1107_v58  ;;  %v1777_v63 = vor.u32 %v1776_v49, %v1773_v5  ;;  %v3592_v4 = vand.u32 %v5017_v55, %v5369_v3 }
  0x6c   : > { %v1786_v0 = vrot.slane %v1784_v54, 4  ;;  %v2651_v10 = vand.u32 %v4839_v59, %v5369_v3  ;;  %v3990_v11 = vand.u32 %v5066_v1, %v5369_v3  ;;  %v1792_v14 = vrot.slane %v1790_v6, 5  ;;  %v1052_v59 = vld [vmem:[%s5392_s7 + $0x18] sm:$0xe] }
  0x6d   : > { %v672_v2 = vpack.c.b16 %v644_v57, %v643_v44  ;;  %v1247_v51 = vpack.c.b16 %v1216_v62, %v1215_v46  ;;  %3601 = vmatpush.bf16.msra.mxu3 %v3592_v4  ;;  %v1778_v12 = vrot.slane %v1777_v63, 4  ;;  %v1110_v17 = vrot.slane %v5463_v33, 5  ;;  %v4749_v57 = vld [vmem:[%s5392_s7 + $0x28] sm:$0xf] }
  0x6e   : > { %v1787_v7 = vor.u32 %v1786_v0, %v1782_v53  ;;  %2660 = vmatpush.bf16.msra.mxu1 %v2651_v10  ;;  %3999 = vmatpush.bf16.msra.mxu0 %v3990_v11  ;;  %v1795_v19 = vshrl.u32 %v4745_v15, 16  ;;  %v1798_v20 = vshll.u32 %v4745_v15, 16  ;;  %v1804_v22 = vshll.u32 %v4746_v16, 16 }
  0x6f   : > { %4503 = vmatmul.msk.bf16.gmra.mxu0 %vm685_vm5, %v672_v2  ;;  %v1783_v21 = vsel %vm5404_vm4, %v1778_v12, %v1782_v53  ;;  %v1808_v23 = vshrl.u32 %v4746_v16, 16  ;;  %v4597_v26 = vrot.slane %v1051_v18, 9  ;;  %v1112_v27 = vrot.slane %v1110_v17, 4  ;;  %v4748_v53 = vld [vmem:[%s5392_s7 + $0x24] sm:$0xf] }
  0x70   : > { %4580 = vmatmul.msk.bf16.vlgmr.msrb.gmra.mxu1 %vm685_vm5, %v5088_v60  ;;  %v1788_v13 = vrot.slane %v1787_v7, 4  ;;  %v1113_v33 = vrot.slane %v5466_v37, 5  ;;  %v2156_v31 = vunpack.c.l.b16 %v1783_v21  ;;  %v1797_v34 = vrot.slane %v1795_v19, 4  ;;  %v4750_v16 = vld [vmem:[%s5392_s7 + $0x2c] sm:$0x1] }
  0x71   : > { %v1800_v36 = vrot.slane %v1798_v20, 5  ;;  %v1806_v38 = vrot.slane %v1804_v22, 5  ;;  %v1810_v40 = vrot.slane %v1808_v23, 4  ;;  %v1111_v42 = vsel %vm5578_vm8, %v4597_v26, %v1110_v17 }
  0x72   : > { %v1793_v3 = vsel %vm5404_vm4, %v1788_v13, %v1792_v14  ;;  %v1114_v43 = vsel %vm5578_vm8, %v1112_v27, %v1113_v33  ;;  %v1814_v47 = vshll.u32 %v4747_v41, 16  ;;  %v1217_v5 = vunpack.c.l.b16 %v1111_v42 }
  0x73   : > { %v2157_v32 = vunpack.c.l.b16 %v1793_v3  ;;  %v1801_v37 = vor.u32 %v1800_v36, %v1797_v34  ;;  %v1811_v46 = vor.u32 %v1810_v40, %v1806_v38  ;;  %v1218_v48 = vunpack.c.l.b16 %v1114_v43  ;;  %v5090_v3 = vld [vmem:[%s5392_s7 + $0x18] sm:$0xff]  ;;  %v1053_v40 = vld [vmem:[%s5392_s7 + $0x24] sm:$0xe] }
  0x74   : > { %v1816_v55 = vrot.slane %v1814_v47, 5  ;;  %v1117_v60 = vrot.slane %v5509_v8, 5  ;;  %v1819_v62 = vshrl.u32 %v4748_v53, 16  ;;  %v1822_v0 = vshll.u32 %v4748_v53, 16 }
  0x75   : > { %4613 = vmatmul.msk.bf16.vlgmr.msrb.gmra.mxu2 %vm685_vm5, %v1247_v51  ;;  %v2188_v44 = vpack.c.b16 %v2157_v32, %v2156_v31  ;;  %v1802_v49 = vrot.slane %v1801_v37, 4  ;;  %v1812_v54 = vrot.slane %v1811_v46, 4  ;;  %v1248_v58 = vpack.c.b16 %v1218_v48, %v1217_v5  ;;  %v5105_v51 = vld [vmem:[%s5392_s7 + $0x18] sm:$0xff]  ;;  %v4751_v31 = vld [vmem:[%s5392_s7 + $0x30] sm:$0xf]  ;;  %v5106_v37 = vld [vmem:[%s5392_s7 + $0x24] sm:$0xff] }
  0x76   : > { %v1828_v6 = vshll.u32 %v4749_v57, 16  ;;  %v1832_v1 = vshrl.u32 %v4749_v57, 16  ;;  %v4598_v4 = vrot.slane %v1052_v59, 9  ;;  %v1119_v10 = vrot.slane %v1117_v60, 4  ;;  %v4752_v32 = vld [vmem:[%s5392_s7 + $0x34] sm:$0xf] }
  0x77   : > { %v1807_v63 = vsel %vm5404_vm4, %v1802_v49, %v1806_v38  ;;  %v1817_v2 = vsel %vm5404_vm4, %v1812_v54, %v1816_v55  ;;  %v1120_v8 = vrot.slane %v5512_v9, 5  ;;  %v1821_v11 = vrot.slane %v1819_v62, 4  ;;  %v4753_v55 = vld [vmem:[%s5392_s7 + $0x38] sm:$0x1] }
  0x78   : > { %v2158_v7 = vunpack.c.l.b16 %v1807_v63  ;;  %v2159_v12 = vunpack.c.l.b16 %v1817_v2  ;;  %v1824_v13 = vrot.slane %v1822_v0, 5  ;;  %v1830_v14 = vrot.slane %v1828_v6, 5  ;;  %v4755_v2 = vld [vmem:[%s5392_s7 + $0x40] sm:$0xf] }
  0x79   : > { %v1834_v15 = vrot.slane %v1832_v1, 4  ;;  %v1118_v17 = vsel %vm5578_vm8, %v4598_v4, %v1117_v60  ;;  %v1121_v18 = vsel %vm5578_vm8, %v1119_v10, %v1120_v8  ;;  %v1838_v9 = vshll.u32 %v4750_v16, 16  ;;  %v4754_v1 = vld [vmem:[%s5392_s7 + $0x3c] sm:$0xf]  ;;  %v5184_v8 = vld [vmem:[%s5392_s7 + $0x34] sm:$0xf] }
  0x7a   : > { %4726 = vmatmul.msk.bf16.vlgmr.msrb.gmra.mxu3 %vm685_vm5, %v5104_v25  ;;  %v2189_v19 = vpack.c.b16 %v2159_v12, %v2158_v7  ;;  %v1825_v20 = vor.u32 %v1824_v13, %v1821_v11  ;;  %v1219_v22 = vunpack.c.l.b16 %v1118_v17  ;;  %v1220_v23 = vunpack.c.l.b16 %v1121_v18  ;;  %v1054_v12 = vld [vmem:[%s5392_s7 + $0x30] sm:$0xe] }
  0x7b   : > { %v1835_v21 = vor.u32 %v1834_v15, %v1830_v14  ;;  %v1840_v27 = vrot.slane %v1838_v9, 5  ;;  %v1124_v34 = vrot.slane %v5555_v50, 5  ;;  %v1843_v41 = vshrl.u32 %v4751_v31, 16  ;;  %v5185_v9 = vld [vmem:[%s5392_s7 + $0x38] sm:$0x1] }
  0x7c   : > { %v1826_v25 = vrot.slane %v1825_v20, 4  ;;  %v1249_v33 = vpack.c.b16 %v1220_v23, %v1219_v22  ;;  %v1846_v42 = vshll.u32 %v4751_v31, 16  ;;  %v1852_v43 = vshll.u32 %v4752_v32, 16  ;;  %v5107_v22 = vld [vmem:[%s5392_s7 + $0x30] sm:$0xff] }
  0x7d   : > { %v1836_v26 = vrot.slane %v1835_v21, 4  ;;  %v1126_v46 = vrot.slane %v1124_v34, 4  ;;  %v1127_v50 = vrot.slane %v5559_v56, 5  ;;  %v1845_v48 = vrot.slane %v1843_v41, 4  ;;  %v5091_v56 = vld [vmem:[%s5392_s7 + $0x24] sm:$0xff] }
  0x7e   : > { %v1831_v36 = vsel %vm5404_vm4, %v1826_v25, %v1830_v14  ;;  %v1848_v49 = vrot.slane %v1846_v42, 5  ;;  %v1854_v53 = vrot.slane %v1852_v43, 5  ;;  %v1862_v63 = vshll.u32 %v4753_v55, 16  ;;  %v5092_v43 = vld [vmem:[%s5392_s7 + $0x30] sm:$0xff] }
  0x7f   : > { %4791 = vmatmul.msk.bf16.vlgmr.msrb.gmra.mxu0 %vm685_vm5, %v2188_v44  ;;  %v1841_v38 = vsel %vm5404_vm4, %v1836_v26, %v1840_v27  ;;  %v1856_v44 = vshrl.u32 %v4752_v32, 16  ;;  %v2160_v47 = vunpack.c.l.b16 %v1831_v36  ;;  %v1131_v11 = vrot.slane %v5184_v8, 5  ;;  %v4756_v32 = vld [vmem:[%s5392_s7 + $0x44] sm:$0x1] }
  0x80   : > { %4581 = vmatmul.msk.bf16.gmra.mxu1 %vm685_vm5, %v5089_v45  ;;  %v4599_v45 = vrot.slane %v1053_v40, 9  ;;  %v2161_v5 = vunpack.c.l.b16 %v1841_v38  ;;  %v1849_v60 = vor.u32 %v1848_v49, %v1845_v48  ;;  %v1864_v7 = vrot.slane %v1862_v63, 5  ;;  %v4757_v48 = vld [vmem:[%s5392_s7 + $0x48] sm:$0xf]  ;;  %v4758_v49 = vld [vmem:[%s5392_s7 + $0x4c] sm:$0xf] }
  0x81   : > { %v1858_v54 = vrot.slane %v1856_v44, 4  ;;  %v1867_v13 = vshrl.u32 %v4754_v1, 16  ;;  %v1870_v14 = vshll.u32 %v4754_v1, 16  ;;  %v1876_v15 = vshll.u32 %v4755_v2, 16  ;;  %v5108_v1 = vld [vmem:[%s5392_s7 + $0x3c] sm:$0xff] }
  0x82   : > { %v1125_v57 = vsel %vm5578_vm8, %v4599_v45, %v1124_v34  ;;  %v2190_v59 = vpack.c.b16 %v2161_v5, %v2160_v47  ;;  %v1850_v4 = vrot.slane %v1849_v60, 4  ;;  %v1880_v16 = vshrl.u32 %v4755_v2, 16 }
  0x83   : > { %v1859_v62 = vor.u32 %v1858_v54, %v1854_v53  ;;  %v1221_v0 = vunpack.c.l.b16 %v1125_v57  ;;  %v4600_v20 = vrot.slane %v1054_v12, 9  ;;  %v1133_v21 = vrot.slane %v1131_v11, 4 }
  0x84   : > { %v1855_v18 = vsel %vm5404_vm4, %v1850_v4, %v1854_v53  ;;  %v1869_v23 = vrot.slane %v1867_v13, 4  ;;  %v1872_v25 = vrot.slane %v1870_v14, 5  ;;  %v1878_v26 = vrot.slane %v1876_v15, 5  ;;  %v4759_v14 = vld [vmem:[%s5392_s7 + $0x50] sm:$0x1] }
  0x85   : > { %4614 = vmatmul.msk.bf16.gmra.mxu2 %vm685_vm5, %v1248_v58  ;;  %v1128_v58 = vsel %vm5578_vm8, %v1126_v46, %v1127_v50  ;;  %v1882_v27 = vrot.slane %v1880_v16, 4  ;;  %v1132_v34 = vsel %vm5578_vm8, %v4600_v20, %v1131_v11  ;;  %v1886_v41 = vshll.u32 %v4756_v32, 16 }
  0x86   : > { %v1222_v6 = vunpack.c.l.b16 %v1128_v58  ;;  %v1873_v38 = vor.u32 %v1872_v25, %v1869_v23  ;;  %v1891_v60 = vshrl.u32 %v4757_v48, 16  ;;  %v1900_v63 = vshll.u32 %v4758_v49, 16 }
  0x87   : > { %v1883_v40 = vor.u32 %v1882_v27, %v1878_v26  ;;  %v1888_v5 = vrot.slane %v1886_v41, 5 }
  0x88   : > { %v1250_v10 = vpack.c.b16 %v1222_v6, %v1221_v0  ;;  %v1874_v50 = vrot.slane %v1873_v38, 4  ;;  %v1904_v0 = vshrl.u32 %v4758_v49, 16  ;;  %v1902_v12 = vrot.slane %v1900_v63, 5 }
  0x89   : > { %v1884_v47 = vrot.slane %v1883_v40, 4  ;;  %v1145_v38 = vrot.slane %v5476_v52, 5 }
  0x8a   : > { %4727 = vmatmul.msk.bf16.gmra.mxu3 %vm685_vm5, %v5105_v51  ;;  %v1860_v51 = vrot.slane %v1859_v62, 4  ;;  %v1879_v55 = vsel %vm5404_vm4, %v1874_v50, %v1878_v26  ;;  %v1894_v62 = vshll.u32 %v4757_v48, 16  ;;  %v1906_v13 = vrot.slane %v1904_v0, 4  ;;  %v4762_v0 = vld [vmem:[%s5392_s7 + $0x5c] sm:$0x1] }
  0x8b   : > { %v1889_v57 = vsel %vm5404_vm4, %v1884_v47, %v1888_v5  ;;  %v2164_v6 = vunpack.c.l.b16 %v1879_v55  ;;  %v5109_v5 = vld [vmem:[%s5392_s7 + $0x48] sm:$0xff]  ;;  %v1147_v49 = vrot.slane %v1145_v38, 4 }
  0x8c   : > { %v2165_v2 = vunpack.c.l.b16 %v1889_v57  ;;  %v1896_v11 = vrot.slane %v1894_v62, 5  ;;  %v1907_v20 = vor.u32 %v1906_v13, %v1902_v12 }
  0x8e   : > { %v1908_v26 = vrot.slane %v1907_v20, 4 }
  0x8f   : > { %4792 = vmatmul.msk.bf16.gmra.mxu0 %vm685_vm5, %v2189_v19  ;;  %v1865_v19 = vsel %vm5404_vm4, %v1860_v51, %v1864_v7 }
  0x90   : > { %4582 = vmatmul.msk.bf16.gmra.mxu1 %vm685_vm5, %v5090_v3  ;;  %v1134_v3 = vrot.slane %v5185_v9, 5  ;;  %v2163_v31 = vunpack.c.l.b16 %v1865_v19 }
  0x92   : > { %v1135_v36 = vsel %vm5578_vm8, %v1133_v21, %v1134_v3  ;;  %v1910_v21 = vshll.u32 %v4759_v14, 16  ;;  %v5093_v3 = vld [vmem:[%s5392_s7 + $0x3c] sm:$0xff] }
  0x93   : > { %v1224_v45 = vunpack.c.l.b16 %v1135_v36  ;;  %v4761_v36 = vld [vmem:[%s5392_s7 + $0x58] sm:$0xf]  ;;  %v4763_v14 = vld [vmem:[%s5392_s7 + $0x60] sm:$0xf] }
  0x94   : > { %v1912_v27 = vrot.slane %v1910_v21, 5  ;;  %v1928_v50 = vshrl.u32 %v4761_v36, 16 }
  0x95   : > { %4615 = vmatmul.msk.bf16.gmra.mxu2 %vm685_vm5, %v1249_v33  ;;  %v2162_v33 = vunpack.c.l.b16 %v1855_v18  ;;  %v2192_v18 = vpack.c.b16 %v2165_v2, %v2164_v6 }
  0x96   : > { %v1913_v41 = vsel %vm5404_vm4, %v1908_v26, %v1912_v27  ;;  %v1930_v62 = vrot.slane %v1928_v50, 4 }
  0x97   : > { %v2191_v42 = vpack.c.b16 %v2163_v31, %v2162_v33  ;;  %v2167_v57 = vunpack.c.l.b16 %v1913_v41 }
  0x9a   : > { %4728 = vmatmul.msk.bf16.gmra.mxu3 %vm685_vm5, %v5106_v37  ;;  %v1223_v37 = vunpack.c.l.b16 %v1132_v34  ;;  %v4760_v34 = vld [vmem:[%s5392_s7 + $0x54] sm:$0xf] }
  0x9c   : > { %v1251_v54 = vpack.c.b16 %v1224_v45, %v1223_v37  ;;  %v1918_v37 = vshll.u32 %v4760_v34, 16  ;;  %v1924_v45 = vshll.u32 %v4761_v36, 16 }
  0x9f   : > { %4793 = vmatmul.msk.bf16.gmra.mxu0 %vm685_vm5, %v2190_v59  ;;  %v1138_v59 = vrot.slane %v5432_v24, 5  ;;  %v1893_v24 = vrot.slane %v1891_v60, 4  ;;  %v1926_v60 = vrot.slane %v1924_v45, 5  ;;  %v1155_v45 = vrot.slane %v5527_v35, 5 }
  0xa0   : > { %4583 = vmatmul.msk.bf16.gmra.mxu1 %vm685_vm5, %v5091_v56  ;;  %v1055_v56 = vld [vmem:[%s5392_s7 + $0x3c] sm:$0xe] }
  0xa1   : > { %v4601_v51 = vrot.slane %v1055_v56, 9  ;;  %v1140_v7 = vrot.slane %v1138_v59, 4  ;;  %v1920_v56 = vrot.slane %v1918_v37, 5 }
  0xa3   : > { %v1139_v15 = vsel %vm5578_vm8, %v4601_v51, %v1138_v59  ;;  %v5094_v51 = vld [vmem:[%s5392_s7 + $0x48] sm:$0xff] }
  0xa5   : > { %v5673_v17 = vpop.f32.mrf.mxu1  ;;  %4616 = vmatmul.msk.bf16.gmra.mxu2 %vm685_vm5, %v1250_v10  ;;  %v1141_v10 = vrot.slane %v5437_v29, 5  ;;  %v1897_v29 = vor.u32 %v1896_v11, %v1893_v24  ;;  %v1934_v24 = vshll.u32 %v4762_v0, 16  ;;  %v5095_v0 = vld [vmem:[%s5392_s7 + $0x54] sm:$0xff] }
  0xa7   : > { %v1142_v16 = vsel %vm5578_vm8, %v1140_v7, %v1141_v10  ;;  %v1898_v25 = vrot.slane %v1897_v29, 4  ;;  %v1931_v10 = vor.u32 %v1930_v62, %v1926_v60  ;;  %v1936_v20 = vrot.slane %v1934_v24, 5 }
  0xa8   : > { %v1226_v23 = vunpack.c.l.b16 %v1142_v16 }
  0xa9   : > { %v1903_v40 = vsel %vm5404_vm4, %v1898_v25, %v1902_v12  ;;  %v1932_v29 = vrot.slane %v1931_v10, 4  ;;  %v1152_v25 = vrot.slane %v5522_v28, 5 }
  0xaa   : > { %4729 = vmatmul.msk.bf16.gmra.mxu3 %vm685_vm5, %v5107_v22  ;;  %v1225_v22 = vunpack.c.l.b16 %v1139_v15  ;;  %v2166_v55 = vunpack.c.l.b16 %v1903_v40  ;;  %v4764_v15 = vld [vmem:[%s5392_s7 + $0x64] sm:$0xf] }
  0xab   : > { %v1952_v26 = vshrl.u32 %v4764_v15, 16  ;;  %v1937_v36 = vsel %vm5404_vm4, %v1932_v29, %v1936_v20  ;;  %v1154_v37 = vrot.slane %v1152_v25, 4  ;;  %v5186_v20 = vld [vmem:[%s5392_s7 + $0x64] sm:$0xf] }
  0xac   : > { %v1252_v31 = vpack.c.b16 %v1226_v23, %v1225_v22  ;;  %v2193_v2 = vpack.c.b16 %v2167_v57, %v2166_v55  ;;  %v1942_v22 = vshll.u32 %v4763_v14, 16  ;;  %v1948_v23 = vshll.u32 %v4764_v15, 16 }
  0xad   : > { %v5689_v44 = vpop.f32.mrf.mxu1  ;;  %v1954_v50 = vrot.slane %v1952_v26, 4 }
  0xae   : > { %v1944_v41 = vrot.slane %v1942_v22, 5  ;;  %v1058_v22 = vld [vmem:[%s5392_s7 + $0x60] sm:$0xe] }
  0xaf   : > { %v5691_v46 = vpop.f32.mrf.mxu2  ;;  %4794 = vmatmul.msk.bf16.gmra.mxu0 %vm685_vm5, %v2191_v42  ;;  %v1056_v42 = vld [vmem:[%s5392_s7 + $0x48] sm:$0xe] }
  0xb0   : > { %4584 = vmatmul.msk.bf16.gmra.mxu1 %vm685_vm5, %v5092_v43  ;;  %v1915_v43 = vshrl.u32 %v4760_v34, 16  ;;  %v4602_v52 = vrot.slane %v1056_v42, 9  ;;  %v1950_v42 = vrot.slane %v1948_v23, 5 }
  0xb2   : > { %v5697_v53 = vpop.f32.mrf.mxu0  ;;  %v1917_v59 = vrot.slane %v1915_v43, 4  ;;  %v5110_v43 = vld [vmem:[%s5392_s7 + $0x54] sm:$0xff]  ;;  %v1955_v35 = vor.u32 %v1954_v50, %v1950_v42 }
  0xb3   : > { %v5703_v58 = vpop.f32.mrf.mxu3 }
  0xb4   : > { %v1921_v7 = vor.u32 %v1920_v56, %v1917_v59  ;;  %v1156_v56 = vsel %vm5578_vm8, %v1154_v37, %v1155_v45  ;;  %v1956_v10 = vrot.slane %v1955_v35, 4 }
  0xb5   : > { %4617 = vmatmul.msk.bf16.gmra.mxu2 %vm685_vm5, %v1251_v54  ;;  %v1148_v54 = vrot.slane %v5481_v61, 5 }
  0xb7   : > { %v5709_v4 = vpop.f32.mrf.mxu1  ;;  %v5712_v8 = vpop.f32.mrf.mxu2  ;;  %v1149_v61 = vsel %vm5578_vm8, %v1147_v49, %v1148_v54  ;;  %v4765_v49 = vld [vmem:[%s5392_s7 + $0x68] sm:$0x1] }
  0xb8   : > { %v1228_v12 = vunpack.c.l.b16 %v1149_v61 }
  0xba   : > { %4730 = vmatmul.msk.bf16.gmra.mxu3 %vm685_vm5, %v5108_v1  ;;  %v5720_v19 = vpop.f32.mrf.mxu0  ;;  %v1146_v1 = vsel %vm5578_vm8, %v4602_v52, %v1145_v38  ;;  %v2169_v52 = vunpack.c.l.b16 %v1937_v36 }
  0xbb   : > { %v5722_v9 = vpop.f32.mrf.mxu3  ;;  %v1227_v11 = vunpack.c.l.b16 %v1146_v1 }
  0xbd   : > { %v1253_v21 = vpack.c.b16 %v1228_v12, %v1227_v11  ;;  %v4766_v11 = vld [vmem:[%s5392_s7 + $0x6c] sm:$0xf]  ;;  %v4767_v12 = vld [vmem:[%s5392_s7 + $0x70] sm:$0xf] }
  0xbe   : > { %v1963_v23 = vshrl.u32 %v4766_v11, 16  ;;  %v1972_v26 = vshll.u32 %v4767_v12, 16 }
  0xbf   : > { %4795 = vmatmul.msk.bf16.gmra.mxu0 %vm685_vm5, %v2192_v18  ;;  %v5726_v33 = vpop.f32.mrf.mxu1  ;;  %v1922_v18 = vrot.slane %v1921_v7, 4 }
  0xc0   : > { %4585 = vmatmul.msk.bf16.gmra.mxu1 %vm685_vm5, %v5093_v3  ;;  %v1939_v3 = vshrl.u32 %v4763_v14, 16  ;;  %v1965_v45 = vrot.slane %v1963_v23, 4  ;;  %v4770_v23 = vld [vmem:[%s5392_s7 + $0x7c] sm:$0xf] }
  0xc1   : > { %v1927_v34 = vsel %vm5404_vm4, %v1922_v18, %v1926_v60  ;;  %v1958_v60 = vshll.u32 %v4765_v49, 16 }
  0xc2   : > { %v5729_v32 = vpop.f32.mrf.mxu2  ;;  %v1941_v40 = vrot.slane %v1939_v3, 4 }
  0xc3   : > { %v1960_v24 = vrot.slane %v1958_v60, 5 }
  0xc4   : > { %v1945_v57 = vor.u32 %v1944_v41, %v1941_v40  ;;  %v5111_v41 = vld [vmem:[%s5392_s7 + $0x60] sm:$0xff] }
  0xc5   : > { %4618 = vmatmul.msk.bf16.gmra.mxu2 %vm685_vm5, %v1252_v31  ;;  %v1057_v31 = vld [vmem:[%s5392_s7 + $0x54] sm:$0xe]  ;;  %v1961_v29 = vsel %vm5404_vm4, %v1956_v10, %v1960_v24 }
  0xc6   : > { %v5739_v47 = vpop.f32.mrf.mxu0  ;;  %v4603_v28 = vrot.slane %v1057_v31, 9  ;;  %v1946_v7 = vrot.slane %v1945_v57, 4  ;;  %v1976_v31 = vshrl.u32 %v4767_v12, 16  ;;  %v4768_v57 = vld [vmem:[%s5392_s7 + $0x74] sm:$0x1] }
  0xc7   : > { %v5743_v48 = vpop.f32.mrf.mxu3 }
  0xc8   : > { %v1153_v59 = vsel %vm5578_vm8, %v4603_v28, %v1152_v25  ;;  %v1951_v18 = vsel %vm5404_vm4, %v1946_v7, %v1950_v42  ;;  %v1966_v25 = vshll.u32 %v4766_v11, 16  ;;  %v4604_v28 = vrot.slane %v1058_v22, 9  ;;  %v4769_v22 = vld [vmem:[%s5392_s7 + $0x78] sm:$0xf] }
  0xc9   : > { %v5746_v63 = vpop.f32.mrf.mxu1  ;;  %v1229_v61 = vunpack.c.l.b16 %v1153_v59  ;;  %v2170_v42 = vunpack.c.l.b16 %v1951_v18 }
  0xca   : > { %4731 = vmatmul.msk.bf16.gmra.mxu3 %vm685_vm5, %v5109_v5  ;;  %v5750_v6 = vpop.f32.mrf.mxu2  ;;  %v2168_v5 = vunpack.c.l.b16 %v1927_v34  ;;  %v5187_v34 = vld [vmem:[%s5392_s7 + $0x68] sm:$0x1]  ;;  %v1968_v50 = vrot.slane %v1966_v25, 5  ;;  %v5188_v25 = vld [vmem:[%s5392_s7 + $0x70] sm:$0xf] }
  0xcb   : > { %v1162_v36 = vrot.slane %v5187_v34, 5  ;;  %v1059_v34 = vld [vmem:[%s5392_s7 + $0x6c] sm:$0xe] }
  0xcc   : > { %v2194_v62 = vpack.c.b16 %v2169_v52, %v2168_v5  ;;  %v1974_v5 = vrot.slane %v1972_v26, 5  ;;  %v1978_v52 = vrot.slane %v1976_v31, 4  ;;  %v1969_v60 = vor.u32 %v1968_v50, %v1965_v45  ;;  %v5189_v50 = vld [vmem:[%s5392_s7 + $0x74] sm:$0x1] }
  0xcd   : > { %v1166_v26 = vrot.slane %v5188_v25, 5 }
  0xce   : > { %v5757_v13 = vpop.f32.mrf.mxu0 }
  0xcf   : > { %4796 = vmatmul.msk.bf16.gmra.mxu0 %vm685_vm5, %v2193_v2  ;;  %v5762_v16 = vpop.f32.mrf.mxu3  ;;  %v1230_v2 = vunpack.c.l.b16 %v1156_v56 }
  0xd0   : > { %4586 = vmatmul.msk.bf16.gmra.mxu1 %vm685_vm5, %v5094_v51 }
  0xd1   : > { %v5766_v27 = vpop.f32.mrf.mxu1  ;;  %v1254_v14 = vpack.c.b16 %v1230_v2, %v1229_v61  ;;  %v5096_v2 = vld [vmem:[%s5392_s7 + $0x60] sm:$0xff] }
  0xd5   : > { %v5773_v38 = vpop.f32.mrf.mxu2  ;;  %4619 = vmatmul.msk.bf16.gmra.mxu2 %vm685_vm5, %v1253_v21  ;;  %v1159_v21 = vrot.slane %v5186_v20, 5 }
  0xd7   : > { %v1161_v37 = vrot.slane %v1159_v21, 4  ;;  %v1160_v59 = vsel %vm5578_vm8, %v4604_v28, %v1159_v21  ;;  %v2000_v28 = vshrl.u32 %v4770_v23, 16 }
  0xd8   : > { %v5779_v54 = vpop.f32.mrf.mxu0  ;;  %v1231_v24 = vunpack.c.l.b16 %v1160_v59  ;;  %v4605_v59 = vrot.slane %v1059_v34, 9 }
  0xd9   : > { %v5781_v55 = vpop.f32.mrf.mxu3  ;;  %v1163_v56 = vsel %vm5578_vm8, %v1161_v37, %v1162_v36 }
  0xda   : > { %4732 = vmatmul.msk.bf16.gmra.mxu3 %vm685_vm5, %v5110_v43  ;;  %v2171_v43 = vunpack.c.l.b16 %v1961_v29  ;;  %v1232_v11 = vunpack.c.l.b16 %v1163_v56  ;;  %v1168_v56 = vrot.slane %v1166_v26, 4 }
  0xdc   : > { %v2195_v35 = vpack.c.b16 %v2171_v43, %v2170_v42  ;;  %v1255_v21 = vpack.c.b16 %v1232_v11, %v1231_v24  ;;  %v1990_v42 = vshll.u32 %v4769_v22, 16  ;;  %v1996_v43 = vshll.u32 %v4770_v23, 16 }
  0xdd   : > { %v5789_v1 = vpop.f32.mrf.mxu1  ;;  %v5791_v51 = vpop.f32.mrf.mxu2  ;;  %v2002_v24 = vrot.slane %v2000_v28, 4 }
  0xdf   : > { %4797 = vmatmul.msk.bf16.gmra.mxu0 %vm685_vm5, %v2194_v62  ;;  %v1979_v62 = vor.u32 %v1978_v52, %v1974_v5  ;;  %v1169_v52 = vrot.slane %v5189_v50, 5 }
  0xe0   : > { %4587 = vmatmul.msk.bf16.gmra.mxu1 %vm685_vm5, %v5095_v0  ;;  %v5797_v15 = vpop.f32.mrf.mxu0  ;;  %v1982_v0 = vshll.u32 %v4768_v57, 16  ;;  %v5112_v57 = vld [vmem:[%s5392_s7 + $0x6c] sm:$0xff] }
  0xe1   : > { %v5804_v3 = vpop.f32.mrf.mxu3  ;;  %v1980_v18 = vrot.slane %v1979_v62, 4 }
  0xe2   : > { %v1984_v29 = vrot.slane %v1982_v0, 5 }
  0xe5   : > { %4620 = vmatmul.msk.bf16.gmra.mxu2 %vm685_vm5, %v1254_v14  ;;  %v5809_v40 = vpop.f32.mrf.mxu1  ;;  %v1970_v14 = vrot.slane %v1969_v60, 4 }
  0xe7   : > { %v1975_v31 = vsel %vm5404_vm4, %v1970_v14, %v1974_v5  ;;  %v4771_v14 = vld [vmem:[%s5392_s7 + $0x80] sm:$0x1] }
  0xe8   : > { %v5812_v49 = vpop.f32.mrf.mxu2 }
  0xea   : > { %4733 = vmatmul.msk.bf16.gmra.mxu3 %vm685_vm5, %v5111_v41  ;;  %v1987_v41 = vshrl.u32 %v4769_v22, 16  ;;  %v5097_v22 = vld [vmem:[%s5392_s7 + $0x6c] sm:$0xff] }
  0xec   : > { %v5820_v61 = vpop.f32.mrf.mxu0  ;;  %v1989_v0 = vrot.slane %v1987_v41, 4 }
  0xed   : > { %v5823_v7 = vpop.f32.mrf.mxu3  ;;  %v970_v10 = vpop.f32.mrf.mxu1 }
  0xee   : > { %v971_v12 = vadd.f32 %v970_v10, %v5697_v53  ;;  %v1985_v53 = vsel %vm5404_vm4, %v1980_v18, %v1984_v29  ;;  %v1998_v10 = vrot.slane %v1996_v43, 5  ;;  %v1167_v18 = vsel %vm5578_vm8, %v4605_v59, %v1166_v26 }
  0xef   : > { %4798 = vmatmul.msk.bf16.gmra.mxu0 %vm685_vm5, %v2195_v35  ;;  %v2172_v35 = vunpack.c.l.b16 %v1975_v31  ;;  %v2173_v60 = vunpack.c.l.b16 %v1985_v53  ;;  %v2006_v31 = vshll.u32 %v4771_v14, 16 }
  0xf0   : > { %v5827_v20 = vpop.f32.mrf.mxu2  ;;  %4588 = vmatmul.msk.bf16.gmra.mxu1 %vm685_vm5, %v5096_v2  ;;  %v1992_v2 = vrot.slane %v1990_v42, 5  ;;  %v2003_v25 = vor.u32 %v2002_v24, %v1998_v10 }
  0xf1   : > { %v2196_v29 = vpack.c.b16 %v2173_v60, %v2172_v35  ;;  %v2008_v50 = vrot.slane %v2006_v31, 5  ;;  %v4773_v35 = vld [vmem:[%s5392_s7 + $0x88] sm:$0xf]  ;;  %v5190_v60 = vld [vmem:[%s5392_s7 + $0x7c] sm:$0xf] }
  0xf2   : > { %v1993_v23 = vor.u32 %v1992_v2, %v1989_v0  ;;  %v1060_v0 = vld [vmem:[%s5392_s7 + $0x78] sm:$0xe] }
  0xf4   : > { %v5838_v36 = vpop.f32.mrf.mxu0  ;;  %v1994_v28 = vrot.slane %v1993_v23, 4 }
  0xf5   : > { %v5840_v37 = vpop.f32.mrf.mxu3  ;;  %4621 = vmatmul.msk.bf16.gmra.mxu2 %vm685_vm5, %v1255_v21  ;;  %v972_v45 = vpop.f32.mrf.mxu1 }
  0xf6   : > { %v973_v5 = vadd.f32 %v972_v45, %v5720_v19  ;;  %v1170_v19 = vsel %vm5578_vm8, %v1168_v56, %v1169_v52  ;;  %v2004_v45 = vrot.slane %v2003_v25, 4  ;;  %v4772_v52 = vld [vmem:[%s5392_s7 + $0x84] sm:$0xf]  ;;  %v5113_v25 = vld [vmem:[%s5392_s7 + $0x78] sm:$0xff] }
  0xf7   : > { %v1234_v41 = vunpack.c.l.b16 %v1170_v19  ;;  %v2014_v2 = vshll.u32 %v4772_v52, 16  ;;  %v2024_v19 = vshrl.u32 %v4773_v35, 16 }
  0xf8   : > { %v1323_v62 = vpop.f32.mrf.mxu2  ;;  %v2009_v14 = vsel %vm5404_vm4, %v2004_v45, %v2008_v50 }
  0xf9   : > { %v1403_v11 = vadd.f32 %v1323_v62, %v971_v12  ;;  %v1233_v12 = vunpack.c.l.b16 %v1167_v18  ;;  %v1173_v62 = vrot.slane %v5190_v60, 5  ;;  %v2020_v18 = vshll.u32 %v4773_v35, 16 }
  0xfa   : > { %4734 = vmatmul.msk.bf16.gmra.mxu3 %vm685_vm5, %v5112_v57  ;;  %v2026_v45 = vrot.slane %v2024_v19, 4 }
  0xfb   : > { %v1256_v56 = vpack.c.b16 %v1234_v41, %v1233_v12 }
  0xfc   : > { %v2264_v21 = vpop.f32.mrf.mxu0 }
  0xfd   : > { %v1610_v53 = vpop.f32.mrf.mxu3  ;;  %v975_v34 = vpop.f32.mrf.mxu1 }
  0xfe   : > { %v1690_v42 = vadd.f32 %v1610_v53, %v1403_v11  ;;  %v976_v26 = vadd.f32 %v975_v34, %v5739_v47  ;;  %v2011_v47 = vshrl.u32 %v4772_v52, 16  ;;  %v1999_v11 = vsel %vm5404_vm4, %v1994_v28, %v1998_v10 }
  0xff   : > { %4799 = vmatmul.msk.bf16.gmra.mxu0 %vm685_vm5, %v2196_v29  ;;  %v5191_v29 = vld [vmem:[%s5392_s7 + $0x80] sm:$0x1]  ;;  %v4606_v53 = vrot.slane %v1060_v0, 9  ;;  %v1175_v34 = vrot.slane %v1173_v62, 4  ;;  %v2174_v12 = vunpack.c.l.b16 %v1999_v11  ;;  %v2175_v10 = vunpack.c.l.b16 %v2009_v14 }
 0x100   : > { %v1325_v43 = vpop.f32.mrf.mxu2  ;;  %4589 = vmatmul.msk.bf16.gmra.mxu1 %vm685_vm5, %v5097_v22  ;;  %v5857_v57 = vadd.f32 %v2264_v21, %v1690_v42  ;;  %v1176_v21 = vrot.slane %v5191_v29, 5  ;;  %v2013_v41 = vrot.slane %v2011_v47, 4  ;;  %v2016_v42 = vrot.slane %v2014_v2, 5  ;;  %v5098_v47 = vld [vmem:[%s5392_s7 + $0x78] sm:$0xff] }
 0x101   : > { %v1404_v59 = vadd.f32 %v1325_v43, %v973_v5  ;;  %v2022_v28 = vrot.slane %v2020_v18, 5  ;;  %v2197_v35 = vpack.c.b16 %v2175_v10, %v2174_v12  ;;  %v4776_v12 = vld [vmem:[%s5392_s7 + $0x94] sm:$0xf]  ;;  %v5192_v10 = vld [vmem:[%s5392_s7 + $0x88] sm:$0xf] }
 0x102   : > { %v2017_v60 = vor.u32 %v2016_v42, %v2013_v41  ;;  %v1180_v41 = vrot.slane %v5192_v10, 5  ;;  %v1061_v42 = vld [vmem:[%s5392_s7 + $0x84] sm:$0xe] }
 0x103   : > { %v2027_v2 = vor.u32 %v2026_v45, %v2022_v28 }
 0x104   : > { %v2266_v24 = vpop.f32.mrf.mxu0  ;;  %v2018_v29 = vrot.slane %v2017_v60, 4 }
 0x105   : > { %v1612_v5 = vpop.f32.mrf.mxu3  ;;  %4622 = vmatmul.msk.bf16.gmra.mxu2 %vm685_vm5, %v1256_v56  ;;  %v977_v22 = vpop.f32.mrf.mxu1  ;;  %v4774_v56 = vld [vmem:[%s5392_s7 + $0x8c] sm:$0x1] }
 0x106   : > { %v1691_v23 = vadd.f32 %v1612_v5, %v1404_v59  ;;  %v978_v31 = vadd.f32 %v977_v22, %v5757_v13  ;;  %v1174_v59 = vsel %vm5578_vm8, %v4606_v53, %v1173_v62  ;;  %v1177_v13 = vsel %vm5578_vm8, %v1175_v34, %v1176_v21 }
 0x107   : > { %v2030_v11 = vshll.u32 %v4774_v56, 16  ;;  %v1236_v18 = vunpack.c.l.b16 %v1177_v13  ;;  %v2028_v5 = vrot.slane %v2027_v2, 4  ;;  %v2048_v13 = vshrl.u32 %v4776_v12, 16  ;;  %v5114_v2 = vld [vmem:[%s5392_s7 + $0x84] sm:$0xff] }
 0x108   : > { %v1328_v43 = vpop.f32.mrf.mxu2  ;;  %v5870_v50 = vadd.f32 %v2266_v24, %v1691_v23  ;;  %v4775_v23 = vld [vmem:[%s5392_s7 + $0x90] sm:$0xf] }
 0x109   : > { %v1405_v52 = vadd.f32 %v1328_v43, %v976_v26  ;;  %v1235_v26 = vunpack.c.l.b16 %v1174_v59  ;;  %v2032_v22 = vrot.slane %v2030_v11, 5  ;;  %v2035_v43 = vshrl.u32 %v4775_v23, 16 }
 0x10a   : > { %4735 = vmatmul.msk.bf16.gmra.mxu3 %vm685_vm5, %v5113_v25  ;;  %v2038_v56 = vshll.u32 %v4775_v23, 16  ;;  %v2044_v59 = vshll.u32 %v4776_v12, 16  ;;  %v4607_v11 = vrot.slane %v1061_v42, 9 }
 0x10b   : > { %v1257_v34 = vpack.c.b16 %v1236_v18, %v1235_v26  ;;  %v2037_v18 = vrot.slane %v2035_v43, 4 }
 0x10c   : > { %v2269_v0 = vpop.f32.mrf.mxu0 }
 0x10d   : > { %v1615_v14 = vpop.f32.mrf.mxu3  ;;  %v980_v24 = vpop.f32.mrf.mxu1 }
 0x10e   : > { %v1692_v19 = vadd.f32 %v1615_v14, %v1405_v52  ;;  %v981_v62 = vadd.f32 %v980_v24, %v5779_v54  ;;  %v2023_v54 = vsel %vm5404_vm4, %v2018_v29, %v2022_v28  ;;  %v2033_v52 = vsel %vm5404_vm4, %v2028_v5, %v2032_v22 }
 0x10f   : > { %4800 = vmatmul.msk.bf16.gmra.mxu0 %vm685_vm5, %v2197_v35  ;;  %v5193_v35 = vld [vmem:[%s5392_s7 + $0x8c] sm:$0x1]  ;;  %v1182_v14 = vrot.slane %v1180_v41, 4  ;;  %v2176_v24 = vunpack.c.l.b16 %v2023_v54  ;;  %v2177_v26 = vunpack.c.l.b16 %v2033_v52  ;;  %v2040_v29 = vrot.slane %v2038_v56, 5  ;;  %v5099_v54 = vld [vmem:[%s5392_s7 + $0x84] sm:$0xff] }
 0x110   : > { %v1330_v21 = vpop.f32.mrf.mxu2  ;;  %4590 = vmatmul.msk.bf16.gmra.mxu1 %vm685_vm5, %v5098_v47  ;;  %v5883_v25 = vadd.f32 %v2269_v0, %v1692_v19  ;;  %v1183_v60 = vrot.slane %v5193_v35, 5  ;;  %v2050_v5 = vrot.slane %v2048_v13, 4 }
 0x111   : > { %v1406_v53 = vadd.f32 %v1330_v21, %v978_v31  ;;  %v2046_v21 = vrot.slane %v2044_v59, 5  ;;  %v2198_v12 = vpack.c.b16 %v2177_v26, %v2176_v24  ;;  %v2041_v42 = vor.u32 %v2040_v29, %v2037_v18  ;;  %v4779_v24 = vld [vmem:[%s5392_s7 + $0xa0] sm:$0xf]  ;;  %v1062_v29 = vld [vmem:[%s5392_s7 + $0x90] sm:$0xe] }
 0x113   : > { %v2051_v43 = vor.u32 %v2050_v5, %v2046_v21 }
 0x114   : > { %v2271_v45 = vpop.f32.mrf.mxu0 }
 0x115   : > { %v1617_v31 = vpop.f32.mrf.mxu3  ;;  %4623 = vmatmul.msk.bf16.gmra.mxu2 %vm685_vm5, %v1257_v34  ;;  %v982_v0 = vpop.f32.mrf.mxu1  ;;  %v4777_v34 = vld [vmem:[%s5392_s7 + $0x98] sm:$0x1] }
 0x116   : > { %v1693_v47 = vadd.f32 %v1617_v31, %v1406_v53  ;;  %v983_v28 = vadd.f32 %v982_v0, %v5797_v15  ;;  %v1181_v15 = vsel %vm5578_vm8, %v4607_v11, %v1180_v41  ;;  %v1184_v53 = vsel %vm5578_vm8, %v1182_v14, %v1183_v60  ;;  %v4778_v41 = vld [vmem:[%s5392_s7 + $0x9c] sm:$0xf] }
 0x117   : > { %v2054_v52 = vshll.u32 %v4777_v34, 16  ;;  %v1238_v59 = vunpack.c.l.b16 %v1184_v53  ;;  %v2042_v31 = vrot.slane %v2041_v42, 4  ;;  %v2052_v0 = vrot.slane %v2051_v43, 4 }
 0x118   : > { %v1333_v19 = vpop.f32.mrf.mxu2  ;;  %v5896_v22 = vadd.f32 %v2271_v45, %v1693_v47  ;;  %v2059_v26 = vshrl.u32 %v4778_v41, 16  ;;  %v2062_v18 = vshll.u32 %v4778_v41, 16  ;;  %v2072_v53 = vshrl.u32 %v4779_v24, 16 }
 0x119   : > { %v1407_v23 = vadd.f32 %v1333_v19, %v981_v62  ;;  %v1237_v62 = vunpack.c.l.b16 %v1181_v15  ;;  %v2056_v47 = vrot.slane %v2054_v52, 5  ;;  %v5194_v19 = vld [vmem:[%s5392_s7 + $0x94] sm:$0xf]  ;;  %v2068_v15 = vshll.u32 %v4779_v24, 16 }
 0x11a   : > { %4736 = vmatmul.msk.bf16.gmra.mxu3 %vm685_vm5, %v5114_v2  ;;  %v2061_v42 = vrot.slane %v2059_v26, 4  ;;  %v2064_v43 = vrot.slane %v2062_v18, 5 }
 0x11b   : > { %v1258_v14 = vpack.c.b16 %v1238_v59, %v1237_v62  ;;  %v2057_v34 = vsel %vm5404_vm4, %v2052_v0, %v2056_v47  ;;  %v4608_v62 = vrot.slane %v1062_v29, 9 }
 0x11c   : > { %v2274_v10 = vpop.f32.mrf.mxu0  ;;  %v2065_v24 = vor.u32 %v2064_v43, %v2061_v42  ;;  %v4782_v42 = vld [vmem:[%s5392_s7 + $0xac] sm:$0xf] }
 0x11d   : > { %v1620_v56 = vpop.f32.mrf.mxu3  ;;  %v985_v45 = vpop.f32.mrf.mxu1 }
 0x11e   : > { %v1694_v13 = vadd.f32 %v1620_v56, %v1407_v23  ;;  %v986_v35 = vadd.f32 %v985_v45, %v5820_v61  ;;  %v1187_v61 = vrot.slane %v5194_v19, 5  ;;  %v2047_v23 = vsel %vm5404_vm4, %v2042_v31, %v2046_v21  ;;  %v5115_v56 = vld [vmem:[%s5392_s7 + $0x90] sm:$0xff] }
 0x11f   : > { %4801 = vmatmul.msk.bf16.gmra.mxu0 %vm685_vm5, %v2198_v12  ;;  %v5195_v12 = vld [vmem:[%s5392_s7 + $0x98] sm:$0x1]  ;;  %v2178_v59 = vunpack.c.l.b16 %v2047_v23  ;;  %v2074_v31 = vrot.slane %v2072_v53, 4  ;;  %v5100_v19 = vld [vmem:[%s5392_s7 + $0x90] sm:$0xff] }
 0x120   : > { %v1335_v60 = vpop.f32.mrf.mxu2  ;;  %4591 = vmatmul.msk.bf16.gmra.mxu1 %vm685_vm5, %v5099_v54  ;;  %v5909_v2 = vadd.f32 %v2274_v10, %v1694_v13  ;;  %v1190_v10 = vrot.slane %v5195_v12, 5  ;;  %v1189_v21 = vrot.slane %v1187_v61, 4  ;;  %v2179_v13 = vunpack.c.l.b16 %v2057_v34 }
 0x121   : > { %v1408_v11 = vadd.f32 %v1335_v60, %v983_v28  ;;  %v2070_v60 = vrot.slane %v2068_v15, 5  ;;  %v2066_v12 = vrot.slane %v2065_v24, 4  ;;  %v5197_v24 = vld [vmem:[%s5392_s7 + $0xa4] sm:$0x1] }
 0x122   : > { %v2199_v26 = vpack.c.b16 %v2179_v13, %v2178_v59  ;;  %v5196_v59 = vld [vmem:[%s5392_s7 + $0xa0] sm:$0xf] }
 0x123   : > { %v2075_v29 = vor.u32 %v2074_v31, %v2070_v60  ;;  %v1194_v13 = vrot.slane %v5196_v59, 5  ;;  %v1063_v31 = vld [vmem:[%s5392_s7 + $0x9c] sm:$0xe] }
 0x124   : > { %v2276_v5 = vpop.f32.mrf.mxu0 }
 0x125   : > { %v1622_v28 = vpop.f32.mrf.mxu3  ;;  %4624 = vmatmul.msk.bf16.gmra.mxu2 %vm685_vm5, %v1258_v14  ;;  %v987_v54 = vpop.f32.mrf.mxu1  ;;  %v4780_v14 = vld [vmem:[%s5392_s7 + $0xa4] sm:$0x1] }
 0x126   : > { %v1695_v52 = vadd.f32 %v1622_v28, %v1408_v11  ;;  %v988_v45 = vadd.f32 %v987_v54, %v5838_v36  ;;  %v1188_v11 = vsel %vm5578_vm8, %v4608_v62, %v1187_v61  ;;  %v1191_v36 = vsel %vm5578_vm8, %v1189_v21, %v1190_v10  ;;  %v4781_v28 = vld [vmem:[%s5392_s7 + $0xa8] sm:$0xf] }
 0x127   : > { %v2078_v23 = vshll.u32 %v4780_v14, 16  ;;  %v1240_v15 = vunpack.c.l.b16 %v1191_v36  ;;  %v2076_v10 = vrot.slane %v2075_v29, 4  ;;  %v2083_v62 = vshrl.u32 %v4781_v28, 16 }
 0x128   : > { %v1338_v41 = vpop.f32.mrf.mxu2  ;;  %v5922_v0 = vadd.f32 %v2276_v5, %v1695_v52  ;;  %v2071_v21 = vsel %vm5404_vm4, %v2066_v12, %v2070_v60  ;;  %v2096_v14 = vshrl.u32 %v4782_v42, 16 }
 0x129   : > { %v1409_v47 = vadd.f32 %v1338_v41, %v986_v35  ;;  %v1239_v35 = vunpack.c.l.b16 %v1188_v11  ;;  %v2080_v54 = vrot.slane %v2078_v23, 5  ;;  %v2086_v41 = vshll.u32 %v4781_v28, 16  ;;  %v5116_v23 = vld [vmem:[%s5392_s7 + $0x9c] sm:$0xff] }
 0x12a   : > { %4737 = vmatmul.msk.bf16.gmra.mxu3 %vm685_vm5, %v5115_v56  ;;  %v2085_v60 = vrot.slane %v2083_v62, 4 }
 0x12b   : > { %v1259_v56 = vpack.c.b16 %v1240_v15, %v1239_v35  ;;  %v2081_v36 = vsel %vm5404_vm4, %v2076_v10, %v2080_v54  ;;  %v1196_v35 = vrot.slane %v1194_v13, 4  ;;  %v2088_v15 = vrot.slane %v2086_v41, 5  ;;  %v4783_v54 = vld [vmem:[%s5392_s7 + $0xb0] sm:$0x1] }
 0x12c   : > { %v2279_v18 = vpop.f32.mrf.mxu0  ;;  %v2181_v12 = vunpack.c.l.b16 %v2081_v36 }
 0x12d   : > { %v1625_v5 = vpop.f32.mrf.mxu3  ;;  %v990_v34 = vpop.f32.mrf.mxu1  ;;  %v2089_v62 = vor.u32 %v2088_v15, %v2085_v60 }
 0x12e   : > { %v1696_v53 = vadd.f32 %v1625_v5, %v1409_v47  ;;  %v2092_v47 = vshll.u32 %v4782_v42, 16  ;;  %v4609_v5 = vrot.slane %v1063_v31, 9  ;;  %v5101_v31 = vld [vmem:[%s5392_s7 + $0x9c] sm:$0xff] }
 0x12f   : > { %4802 = vmatmul.msk.bf16.gmra.mxu0 %vm685_vm5, %v2199_v26  ;;  %v1197_v26 = vrot.slane %v5197_v24, 5 }
 0x130   : > { %v1340_v61 = vpop.f32.mrf.mxu2  ;;  %4592 = vmatmul.msk.bf16.gmra.mxu1 %vm685_vm5, %v5100_v19  ;;  %v5935_v43 = vadd.f32 %v2279_v18, %v1696_v53  ;;  %v2180_v18 = vunpack.c.l.b16 %v2071_v21  ;;  %v991_v53 = vadd.f32 %v990_v34, %v5673_v17  ;;  %v2094_v28 = vrot.slane %v2092_v47, 5 }
 0x131   : > { %v1410_v52 = vadd.f32 %v1340_v61, %v988_v45  ;;  %v2098_v61 = vrot.slane %v2096_v14, 4  ;;  %v2102_v21 = vshll.u32 %v4783_v54, 16 }
 0x132   : > { %v2200_v17 = vpack.c.b16 %v2181_v12, %v2180_v18  ;;  %v4784_v18 = vld [vmem:[%s5392_s7 + $0xb4] sm:$0xf] }
 0x133   : > { %v2099_v34 = vor.u32 %v2098_v61, %v2094_v28  ;;  %v2104_v60 = vrot.slane %v2102_v21, 5  ;;  %v2110_v54 = vshll.u32 %v4784_v18, 16 }
 0x134   : > { %v2281_v11 = vpop.f32.mrf.mxu0 }
 0x135   : > { %v1627_v45 = vpop.f32.mrf.mxu3  ;;  %4625 = vmatmul.msk.bf16.gmra.mxu2 %vm685_vm5, %v1259_v56  ;;  %v992_v19 = vpop.f32.mrf.mxu1  ;;  %v1198_v56 = vsel %vm5578_vm8, %v1196_v35, %v1197_v26  ;;  %v2100_v26 = vrot.slane %v2099_v34, 4 }
 0x136   : > { %v1697_v29 = vadd.f32 %v1627_v45, %v1410_v52  ;;  %v1195_v52 = vsel %vm5578_vm8, %v4609_v5, %v1194_v13  ;;  %v1242_v36 = vunpack.c.l.b16 %v1198_v56  ;;  %v2090_v45 = vrot.slane %v2089_v62, 4  ;;  %v5199_v62 = vld [vmem:[%s5392_s7 + $0xb0] sm:$0x1] }
 0x137   : > { %v993_v13 = vadd.f32 %v992_v19, %v5689_v44  ;;  %v2107_v44 = vshrl.u32 %v4784_v18, 16  ;;  %v2105_v19 = vsel %vm5404_vm4, %v2100_v26, %v2104_v60 }
 0x138   : > { %v1343_v10 = vpop.f32.mrf.mxu2  ;;  %v5948_v42 = vadd.f32 %v2281_v11, %v1697_v29  ;;  %v1241_v11 = vunpack.c.l.b16 %v1195_v52  ;;  %v2095_v61 = vsel %vm5404_vm4, %v2090_v45, %v2094_v28 }
 0x139   : > { %v1411_v59 = vadd.f32 %v1343_v10, %v991_v53  ;;  %v5198_v53 = vld [vmem:[%s5392_s7 + $0xac] sm:$0xf]  ;;  %v1064_v10 = vld [vmem:[%s5392_s7 + $0xa8] sm:$0xe] }
 0x13a   : > { %4738 = vmatmul.msk.bf16.gmra.mxu3 %vm685_vm5, %v5116_v23  ;;  %v4785_v23 = vld [vmem:[%s5392_s7 + $0xb8] sm:$0xf]  ;;  %v1260_v15 = vpack.c.b16 %v1242_v36, %v1241_v11  ;;  %v1201_v12 = vrot.slane %v5198_v53, 5  ;;  %v2182_v11 = vunpack.c.l.b16 %v2095_v61  ;;  %v2183_v36 = vunpack.c.l.b16 %v2105_v19  ;;  %v4786_v53 = vld [vmem:[%s5392_s7 + $0xbc] sm:$0x1] }
 0x13b   : > { %v2120_v52 = vshrl.u32 %v4785_v23, 16 }
 0x13c   : > { %v2284_v41 = vpop.f32.mrf.mxu0 }
 0x13d   : > { %v1630_v47 = vpop.f32.mrf.mxu3  ;;  %v995_v14 = vpop.f32.mrf.mxu1  ;;  %v2122_v60 = vrot.slane %v2120_v52, 4 }
 0x13e   : > { %v1698_v24 = vadd.f32 %v1630_v47, %v1411_v59  ;;  %v2116_v59 = vshll.u32 %v4785_v23, 16  ;;  %v5117_v47 = vld [vmem:[%s5392_s7 + $0xa8] sm:$0xff]  ;;  %v996_v45 = vadd.f32 %v995_v14, %v5709_v4  ;;  %v2201_v4 = vpack.c.b16 %v2183_v36, %v2182_v11 }
 0x13f   : > { %4803 = vmatmul.msk.bf16.gmra.mxu0 %vm685_vm5, %v2200_v17  ;;  %v1204_v17 = vrot.slane %v5199_v62, 5 }
 0x140   : > { %v1345_v29 = vpop.f32.mrf.mxu2  ;;  %4593 = vmatmul.msk.bf16.gmra.mxu1 %vm685_vm5, %v5101_v31  ;;  %v5961_v5 = vadd.f32 %v2284_v41, %v1698_v24  ;;  %v4610_v41 = vrot.slane %v1064_v10, 9  ;;  %v1203_v31 = vrot.slane %v1201_v12, 4  ;;  %v2109_v24 = vrot.slane %v2107_v44, 4  ;;  %v5102_v44 = vld [vmem:[%s5392_s7 + $0xa8] sm:$0xff] }
 0x141   : > { %v1412_v35 = vadd.f32 %v1345_v29, %v993_v13  ;;  %v2112_v13 = vrot.slane %v2110_v54, 5  ;;  %v5973_v26 = vrot.slane %v2116_v59, 5  ;;  %v2126_v59 = vshll.u32 %v4786_v53, 16 }
 0x143   : > { %v2113_v14 = vor.u32 %v2112_v13, %v2109_v24  ;;  %v2123_v61 = vor.u32 %v2122_v60, %v5973_v26  ;;  %v2128_v24 = vrot.slane %v2126_v59, 5 }
 0x144   : > { %v2286_v56 = vpop.f32.mrf.mxu0 }
 0x145   : > { %v1632_v34 = vpop.f32.mrf.mxu3  ;;  %4626 = vmatmul.msk.bf16.gmra.mxu2 %vm685_vm5, %v1260_v15  ;;  %v997_v21 = vpop.f32.mrf.mxu1  ;;  %v1202_v15 = vsel %vm5578_vm8, %v4610_v41, %v1201_v12  ;;  %v4787_v12 = vld [vmem:[%s5392_s7 + $0xc0] sm:$0xf]  ;;  %v5200_v41 = vld [vmem:[%s5392_s7 + $0x10] sm:$0xf] }
 0x146   : > { %v1699_v28 = vadd.f32 %v1632_v34, %v1412_v35  ;;  %v1205_v35 = vsel %vm5578_vm8, %v1203_v31, %v1204_v17  ;;  %v1243_v19 = vunpack.c.l.b16 %v1202_v15  ;;  %v4788_v34 = vld [vmem:[%s5392_s7 + $0xc4] sm:$0xf]  ;;  %v2442_v17 = vrot.slane %v5200_v41, 5 }
 0x147   : > { %v1244_v54 = vunpack.c.l.b16 %v1205_v35  ;;  %v998_v31 = vadd.f32 %v997_v21, %v5726_v33  ;;  %v2134_v13 = vshll.u32 %v4787_v12, 16  ;;  %v5201_v35 = vld [vmem:[%s5392_s7 + $0xb8] sm:$0xf]  ;;  %v1065_v21 = vld [vmem:[%s5392_s7 + $0xb4] sm:$0xe] }
 0x148   : > { %v1348_v18 = vpop.f32.mrf.mxu2  ;;  %v5975_v29 = vadd.f32 %v2286_v56, %v1699_v28  ;;  %v2114_v28 = vrot.slane %v2113_v14, 4  ;;  %v1208_v53 = vrot.slane %v5201_v35, 5  ;;  %v2444_v14 = vrot.slane %v2442_v17, 4  ;;  %v5118_v35 = vld [vmem:[%s5392_s7 + $0xb4] sm:$0xff] }
 0x149   : > { %v1413_v23 = vadd.f32 %v1348_v18, %v996_v45  ;;  %v1261_v36 = vpack.c.b16 %v1244_v54, %v1243_v19  ;;  %v2131_v45 = vshrl.u32 %v4787_v12, 16  ;;  %v2140_v18 = vshll.u32 %v4788_v34, 16 }
 0x14a   : > { %4739 = vmatmul.msk.bf16.gmra.mxu3 %vm685_vm5, %v5117_v47  ;;  %v2124_v47 = vrot.slane %v2123_v61, 4  ;;  %v5203_v61 = vld [vmem:[%s5392_s7 + $0x14] sm:$0x1]  ;;  %v2119_v19 = vsel %vm5404_vm4, %v2114_v28, %v5973_v26 }
 0x14b   : > { %v2133_v12 = vrot.slane %v2131_v45, 4  ;;  %v2184_v28 = vunpack.c.l.b16 %v2119_v19 }
 0x14c   : > { %v2289_v10 = vpop.f32.mrf.mxu0  ;;  %v2129_v54 = vsel %vm5404_vm4, %v2124_v47, %v2128_v24 }
 0x14d   : > { %v1635_v52 = vpop.f32.mrf.mxu3  ;;  %v1000_v56 = vpop.f32.mrf.mxu1  ;;  %v2185_v47 = vunpack.c.l.b16 %v2129_v54 }
 0x14e   : > { %v1700_v62 = vadd.f32 %v1635_v52, %v1413_v23  ;;  %v2144_v23 = vshrl.u32 %v4788_v34, 16  ;;  %v2445_v52 = vrot.slane %v5203_v61, 5  ;;  %v6003_v34 = vrot.slane %v2140_v18, 5 }
 0x14f   : > { %4804 = vmatmul.msk.bf16.gmra.mxu0 %vm685_vm5, %v2201_v4  ;;  %v5202_v4 = vld [vmem:[%s5392_s7 + $0xbc] sm:$0x1]  ;;  %v1210_v61 = vrot.slane %v1208_v53, 4  ;;  %v1001_v26 = vadd.f32 %v1000_v56, %v5746_v63 }
 0x150   : > { %v1350_v11 = vpop.f32.mrf.mxu2  ;;  %4594 = vmatmul.msk.bf16.gmra.mxu1 %vm685_vm5, %v5102_v44  ;;  %v5991_v15 = vadd.f32 %v2289_v10, %v1700_v62  ;;  %v1211_v33 = vrot.slane %v5202_v4, 5  ;;  %v2136_v62 = vrot.slane %v2134_v13, 5  ;;  %v2146_v41 = vrot.slane %v2144_v23, 4 }
 0x151   : > { %v1414_v60 = vadd.f32 %v1350_v11, %v998_v31  ;;  %v4807_v31 = vld [vmem:[%s5392_s7 + $0xc] sm:$0xe]  ;;  %v4611_v4 = vrot.slane %v1065_v21, 9  ;;  %v2446_v13 = vsel %vm5578_vm8, %v2444_v14, %v2445_v52  ;;  %v4969_v14 = vld [vmem:[%s5392_s7 + $0x18] sm:$0xf] }
 0x152   : > { %6889 = vst [vmem:[#allocation6_spill] sm:$0xff] %v5991_v15  ;;  %v4823_v15 = vrot.slane %v4807_v31, 9  ;;  %v2137_v18 = vor.u32 %v2136_v62, %v2133_v12  ;;  %v2555_v21 = vunpack.c.l.b16 %v2446_v13  ;;  %v1212_v56 = vsel %vm5578_vm8, %v1210_v61, %v1211_v33  ;;  %v5103_v12 = vld [vmem:[%s5392_s7 + $0xb4] sm:$0xff]  ;;  %v6026_v62 = vld [vmem:[%s5392_s7 + $0x1c] sm:$0xf] }
 0x153   : > { %v1209_v63 = vsel %vm5578_vm8, %v4611_v4, %v1208_v53  ;;  %v2147_v19 = vor.u32 %v2146_v41, %v6003_v34  ;;  %v1246_v53 = vunpack.c.l.b16 %v1212_v56  ;;  %v3110_v61 = vshrl.u32 %v4969_v14, 16 }
 0x154   : > { %v2291_v44 = vpop.f32.mrf.mxu0  ;;  %v2443_v45 = vsel %vm5578_vm8, %v4823_v15, %v2442_v17  ;;  %v2202_v17 = vpack.c.b16 %v2185_v47, %v2184_v28  ;;  %v2138_v4 = vrot.slane %v2137_v18, 4  ;;  %v3113_v41 = vshll.u32 %v4969_v14, 16 }
 0x155   : > { %v1637_v10 = vpop.f32.mrf.mxu3  ;;  %4627 = vmatmul.msk.bf16.gmra.mxu2 %vm685_vm5, %v1261_v36  ;;  %v1002_v59 = vpop.f32.mrf.mxu1  ;;  %v4789_v36 = vld [vmem:[%s5392_s7 + $0xc8] sm:$0x1]  ;;  %v2554_v23 = vunpack.c.l.b16 %v2443_v45  ;;  %v2148_v33 = vrot.slane %v2147_v19, 4  ;;  %v3123_v47 = vshrl.u32 %v6026_v62, 16  ;;  %v3112_v18 = vrot.slane %v3110_v61, 4 }
 0x156   : > { %v1701_v11 = vadd.f32 %v1637_v10, %v1414_v60  ;;  %v2150_v15 = vshll.u32 %v4789_v36, 16  ;;  %v1003_v28 = vadd.f32 %v1002_v59, %v5766_v27  ;;  %v2143_v27 = vsel %vm5404_vm4, %v2138_v4, %v6003_v34  ;;  %v4971_v19 = vld [vmem:[%s5392_s7 + $0x20] sm:$0x1]  ;;  %v4972_v61 = vld [vmem:[%s5392_s7 + $0x24] sm:$0xf] }
 0x157   : > { %v6019_v54 = vpack.c.b16 %v2555_v21, %v2554_v23  ;;  %v3115_v23 = vrot.slane %v3113_v41, 5  ;;  %v3129_v4 = vshll.u32 %v4971_v19, 16  ;;  %v6046_v41 = vld [vmem:[%s5392_s7 + $0x28] sm:$0xf] }
 0x158   : > { %v1353_v24 = vpop.f32.mrf.mxu2  ;;  %v6022_v52 = vadd.f32 %v2291_v44, %v1701_v11  ;;  %v2152_v44 = vrot.slane %v2150_v15, 5  ;;  %v3119_v11 = vshll.u32 %v6026_v62, 16 }
 0x159   : > { %v1415_v60 = vadd.f32 %v1353_v24, %v1001_v26  ;;  %v1245_v26 = vunpack.c.l.b16 %v1209_v63  ;;  %v3125_v63 = vrot.slane %v3123_v47, 4  ;;  %v3131_v47 = vrot.slane %v3129_v4, 5 }
 0x15a   : > { %4740 = vmatmul.msk.bf16.gmra.mxu3 %vm685_vm5, %v5118_v35  ;;  %v2153_v59 = vsel %vm5404_vm4, %v2148_v33, %v2152_v44  ;;  %v3121_v21 = vrot.slane %v3119_v11, 5 }
 0x15b   : > { %v1262_v13 = vpack.c.b16 %v1246_v53, %v1245_v26  ;;  %v3116_v26 = vor.u32 %v3115_v23, %v3112_v18  ;;  %v3137_v18 = vshll.u32 %v4972_v61, 16  ;;  %v3143_v23 = vshll.u32 %v6046_v41, 16 }
 0x15c   : > { %v2294_v10 = vpop.f32.mrf.mxu0  ;;  %v3126_v53 = vor.u32 %v3125_v63, %v3121_v21 }
 0x15d   : > { %v1640_v31 = vpop.f32.mrf.mxu3  ;;  %v1005_v35 = vpop.f32.mrf.mxu1  ;;  %v3117_v44 = vrot.slane %v3116_v26, 4 }
 0x15e   : > { %v1702_v24 = vadd.f32 %v1640_v31, %v1415_v60  ;;  %v2187_v31 = vunpack.c.l.b16 %v2153_v59  ;;  %v1006_v34 = vadd.f32 %v1005_v35, %v5789_v1  ;;  %v3127_v11 = vrot.slane %v3126_v53, 4 }
 0x15f   : > { %4805 = vmatmul.msk.bf16.gmra.mxu0 %vm685_vm5, %v2202_v17 }
 0x160   : > { %v1355_v36 = vpop.f32.mrf.mxu2  ;;  %4595 = vmatmul.msk.bf16.gmra.mxu1 %vm685_vm5, %v5103_v12  ;;  %v6033_v60 = vadd.f32 %v2294_v10, %v1702_v24  ;;  %v5119_v10 = vld [vmem:[%s5392_s7 + $0xc0] sm:$0xff]  ;;  %v2186_v12 = vunpack.c.l.b16 %v2143_v27  ;;  %v3147_v27 = vshrl.u32 %v6046_v41, 16  ;;  %v3132_v53 = vsel %vm5404_vm4, %v3127_v11, %v3131_v47  ;;  %v6072_v47 = vld [vmem:[%s5392_s7 + $0x2c] sm:$0x1] }
 0x161   : > { %v1416_v45 = vadd.f32 %v1355_v36, %v1003_v28  ;;  %v5034_v36 = vld [vmem:[%s5392_s7 + $0x18] sm:$0xe]  ;;  %v3496_v11 = vunpack.c.l.b16 %v3132_v53 }
 0x162   : > { %v2203_v28 = vpack.c.b16 %v2187_v31, %v2186_v12  ;;  %v5205_v12 = vld [vmem:[%s5392_s7 + $0x20] sm:$0x1] }
 0x163   : > { %v2452_v31 = vrot.slane %v5205_v12, 5 }
 0x164   : > { %v2296_v56 = vpop.f32.mrf.mxu0 }
 0x165   : > { %v1642_v17 = vpop.f32.mrf.mxu3  ;;  %4628 = vmatmul.msk.bf16.gmra.mxu2 %vm685_vm5, %v1262_v13  ;;  %v1007_v15 = vpop.f32.mrf.mxu1  ;;  %v3134_v13 = vshrl.u32 %v4972_v61, 16 }
 0x166   : > { %v1703_v14 = vadd.f32 %v1642_v17, %v1416_v45  ;;  %v3781_v45 = vrot.slane %v6026_v62, 5  ;;  %v5204_v17 = vld [vmem:[%s5392_s7 + $0x1c] sm:$0xf]  ;;  %v3122_v62 = vsel %vm5404_vm4, %v3117_v44, %v3121_v21  ;;  %v3149_v21 = vrot.slane %v3147_v27, 4 }
 0x168   : > { %v1358_v24 = vpop.f32.mrf.mxu2  ;;  %v6051_v1 = vadd.f32 %v2296_v56, %v1703_v14  ;;  %v5050_v56 = vrot.slane %v5034_v36, 9  ;;  %v4808_v14 = vld [vmem:[%s5392_s7 + $0x18] sm:$0xe]  ;;  %v3783_v4 = vrot.slane %v3781_v45, 4 }
 0x169   : > { %v1417_v33 = vadd.f32 %v1358_v24, %v1006_v34  ;;  %v1008_v34 = vadd.f32 %v1007_v15, %v5809_v40  ;;  %v3784_v24 = vrot.slane %v4971_v19, 5  ;;  %v5120_v36 = vld [vmem:[%s5392_s7 + $0x18] sm:$0xff]  ;;  %v3495_v15 = vunpack.c.l.b16 %v3122_v62 }
 0x16a   : > { %4741 = vmatmul.msk.bf16.gmra.mxu3 %vm685_vm5, %v5119_v10  ;;  %6890 = vst [vmem:[#allocation7_spill] sm:$0xff] %v6051_v1  ;;  %v2449_v10 = vrot.slane %v5204_v17, 5  ;;  %v6066_v17 = vrot.slane %v3143_v23, 5  ;;  %v3782_v1 = vsel %vm5578_vm8, %v5050_v56, %v3781_v45  ;;  %v3153_v45 = vshll.u32 %v6072_v47, 16 }
 0x16b   : > { %v3527_v56 = vpack.c.b16 %v3496_v11, %v3495_v15  ;;  %v5206_v15 = vld [vmem:[%s5392_s7 + $0x28] sm:$0xf] }
 0x16c   : > { %v2299_v35 = vpop.f32.mrf.mxu0  ;;  %v2451_v12 = vrot.slane %v2449_v10, 4  ;;  %v2456_v11 = vrot.slane %v5206_v15, 5 }
 0x16d   : > { %v1645_v59 = vpop.f32.mrf.mxu3  ;;  %v1010_v63 = vpop.f32.mrf.mxu1 }
 0x16e   : > { %v1704_v26 = vadd.f32 %v1645_v59, %v1417_v33  ;;  %v3136_v33 = vrot.slane %v3134_v13, 4  ;;  %v3139_v59 = vrot.slane %v3137_v18, 5  ;;  %v2453_v27 = vsel %vm5578_vm8, %v2451_v12, %v2452_v31  ;;  %v6091_v12 = vld [vmem:[%s5392_s7 + $0x34] sm:$0xf] }
 0x16f   : > { %4806 = vmatmul.msk.bf16.gmra.mxu0 %vm685_vm5, %v2203_v28  ;;  %v4824_v28 = vrot.slane %v4808_v14, 9  ;;  %v1011_v14 = vadd.f32 %v1010_v63, %v5691_v46 }
 0x170   : > { %v1360_v61 = vpop.f32.mrf.mxu2  ;;  %4840 = vmatmul.msk.bf16.vlgmr.msra.gmra.mxu1 %vm685_vm5, %v6019_v54  ;;  %v6069_v40 = vadd.f32 %v2299_v35, %v1704_v26  ;;  %v3785_v54 = vsel %vm5578_vm8, %v3783_v4, %v3784_v24  ;;  %v3140_v13 = vor.u32 %v3139_v59, %v3136_v33  ;;  %v3150_v26 = vor.u32 %v3149_v21, %v6066_v17  ;;  %v5035_v21 = vld [vmem:[%s5392_s7 + $0x24] sm:$0xe] }
 0x171   : > { %v1418_v44 = vadd.f32 %v1360_v61, %v1008_v34  ;;  %v2450_v35 = vsel %vm5578_vm8, %v4824_v28, %v2449_v10  ;;  %v3893_v34 = vunpack.c.l.b16 %v3782_v1  ;;  %v3894_v53 = vunpack.c.l.b16 %v3785_v54 }
 0x172   : > { %v2556_v24 = vunpack.c.l.b16 %v2450_v35  ;;  %v2557_v10 = vunpack.c.l.b16 %v2453_v27  ;;  %v3141_v33 = vrot.slane %v3140_v13, 4  ;;  %v3151_v31 = vrot.slane %v3150_v26, 4 }
 0x173   : > { %v3155_v59 = vrot.slane %v3153_v45, 5  ;;  %v3788_v28 = vrot.slane %v6046_v41, 5  ;;  %v5051_v27 = vrot.slane %v5035_v21, 9  ;;  %v4809_v41 = vld [vmem:[%s5392_s7 + $0x24] sm:$0xe] }
 0x174   : > { %v2301_v19 = vpop.f32.mrf.mxu0  ;;  %v2587_v63 = vpack.c.b16 %v2557_v10, %v2556_v24 }
 0x175   : > { %v1647_v18 = vpop.f32.mrf.mxu3  ;;  %4953 = vmatmul.msk.bf16.vlgmr.msra.gmra.mxu2 %vm685_vm5, %v5120_v36  ;;  %v1012_v23 = vpop.f32.mrf.mxu1  ;;  %v4975_v36 = vld [vmem:[%s5392_s7 + $0x30] sm:$0xf]  ;;  %v3156_v35 = vsel %vm5404_vm4, %v3151_v31, %v3155_v59  ;;  %v5121_v59 = vld [vmem:[%s5392_s7 + $0x24] sm:$0xff] }
 0x176   : > { %v1705_v62 = vadd.f32 %v1647_v18, %v1418_v44  ;;  %v3925_v44 = vpack.c.b16 %v3894_v53, %v3893_v34  ;;  %v3146_v18 = vsel %vm5404_vm4, %v3141_v33, %v6066_v17  ;;  %v3158_v26 = vshrl.u32 %v4975_v36, 16  ;;  %v5207_v53 = vld [vmem:[%s5392_s7 + $0x2c] sm:$0x1] }
 0x177   : > { %v3790_v34 = vrot.slane %v3788_v28, 4  ;;  %v3791_v17 = vrot.slane %v6072_v47, 5  ;;  %v3497_v10 = vunpack.c.l.b16 %v3146_v18  ;;  %v2458_v33 = vrot.slane %v2456_v11, 4 }
 0x178   : > { %v1363_v4 = vpop.f32.mrf.mxu2  ;;  %v6093_v46 = vadd.f32 %v2301_v19, %v1705_v62  ;;  %v3161_v19 = vshll.u32 %v4975_v36, 16  ;;  %v3167_v62 = vshll.u32 %v6091_v12, 16  ;;  %v3498_v21 = vunpack.c.l.b16 %v3156_v35 }
 0x179   : > { %v1419_v61 = vadd.f32 %v1363_v4, %v1011_v14  ;;  %v1013_v14 = vadd.f32 %v1012_v23, %v5712_v8  ;;  %v2459_v4 = vrot.slane %v5207_v53, 5  ;;  %v3789_v36 = vsel %vm5578_vm8, %v5051_v27, %v3788_v28 }
 0x17a   : > { %5018 = vmatmul.msk.bf16.vlgmr.msra.gmra.mxu3 %vm685_vm5, %v3527_v56  ;;  %v3171_v56 = vshrl.u32 %v6091_v12, 16  ;;  %v3160_v8 = vrot.slane %v3158_v26, 4  ;;  %v3163_v23 = vrot.slane %v3161_v19, 5  ;;  %v6114_v47 = vrot.slane %v3167_v62, 5 }
 0x17b   : > { %v2460_v35 = vsel %vm5578_vm8, %v2458_v33, %v2459_v4  ;;  %v3895_v27 = vunpack.c.l.b16 %v3789_v36  ;;  %v5036_v36 = vld [vmem:[%s5392_s7 + $0x30] sm:$0xe] }
 0x17c   : > { %v2304_v1 = vpop.f32.mrf.mxu0  ;;  %v3173_v15 = vrot.slane %v3171_v56, 4  ;;  %v3164_v62 = vor.u32 %v3163_v23, %v3160_v8 }
 0x17d   : > { %v1650_v54 = vpop.f32.mrf.mxu3  ;;  %v1015_v13 = vpop.f32.mrf.mxu1 }
 0x17e   : > { %v1706_v45 = vadd.f32 %v1650_v54, %v1419_v61  ;;  %v4825_v61 = vrot.slane %v4809_v41, 9  ;;  %v6123_v41 = vld [vmem:[%s5392_s7 + $0x38] sm:$0x1]  ;;  %v3174_v56 = vor.u32 %v3173_v15, %v6114_v47  ;;  %v3165_v33 = vrot.slane %v3164_v62, 4 }
 0x17f   : > { %5067 = vmatmul.msk.bf16.vlgmr.msra.gmra.mxu0 %vm685_vm5, %v3925_v44 }
 0x180   : > { %v1365_v24 = vpop.f32.mrf.mxu2  ;;  %4841 = vmatmul.msk.bf16.gmra.mxu1 %vm685_vm5, %v2587_v63  ;;  %v6112_v44 = vadd.f32 %v2304_v1, %v1706_v45  ;;  %v3792_v63 = vsel %vm5578_vm8, %v3790_v34, %v3791_v17  ;;  %v2457_v18 = vsel %vm5578_vm8, %v4825_v61, %v2456_v11  ;;  %v3528_v1 = vpack.c.b16 %v3498_v21, %v3497_v10  ;;  %v6131_v61 = vld [vmem:[%s5392_s7 + $0x40] sm:$0xf] }
 0x181   : > { %v1420_v31 = vadd.f32 %v1365_v24, %v1013_v14  ;;  %v3896_v19 = vunpack.c.l.b16 %v3792_v63  ;;  %v1016_v11 = vadd.f32 %v1015_v13, %v5729_v32  ;;  %v2558_v14 = vunpack.c.l.b16 %v2457_v18  ;;  %v4978_v24 = vld [vmem:[%s5392_s7 + $0x3c] sm:$0xf] }
 0x182   : > { %v2559_v34 = vunpack.c.l.b16 %v2460_v35  ;;  %v3177_v17 = vshll.u32 %v6123_v41, 16  ;;  %v3795_v32 = vrot.slane %v6091_v12, 5  ;;  %v3182_v23 = vshrl.u32 %v4978_v24, 16 }
 0x183   : > { %v3926_v10 = vpack.c.b16 %v3896_v19, %v3895_v27  ;;  %v3185_v15 = vshll.u32 %v4978_v24, 16  ;;  %v3191_v63 = vshll.u32 %v6131_v61, 16  ;;  %v3195_v18 = vshrl.u32 %v6131_v61, 16  ;;  %v5209_v19 = vld [vmem:[%s5392_s7 + $0x38] sm:$0x1] }
 0x184   : > { %v2306_v54 = vpop.f32.mrf.mxu0  ;;  %v3179_v21 = vrot.slane %v3177_v17, 5  ;;  %v2466_v62 = vrot.slane %v5209_v19, 5  ;;  %v3798_v12 = vrot.slane %v6123_v41, 5  ;;  %v3797_v17 = vrot.slane %v3795_v32, 4  ;;  %v6158_v19 = vld [vmem:[%s5392_s7 + $0x44] sm:$0x1] }
 0x185   : > { %v1652_v28 = vpop.f32.mrf.mxu3  ;;  %4954 = vmatmul.msk.bf16.gmra.mxu2 %vm685_vm5, %v5121_v59  ;;  %v1017_v26 = vpop.f32.mrf.mxu1  ;;  %v2588_v59 = vpack.c.b16 %v2559_v34, %v2558_v14  ;;  %v3170_v14 = vsel %vm5404_vm4, %v3165_v33, %v6114_v47  ;;  %v3187_v24 = vrot.slane %v3185_v15, 5  ;;  %v6152_v41 = vrot.slane %v3191_v63, 5 }
 0x186   : > { %v1707_v45 = vadd.f32 %v1652_v28, %v1420_v31  ;;  %v3175_v31 = vrot.slane %v3174_v56, 4  ;;  %v3499_v47 = vunpack.c.l.b16 %v3170_v14 }
 0x188   : > { %v1368_v53 = vpop.f32.mrf.mxu2  ;;  %v6136_v13 = vadd.f32 %v2306_v54, %v1707_v45  ;;  %v4810_v54 = vld [vmem:[%s5392_s7 + $0x30] sm:$0xe]  ;;  %v1018_v45 = vadd.f32 %v1017_v26, %v5750_v6  ;;  %v3180_v34 = vsel %vm5404_vm4, %v3175_v31, %v3179_v21 }
 0x189   : > { %v1421_v4 = vadd.f32 %v1368_v53, %v1016_v11  ;;  %v5052_v11 = vrot.slane %v5036_v36, 9  ;;  %v3197_v36 = vrot.slane %v3195_v18, 4  ;;  %v4826_v6 = vrot.slane %v4810_v54, 9 }
 0x18a   : > { %5019 = vmatmul.msk.bf16.gmra.mxu3 %vm685_vm5, %v3528_v1  ;;  %v5208_v1 = vld [vmem:[%s5392_s7 + $0x34] sm:$0xf]  ;;  %v3500_v33 = vunpack.c.l.b16 %v3180_v34 }
 0x18b   : > { %v2463_v27 = vrot.slane %v5208_v1, 5  ;;  %v3796_v21 = vsel %vm5578_vm8, %v5052_v11, %v3795_v32  ;;  %v3201_v32 = vshll.u32 %v6158_v19, 16 }
 0x18c   : > { %v2309_v8 = vpop.f32.mrf.mxu0  ;;  %v3529_v54 = vpack.c.b16 %v3500_v33, %v3499_v47  ;;  %v5210_v33 = vld [vmem:[%s5392_s7 + $0x40] sm:$0xf] }
 0x18d   : > { %v1655_v35 = vpop.f32.mrf.mxu3  ;;  %v1020_v28 = vpop.f32.mrf.mxu1  ;;  %v2465_v26 = vrot.slane %v2463_v27, 4 }
 0x18e   : > { %v1708_v56 = vadd.f32 %v1655_v35, %v1421_v4  ;;  %v3184_v4 = vrot.slane %v3182_v23, 4  ;;  %v5122_v35 = vld [vmem:[%s5392_s7 + $0x30] sm:$0xff] }
 0x18f   : > { %5068 = vmatmul.msk.bf16.gmra.mxu0 %vm685_vm5, %v3926_v10  ;;  %v2467_v18 = vsel %vm5578_vm8, %v2465_v26, %v2466_v62  ;;  %v6177_v26 = vld [vmem:[%s5392_s7 + $0x4c] sm:$0xf] }
 0x190   : > { %v1370_v53 = vpop.f32.mrf.mxu2  ;;  %4842 = vmatmul.msk.bf16.gmra.mxu1 %vm685_vm5, %v2588_v59  ;;  %v6155_v1 = vadd.f32 %v2309_v8, %v1708_v56  ;;  %v3799_v59 = vsel %vm5578_vm8, %v3797_v17, %v3798_v12  ;;  %v3188_v23 = vor.u32 %v3187_v24, %v3184_v4  ;;  %v2464_v8 = vsel %vm5578_vm8, %v4826_v6, %v2463_v27 }
 0x191   : > { %v1422_v10 = vadd.f32 %v1370_v53, %v1018_v45  ;;  %v3198_v56 = vor.u32 %v3197_v36, %v6152_v41  ;;  %v1021_v12 = vadd.f32 %v1020_v28, %v5773_v38  ;;  %v3897_v45 = vunpack.c.l.b16 %v3796_v21  ;;  %v5037_v36 = vld [vmem:[%s5392_s7 + $0x3c] sm:$0xe] }
 0x192   : > { %v3898_v14 = vunpack.c.l.b16 %v3799_v59  ;;  %v2560_v17 = vunpack.c.l.b16 %v2464_v8  ;;  %v2561_v27 = vunpack.c.l.b16 %v2467_v18  ;;  %v3189_v4 = vrot.slane %v3188_v23, 4 }
 0x193   : > { %v3199_v62 = vrot.slane %v3198_v56, 4  ;;  %v3203_v24 = vrot.slane %v3201_v32, 5  ;;  %v3802_v6 = vrot.slane %v6131_v61, 5  ;;  %v2470_v21 = vrot.slane %v5210_v33, 5  ;;  %v4811_v61 = vld [vmem:[%s5392_s7 + $0x3c] sm:$0xe] }
 0x194   : > { %v2311_v31 = vpop.f32.mrf.mxu0  ;;  %v2589_v47 = vpack.c.b16 %v2561_v27, %v2560_v17  ;;  %v5053_v18 = vrot.slane %v5037_v36, 9 }
 0x195   : > { %v1657_v15 = vpop.f32.mrf.mxu3  ;;  %4955 = vmatmul.msk.bf16.gmra.mxu2 %vm685_vm5, %v5122_v35  ;;  %v1022_v63 = vpop.f32.mrf.mxu1  ;;  %v4981_v35 = vld [vmem:[%s5392_s7 + $0x48] sm:$0xf]  ;;  %v3204_v8 = vsel %vm5404_vm4, %v3199_v62, %v3203_v24  ;;  %v5123_v24 = vld [vmem:[%s5392_s7 + $0x3c] sm:$0xff] }
 0x196   : > { %v1709_v11 = vadd.f32 %v1657_v15, %v1422_v10  ;;  %v3927_v10 = vpack.c.b16 %v3898_v14, %v3897_v45  ;;  %v3194_v15 = vsel %vm5404_vm4, %v3189_v4, %v6152_v41  ;;  %v3206_v56 = vshrl.u32 %v4981_v35, 16  ;;  %v5211_v14 = vld [vmem:[%s5392_s7 + $0x44] sm:$0x1] }
 0x197   : > { %v3804_v45 = vrot.slane %v3802_v6, 4  ;;  %v3805_v41 = vrot.slane %v6158_v19, 5  ;;  %v3501_v27 = vunpack.c.l.b16 %v3194_v15  ;;  %v2472_v4 = vrot.slane %v2470_v21, 4 }
 0x198   : > { %v1373_v34 = vpop.f32.mrf.mxu2  ;;  %v6179_v38 = vadd.f32 %v2311_v31, %v1709_v11  ;;  %v3209_v31 = vshll.u32 %v4981_v35, 16  ;;  %v3215_v11 = vshll.u32 %v6177_v26, 16  ;;  %v3502_v36 = vunpack.c.l.b16 %v3204_v8 }
 0x199   : > { %v1423_v53 = vadd.f32 %v1373_v34, %v1021_v12  ;;  %v1023_v12 = vadd.f32 %v1022_v63, %v5791_v51  ;;  %v2473_v34 = vrot.slane %v5211_v14, 5  ;;  %v3803_v35 = vsel %vm5578_vm8, %v5053_v18, %v3802_v6 }
 0x19a   : > { %5020 = vmatmul.msk.bf16.gmra.mxu3 %vm685_vm5, %v3529_v54  ;;  %v3219_v54 = vshrl.u32 %v6177_v26, 16  ;;  %v3208_v51 = vrot.slane %v3206_v56, 4  ;;  %v3211_v63 = vrot.slane %v3209_v31, 5  ;;  %v6200_v19 = vrot.slane %v3215_v11, 5 }
 0x19b   : > { %v2474_v8 = vsel %vm5578_vm8, %v2472_v4, %v2473_v34  ;;  %v3899_v18 = vunpack.c.l.b16 %v3803_v35  ;;  %v5038_v35 = vld [vmem:[%s5392_s7 + $0x48] sm:$0xe] }
 0x19c   : > { %v2314_v28 = vpop.f32.mrf.mxu0  ;;  %v3221_v33 = vrot.slane %v3219_v54, 4  ;;  %v3212_v11 = vor.u32 %v3211_v63, %v3208_v51 }
 0x19d   : > { %v1660_v59 = vpop.f32.mrf.mxu3  ;;  %v1025_v23 = vpop.f32.mrf.mxu1 }
 0x19e   : > { %v1710_v32 = vadd.f32 %v1660_v59, %v1423_v53  ;;  %v4827_v53 = vrot.slane %v4811_v61, 9  ;;  %v6209_v61 = vld [vmem:[%s5392_s7 + $0x50] sm:$0x1]  ;;  %v3222_v54 = vor.u32 %v3221_v33, %v6200_v19  ;;  %v3213_v4 = vrot.slane %v3212_v11, 4 }
 0x19f   : > { %5069 = vmatmul.msk.bf16.gmra.mxu0 %vm685_vm5, %v3927_v10 }
 0x1a0   : > { %v1375_v17 = vpop.f32.mrf.mxu2  ;;  %4843 = vmatmul.msk.bf16.gmra.mxu1 %vm685_vm5, %v2589_v47  ;;  %v6198_v10 = vadd.f32 %v2314_v28, %v1710_v32  ;;  %v3806_v47 = vsel %vm5578_vm8, %v3804_v45, %v3805_v41  ;;  %v2471_v15 = vsel %vm5578_vm8, %v4827_v53, %v2470_v21  ;;  %v3530_v28 = vpack.c.b16 %v3502_v36, %v3501_v27  ;;  %v6217_v53 = vld [vmem:[%s5392_s7 + $0x58] sm:$0xf] }
 0x1a1   : > { %v1424_v62 = vadd.f32 %v1375_v17, %v1023_v12  ;;  %v3900_v31 = vunpack.c.l.b16 %v3806_v47  ;;  %v1026_v21 = vadd.f32 %v1025_v23, %v5812_v49  ;;  %v2562_v12 = vunpack.c.l.b16 %v2471_v15  ;;  %v4984_v17 = vld [vmem:[%s5392_s7 + $0x54] sm:$0xf] }
 0x1a2   : > { %v2563_v45 = vunpack.c.l.b16 %v2474_v8  ;;  %v3225_v41 = vshll.u32 %v6209_v61, 16  ;;  %v3809_v49 = vrot.slane %v6177_v26, 5  ;;  %v3230_v63 = vshrl.u32 %v4984_v17, 16 }
 0x1a3   : > { %v3928_v27 = vpack.c.b16 %v3900_v31, %v3899_v18  ;;  %v3233_v33 = vshll.u32 %v4984_v17, 16  ;;  %v3239_v47 = vshll.u32 %v6217_v53, 16  ;;  %v3243_v15 = vshrl.u32 %v6217_v53, 16  ;;  %v5213_v31 = vld [vmem:[%s5392_s7 + $0x50] sm:$0x1] }
 0x1a4   : > { %v2316_v59 = vpop.f32.mrf.mxu0  ;;  %v3227_v36 = vrot.slane %v3225_v41, 5  ;;  %v2480_v11 = vrot.slane %v5213_v31, 5  ;;  %v3812_v26 = vrot.slane %v6209_v61, 5  ;;  %v3811_v41 = vrot.slane %v3809_v49, 4  ;;  %v6244_v31 = vld [vmem:[%s5392_s7 + $0x5c] sm:$0x1] }
 0x1a5   : > { %v1662_v6 = vpop.f32.mrf.mxu3  ;;  %4956 = vmatmul.msk.bf16.gmra.mxu2 %vm685_vm5, %v5123_v24  ;;  %v1027_v56 = vpop.f32.mrf.mxu1  ;;  %v2590_v24 = vpack.c.b16 %v2563_v45, %v2562_v12  ;;  %v3218_v12 = vsel %vm5404_vm4, %v3213_v4, %v6200_v19  ;;  %v3235_v17 = vrot.slane %v3233_v33, 5  ;;  %v6238_v61 = vrot.slane %v3239_v47, 5 }
 0x1a6   : > { %v1711_v32 = vadd.f32 %v1662_v6, %v1424_v62  ;;  %v3223_v62 = vrot.slane %v3222_v54, 4  ;;  %v3503_v19 = vunpack.c.l.b16 %v3218_v12 }
 0x1a8   : > { %v1378_v14 = vpop.f32.mrf.mxu2  ;;  %v6222_v23 = vadd.f32 %v2316_v59, %v1711_v32  ;;  %v4812_v59 = vld [vmem:[%s5392_s7 + $0x48] sm:$0xe]  ;;  %v1028_v32 = vadd.f32 %v1027_v56, %v5827_v20  ;;  %v3228_v45 = vsel %vm5404_vm4, %v3223_v62, %v3227_v36 }
 0x1a9   : > { %v1425_v34 = vadd.f32 %v1378_v14, %v1026_v21  ;;  %v5054_v21 = vrot.slane %v5038_v35, 9  ;;  %v3245_v35 = vrot.slane %v3243_v15, 4  ;;  %v4828_v20 = vrot.slane %v4812_v59, 9 }
 0x1aa   : > { %5021 = vmatmul.msk.bf16.gmra.mxu3 %vm685_vm5, %v3530_v28  ;;  %v5212_v28 = vld [vmem:[%s5392_s7 + $0x4c] sm:$0xf]  ;;  %v3504_v4 = vunpack.c.l.b16 %v3228_v45 }
 0x1ab   : > { %v2477_v18 = vrot.slane %v5212_v28, 5  ;;  %v3810_v36 = vsel %vm5578_vm8, %v5054_v21, %v3809_v49  ;;  %v3249_v49 = vshll.u32 %v6244_v31, 16 }
 0x1ac   : > { %v2319_v51 = vpop.f32.mrf.mxu0  ;;  %v3531_v59 = vpack.c.b16 %v3504_v4, %v3503_v19  ;;  %v5214_v4 = vld [vmem:[%s5392_s7 + $0x58] sm:$0xf] }
 0x1ad   : > { %v1665_v8 = vpop.f32.mrf.mxu3  ;;  %v1030_v6 = vpop.f32.mrf.mxu1  ;;  %v2479_v56 = vrot.slane %v2477_v18, 4 }
 0x1ae   : > { %v1712_v54 = vadd.f32 %v1665_v8, %v1425_v34  ;;  %v3232_v34 = vrot.slane %v3230_v63, 4  ;;  %v5124_v8 = vld [vmem:[%s5392_s7 + $0x48] sm:$0xff] }
 0x1af   : > { %5070 = vmatmul.msk.bf16.gmra.mxu0 %vm685_vm5, %v3928_v27  ;;  %v2481_v15 = vsel %vm5578_vm8, %v2479_v56, %v2480_v11  ;;  %v6263_v56 = vld [vmem:[%s5392_s7 + $0x64] sm:$0xf] }
 0x1b0   : > { %v1380_v14 = vpop.f32.mrf.mxu2  ;;  %4844 = vmatmul.msk.bf16.gmra.mxu1 %vm685_vm5, %v2590_v24  ;;  %v6241_v28 = vadd.f32 %v2319_v51, %v1712_v54  ;;  %v3813_v24 = vsel %vm5578_vm8, %v3811_v41, %v3812_v26  ;;  %v3236_v63 = vor.u32 %v3235_v17, %v3232_v34  ;;  %v2478_v51 = vsel %vm5578_vm8, %v4828_v20, %v2477_v18 }
 0x1b1   : > { %v1426_v27 = vadd.f32 %v1380_v14, %v1028_v32  ;;  %v3246_v54 = vor.u32 %v3245_v35, %v6238_v61  ;;  %v1031_v26 = vadd.f32 %v1030_v6, %v5703_v58  ;;  %v3901_v32 = vunpack.c.l.b16 %v3810_v36  ;;  %v5039_v35 = vld [vmem:[%s5392_s7 + $0x54] sm:$0xe] }
 0x1b2   : > { %v3902_v12 = vunpack.c.l.b16 %v3813_v24  ;;  %v2564_v41 = vunpack.c.l.b16 %v2478_v51  ;;  %v2565_v18 = vunpack.c.l.b16 %v2481_v15  ;;  %v3237_v34 = vrot.slane %v3236_v63, 4 }
 0x1b3   : > { %v3247_v11 = vrot.slane %v3246_v54, 4  ;;  %v3251_v17 = vrot.slane %v3249_v49, 5  ;;  %v3816_v20 = vrot.slane %v6217_v53, 5  ;;  %v2484_v36 = vrot.slane %v5214_v4, 5  ;;  %v4813_v53 = vld [vmem:[%s5392_s7 + $0x54] sm:$0xe] }
 0x1b4   : > { %v2321_v62 = vpop.f32.mrf.mxu0  ;;  %v2591_v19 = vpack.c.b16 %v2565_v18, %v2564_v41  ;;  %v5055_v15 = vrot.slane %v5039_v35, 9 }
 0x1b5   : > { %v1667_v33 = vpop.f32.mrf.mxu3  ;;  %4957 = vmatmul.msk.bf16.gmra.mxu2 %vm685_vm5, %v5124_v8  ;;  %v1032_v47 = vpop.f32.mrf.mxu1  ;;  %v4987_v8 = vld [vmem:[%s5392_s7 + $0x60] sm:$0xf]  ;;  %v3252_v51 = vsel %vm5404_vm4, %v3247_v11, %v3251_v17  ;;  %v5125_v17 = vld [vmem:[%s5392_s7 + $0x54] sm:$0xff] }
 0x1b6   : > { %v1713_v21 = vadd.f32 %v1667_v33, %v1426_v27  ;;  %v3929_v27 = vpack.c.b16 %v3902_v12, %v3901_v32  ;;  %v3242_v33 = vsel %vm5404_vm4, %v3237_v34, %v6238_v61  ;;  %v3254_v54 = vshrl.u32 %v4987_v8, 16  ;;  %v5215_v12 = vld [vmem:[%s5392_s7 + $0x5c] sm:$0x1] }
 0x1b7   : > { %v3818_v32 = vrot.slane %v3816_v20, 4  ;;  %v3819_v61 = vrot.slane %v6244_v31, 5  ;;  %v3505_v18 = vunpack.c.l.b16 %v3242_v33  ;;  %v2486_v34 = vrot.slane %v2484_v36, 4 }
 0x1b8   : > { %v1383_v45 = vpop.f32.mrf.mxu2  ;;  %v6265_v58 = vadd.f32 %v2321_v62, %v1713_v21  ;;  %v3257_v62 = vshll.u32 %v4987_v8, 16  ;;  %v3263_v21 = vshll.u32 %v6263_v56, 16  ;;  %v3506_v35 = vunpack.c.l.b16 %v3252_v51 }
 0x1b9   : > { %v1427_v14 = vadd.f32 %v1383_v45, %v1031_v26  ;;  %v1033_v26 = vadd.f32 %v1032_v47, %v5722_v9  ;;  %v2487_v45 = vrot.slane %v5215_v12, 5  ;;  %v3817_v8 = vsel %vm5578_vm8, %v5055_v15, %v3816_v20 }
 0x1ba   : > { %5022 = vmatmul.msk.bf16.gmra.mxu3 %vm685_vm5, %v3531_v59  ;;  %v3267_v59 = vshrl.u32 %v6263_v56, 16  ;;  %v3256_v9 = vrot.slane %v3254_v54, 4  ;;  %v3259_v47 = vrot.slane %v3257_v62, 5  ;;  %v6286_v31 = vrot.slane %v3263_v21, 5 }
 0x1bb   : > { %v2488_v51 = vsel %vm5578_vm8, %v2486_v34, %v2487_v45  ;;  %v3903_v15 = vunpack.c.l.b16 %v3817_v8  ;;  %v5040_v8 = vld [vmem:[%s5392_s7 + $0x60] sm:$0xe] }
 0x1bc   : > { %v2324_v6 = vpop.f32.mrf.mxu0  ;;  %v3269_v4 = vrot.slane %v3267_v59, 4  ;;  %v3260_v21 = vor.u32 %v3259_v47, %v3256_v9 }
 0x1bd   : > { %v1670_v24 = vpop.f32.mrf.mxu3  ;;  %v1035_v63 = vpop.f32.mrf.mxu1 }
 0x1be   : > { %v1714_v49 = vadd.f32 %v1670_v24, %v1427_v14  ;;  %v4829_v14 = vrot.slane %v4813_v53, 9  ;;  %v6295_v53 = vld [vmem:[%s5392_s7 + $0x68] sm:$0x1]  ;;  %v3270_v59 = vor.u32 %v3269_v4, %v6286_v31  ;;  %v3261_v34 = vrot.slane %v3260_v21, 4 }
 0x1bf   : > { %5071 = vmatmul.msk.bf16.gmra.mxu0 %vm685_vm5, %v3929_v27 }
 0x1c0   : > { %v1385_v41 = vpop.f32.mrf.mxu2  ;;  %4845 = vmatmul.msk.bf16.gmra.mxu1 %vm685_vm5, %v2591_v19  ;;  %v6284_v27 = vadd.f32 %v2324_v6, %v1714_v49  ;;  %v3820_v19 = vsel %vm5578_vm8, %v3818_v32, %v3819_v61  ;;  %v2485_v33 = vsel %vm5578_vm8, %v4829_v14, %v2484_v36  ;;  %v3532_v6 = vpack.c.b16 %v3506_v35, %v3505_v18  ;;  %v6303_v14 = vld [vmem:[%s5392_s7 + $0x70] sm:$0xf] }
 0x1c1   : > { %v1428_v11 = vadd.f32 %v1385_v41, %v1033_v26  ;;  %v3904_v62 = vunpack.c.l.b16 %v3820_v19  ;;  %v1036_v36 = vadd.f32 %v1035_v63, %v5743_v48  ;;  %v2566_v26 = vunpack.c.l.b16 %v2485_v33  ;;  %v4990_v41 = vld [vmem:[%s5392_s7 + $0x6c] sm:$0xf] }
 0x1c2   : > { %v2567_v32 = vunpack.c.l.b16 %v2488_v51  ;;  %v3273_v61 = vshll.u32 %v6295_v53, 16  ;;  %v3823_v48 = vrot.slane %v6263_v56, 5  ;;  %v3278_v47 = vshrl.u32 %v4990_v41, 16 }
 0x1c3   : > { %v3930_v18 = vpack.c.b16 %v3904_v62, %v3903_v15  ;;  %v3281_v4 = vshll.u32 %v4990_v41, 16  ;;  %v3287_v19 = vshll.u32 %v6303_v14, 16  ;;  %v3291_v33 = vshrl.u32 %v6303_v14, 16  ;;  %v5217_v62 = vld [vmem:[%s5392_s7 + $0x68] sm:$0x1] }
 0x1c4   : > { %v2326_v24 = vpop.f32.mrf.mxu0  ;;  %v3275_v35 = vrot.slane %v3273_v61, 5  ;;  %v2494_v21 = vrot.slane %v5217_v62, 5  ;;  %v3826_v56 = vrot.slane %v6295_v53, 5  ;;  %v3825_v61 = vrot.slane %v3823_v48, 4 }
 0x1c5   : > { %v1672_v20 = vpop.f32.mrf.mxu3  ;;  %4958 = vmatmul.msk.bf16.gmra.mxu2 %vm685_vm5, %v5125_v17  ;;  %v1037_v54 = vpop.f32.mrf.mxu1  ;;  %v2592_v17 = vpack.c.b16 %v2567_v32, %v2566_v26  ;;  %v3266_v26 = vsel %vm5404_vm4, %v3261_v34, %v6286_v31  ;;  %v3283_v41 = vrot.slane %v3281_v4, 5  ;;  %v3289_v53 = vrot.slane %v3287_v19, 5  ;;  %v6328_v34 = vld [vmem:[%s5392_s7 + $0x74] sm:$0x1] }
 0x1c6   : > { %v1715_v49 = vadd.f32 %v1672_v20, %v1428_v11  ;;  %v3271_v11 = vrot.slane %v3270_v59, 4  ;;  %v3507_v62 = vunpack.c.l.b16 %v3266_v26 }
 0x1c8   : > { %v1388_v12 = vpop.f32.mrf.mxu2  ;;  %v6308_v63 = vadd.f32 %v2326_v24, %v1715_v49  ;;  %v4814_v24 = vld [vmem:[%s5392_s7 + $0x60] sm:$0xe]  ;;  %v1038_v49 = vadd.f32 %v1037_v54, %v5762_v16  ;;  %v3276_v32 = vsel %vm5404_vm4, %v3271_v11, %v3275_v35 }
 0x1c9   : > { %v1429_v45 = vadd.f32 %v1388_v12, %v1036_v36  ;;  %v5056_v36 = vrot.slane %v5040_v8, 9  ;;  %v3293_v8 = vrot.slane %v3291_v33, 4  ;;  %v3508_v31 = vunpack.c.l.b16 %v3276_v32 }
 0x1ca   : > { %5023 = vmatmul.msk.bf16.gmra.mxu3 %vm685_vm5, %v3532_v6  ;;  %6891 = vst [vmem:[#allocation8_spill] sm:$0xff] %v6308_v63  ;;  %v5216_v6 = vld [vmem:[%s5392_s7 + $0x64] sm:$0xf] }
 0x1cb   : > { %v2491_v15 = vrot.slane %v5216_v6, 5  ;;  %v4830_v6 = vrot.slane %v4814_v24, 9  ;;  %v3824_v11 = vsel %vm5578_vm8, %v5056_v36, %v3823_v48  ;;  %v3294_v33 = vor.u32 %v3293_v8, %v3289_v53  ;;  %v4993_v8 = vld [vmem:[%s5392_s7 + $0x78] sm:$0xf] }
 0x1cc   : > { %v2329_v9 = vpop.f32.mrf.mxu0  ;;  %v3533_v36 = vpack.c.b16 %v3508_v31, %v3507_v62  ;;  %v3905_v24 = vunpack.c.l.b16 %v3824_v11  ;;  %v3830_v62 = vrot.slane %v6303_v14, 5 }
 0x1cd   : > { %v1675_v51 = vpop.f32.mrf.mxu3  ;;  %v1040_v20 = vpop.f32.mrf.mxu1  ;;  %v2493_v16 = vrot.slane %v2491_v15, 4 }
 0x1ce   : > { %v1716_v59 = vadd.f32 %v1675_v51, %v1429_v45  ;;  %v3280_v45 = vrot.slane %v3278_v47, 4 }
 0x1cf   : > { %5072 = vmatmul.msk.bf16.gmra.mxu0 %vm685_vm5, %v3930_v18  ;;  %v5126_v18 = vld [vmem:[%s5392_s7 + $0x60] sm:$0xff]  ;;  %v2495_v19 = vsel %vm5578_vm8, %v2493_v16, %v2494_v21  ;;  %v5041_v21 = vld [vmem:[%s5392_s7 + $0x6c] sm:$0xe] }
 0x1d0   : > { %v1390_v12 = vpop.f32.mrf.mxu2  ;;  %4846 = vmatmul.msk.bf16.gmra.mxu1 %vm685_vm5, %v2592_v17  ;;  %v6325_v54 = vadd.f32 %v2329_v9, %v1716_v59  ;;  %v3827_v17 = vsel %vm5578_vm8, %v3825_v61, %v3826_v56  ;;  %v3284_v35 = vor.u32 %v3283_v41, %v3280_v45  ;;  %v2492_v9 = vsel %vm5578_vm8, %v4830_v6, %v2491_v15 }
 0x1d1   : > { %v1430_v51 = vadd.f32 %v1390_v12, %v1038_v49  ;;  %v3297_v59 = vshll.u32 %v6328_v34, 16  ;;  %v1041_v56 = vadd.f32 %v1040_v20, %v5781_v55  ;;  %v3906_v49 = vunpack.c.l.b16 %v3827_v17 }
 0x1d2   : > { %v2568_v32 = vunpack.c.l.b16 %v2492_v9  ;;  %v2569_v61 = vunpack.c.l.b16 %v2495_v19  ;;  %v3285_v15 = vrot.slane %v3284_v35, 4  ;;  %v3295_v45 = vrot.slane %v3294_v33, 4  ;;  %v5218_v9 = vld [vmem:[%s5392_s7 + $0x70] sm:$0xf] }
 0x1d3   : > { %v3299_v41 = vrot.slane %v3297_v59, 5  ;;  %v5057_v16 = vrot.slane %v5041_v21, 9  ;;  %v2498_v19 = vrot.slane %v5218_v9, 5  ;;  %v3302_v33 = vshrl.u32 %v4993_v8, 16 }
 0x1d4   : > { %v2331_v63 = vpop.f32.mrf.mxu0  ;;  %v2593_v20 = vpack.c.b16 %v2569_v61, %v2568_v32  ;;  %v3290_v17 = vsel %vm5404_vm4, %v3285_v15, %v3289_v53  ;;  %v3833_v53 = vrot.slane %v6328_v34, 5  ;;  %v5299_v61 = vmov -inf   ;;  %v5127_v15 = vld [vmem:[%s5392_s7 + $0x6c] sm:$0xff] }
 0x1d5   : > { %v1677_v47 = vpop.f32.mrf.mxu3  ;;  %4959 = vmatmul.msk.bf16.gmra.mxu2 %vm685_vm5, %v5126_v18  ;;  %v1042_v4 = vpop.f32.mrf.mxu1  ;;  %v6345_v18 = vld [vmem:[%s5392_s7 + $0x7c] sm:$0xf]  ;;  %v3300_v35 = vsel %vm5404_vm4, %v3295_v45, %v3299_v41  ;;  %148 = vst.msk [vmem:[#allocation2 + $0x18] sm:$0xff] %vm143_vm9, %v5299_v61  ;;  %v2500_v45 = vrot.slane %v2498_v19, 4  ;;  %v5219_v41 = vld [vmem:[%s5392_s7 + $0x74] sm:$0x1] }
 0x1d6   : > { %v1717_v48 = vadd.f32 %v1677_v47, %v1430_v51  ;;  %v3931_v51 = vpack.c.b16 %v3906_v49, %v3905_v24  ;;  %v4815_v47 = vld [vmem:[%s5392_s7 + $0x6c] sm:$0xe]  ;;  %v1043_v14 = vadd.f32 %v1042_v4, %v5804_v3  ;;  %v3509_v24 = vunpack.c.l.b16 %v3290_v17  ;;  %149 = vst.msk [vmem:[#allocation2 + $0x20] sm:$0xff] %vm143_vm9, %v5299_v61 }
 0x1d7   : > { %v3510_v49 = vunpack.c.l.b16 %v3300_v35  ;;  %v4831_v32 = vrot.slane %v4815_v47, 9  ;;  %v2501_v3 = vrot.slane %v5219_v41, 5  ;;  %v3304_v4 = vrot.slane %v3302_v33, 4  ;;  %144 = vst.msk [vmem:[#allocation2] sm:$0xff] %vm143_vm9, %v5299_v61  ;;  %v5042_v41 = vld [vmem:[%s5392_s7 + $0x78] sm:$0xe] }
 0x1d8   : > { %v1393_v26 = vpop.f32.mrf.mxu2  ;;  %v6347_v6 = vadd.f32 %v2331_v63, %v1717_v48  ;;  %v3305_v63 = vshll.u32 %v4993_v8, 16  ;;  %v3311_v48 = vshll.u32 %v6345_v18, 16  ;;  %145 = vst.msk [vmem:[#allocation2 + $0x8] sm:$0xff] %vm143_vm9, %v5299_v61 }
 0x1d9   : > { %v1431_v12 = vadd.f32 %v1393_v26, %v1041_v56  ;;  %v3832_v26 = vrot.slane %v3830_v62, 4  ;;  %151 = vst.msk [vmem:[#allocation2 + $0x30] sm:$0xff] %vm143_vm9, %v5299_v61  ;;  %v2499_v9 = vsel %vm5578_vm8, %v4831_v32, %v2498_v19  ;;  %v2502_v33 = vsel %vm5578_vm8, %v2500_v45, %v2501_v3 }
 0x1da   : > { %5024 = vmatmul.msk.bf16.gmra.mxu3 %vm685_vm5, %v3533_v36  ;;  %v3315_v36 = vshrl.u32 %v6345_v18, 16  ;;  %v3307_v21 = vrot.slane %v3305_v63, 5  ;;  %v6370_v8 = vrot.slane %v3311_v48, 5  ;;  %152 = vst.msk [vmem:[#allocation2 + $0x38] sm:$0xff] %vm143_vm9, %v5299_v61 }
 0x1db   : > { %v3834_v17 = vsel %vm5578_vm8, %v3832_v26, %v3833_v53  ;;  %154 = vst.msk [vmem:[#allocation2 + $0x48] sm:$0xff] %vm143_vm9, %v5299_v61 }
 0x1dc   : > { %v2334_v55 = vpop.f32.mrf.mxu0  ;;  %v3908_v19 = vunpack.c.l.b16 %v3834_v17  ;;  %155 = vst.msk [vmem:[#allocation2 + $0x50] sm:$0xff] %vm143_vm9, %v5299_v61 }
 0x1dd   : > { %v1680_v31 = vpop.f32.mrf.mxu3  ;;  %v1045_v11 = vpop.f32.mrf.mxu1  ;;  %157 = vst.msk [vmem:[#allocation2 + $0x60] sm:$0xff] %vm143_vm9, %v5299_v61 }
 0x1de   : > { %v1718_v59 = vadd.f32 %v1680_v31, %v1431_v12  ;;  %v3831_v31 = vsel %vm5578_vm8, %v5057_v16, %v3830_v62  ;;  %v3534_v62 = vpack.c.b16 %v3510_v49, %v3509_v24  ;;  %v1046_v48 = vadd.f32 %v1045_v11, %v5823_v7  ;;  %v4996_v49 = vld [vmem:[%s5392_s7 + $0x84] sm:$0xf]  ;;  %158 = vst.msk [vmem:[#allocation2 + $0x68] sm:$0xff] %vm143_vm9, %v5299_v61  ;;  %v6407_v7 = vld [vmem:[%s5392_s7 + $0x88] sm:$0xf] }
 0x1df   : > { %5073 = vmatmul.msk.bf16.gmra.mxu0 %vm685_vm5, %v3931_v51  ;;  %v3317_v51 = vrot.slane %v3315_v36, 4  ;;  %v3907_v36 = vunpack.c.l.b16 %v3831_v31  ;;  %v2571_v24 = vunpack.c.l.b16 %v2502_v33  ;;  %160 = vst.msk [vmem:[#allocation2 + $0x78] sm:$0xff] %vm143_vm9, %v5299_v61  ;;  %v3326_v3 = vshrl.u32 %v4996_v49, 16  ;;  %v5220_v33 = vld [vmem:[%s5392_s7 + $0x7c] sm:$0xf] }
 0x1e0   : > { %v1395_v56 = vpop.f32.mrf.mxu2  ;;  %4847 = vmatmul.msk.bf16.gmra.mxu1 %vm685_vm5, %v2593_v20  ;;  %v6368_v34 = vadd.f32 %v2334_v55, %v1718_v59  ;;  %v6381_v55 = vld [vmem:[%s5392_s7 + $0x80] sm:$0x1]  ;;  %v3308_v59 = vor.u32 %v3307_v21, %v3304_v4  ;;  %161 = vst.msk [vmem:[#allocation2 + $0x80] sm:$0xff] %vm143_vm9, %v5299_v61  ;;  %v3329_v4 = vshll.u32 %v4996_v49, 16  ;;  %v3335_v31 = vshll.u32 %v6407_v7, 16  ;;  %v5128_v49 = vld [vmem:[%s5392_s7 + $0x78] sm:$0xff] }
 0x1e1   : > { %v1432_v12 = vadd.f32 %v1395_v56, %v1043_v14  ;;  %v3318_v63 = vor.u32 %v3317_v51, %v6370_v8  ;;  %v3321_v14 = vshll.u32 %v6381_v55, 16  ;;  %v2570_v56 = vunpack.c.l.b16 %v2499_v9  ;;  %163 = vst.msk [vmem:[#allocation2 + $0x90] sm:$0xff] %vm143_vm9, %v5299_v61 }
 0x1e2   : > { %v3309_v11 = vrot.slane %v3308_v59, 4  ;;  %v3339_v17 = vshrl.u32 %v6407_v7, 16  ;;  %164 = vst.msk [vmem:[#allocation2 + $0x98] sm:$0xff] %vm143_vm9, %v5299_v61 }
 0x1e3   : > { %v3323_v45 = vrot.slane %v3321_v14, 5  ;;  %v2594_v51 = vpack.c.b16 %v2571_v24, %v2570_v56  ;;  %166 = vst.msk [vmem:[#allocation2 + $0xa8] sm:$0xff] %vm143_vm9, %v5299_v61  ;;  %v3331_v14 = vrot.slane %v3329_v4, 5  ;;  %v6439_v56 = vrot.slane %v3335_v31, 5 }
 0x1e4   : > { %v2336_v20 = vpop.f32.mrf.mxu0  ;;  %v3314_v59 = vsel %vm5404_vm4, %v3309_v11, %v6370_v8  ;;  %167 = vst.msk [vmem:[#allocation2 + $0xb0] sm:$0xff] %vm143_vm9, %v5299_v61  ;;  %v3328_v8 = vrot.slane %v3326_v3, 4  ;;  %v6450_v3 = vld [vmem:[%s5392_s7 + $0x8c] sm:$0x1] }
 0x1e5   : > { %v1682_v35 = vpop.f32.mrf.mxu3  ;;  %4960 = vmatmul.msk.bf16.gmra.mxu2 %vm685_vm5, %v5127_v15  ;;  %v1047_v47 = vpop.f32.mrf.mxu1  ;;  %v3932_v15 = vpack.c.b16 %v3908_v19, %v3907_v36  ;;  %169 = vst.msk [vmem:[#allocation2 + $0xc0] sm:$0xff] %vm143_vm9, %v5299_v61 }
 0x1e6   : > { %v1719_v16 = vadd.f32 %v1682_v35, %v1432_v12  ;;  %v3319_v12 = vrot.slane %v3318_v63, 4  ;;  %v3840_v63 = vrot.slane %v6381_v55, 5  ;;  %v1048_v36 = vadd.f32 %v1047_v47, %v5840_v37  ;;  %170 = vst.msk [vmem:[#allocation2 + $0xc8] sm:$0xff] %vm143_vm9, %v5299_v61 }
 0x1e7   : > { %v3341_v37 = vrot.slane %v3339_v17, 4  ;;  %172 = vst.msk [vmem:[#allocation2 + $0xd8] sm:$0xff] %vm143_vm9, %v5299_v61  ;;  %v3332_v4 = vor.u32 %v3331_v14, %v3328_v8 }
 0x1e8   : > { %v1398_v53 = vpop.f32.mrf.mxu2  ;;  %v6402_v26 = vadd.f32 %v2336_v20, %v1719_v16  ;;  %v3837_v20 = vrot.slane %v6345_v18, 5  ;;  %v2505_v16 = vrot.slane %v5220_v33, 5  ;;  %v5058_v18 = vrot.slane %v5042_v41, 9  ;;  %173 = vst.msk [vmem:[#allocation2 + $0xe0] sm:$0xff] %vm143_vm9, %v5299_v61 }
 0x1e9   : > { %v1433_v32 = vadd.f32 %v1398_v53, %v1046_v48  ;;  %v4816_v48 = vld [vmem:[%s5392_s7 + $0x78] sm:$0xe]  ;;  %v3324_v19 = vsel %vm5404_vm4, %v3319_v12, %v3323_v45  ;;  %v5221_v12 = vld [vmem:[%s5392_s7 + $0x80] sm:$0x1]  ;;  %v3511_v45 = vunpack.c.l.b16 %v3314_v59  ;;  %175 = vst.msk [vmem:[#allocation2 + $0xf0] sm:$0xff] %vm143_vm9, %v5299_v61  ;;  %v3345_v59 = vshll.u32 %v6450_v3, 16 }
 0x1ea   : > { %5025 = vmatmul.msk.bf16.gmra.mxu3 %vm685_vm5, %v3534_v62  ;;  %v3839_v55 = vrot.slane %v3837_v20, 4  ;;  %v2507_v11 = vrot.slane %v2505_v16, 4  ;;  %v3512_v41 = vunpack.c.l.b16 %v3324_v19  ;;  %176 = vst.msk [vmem:[#allocation2 + $0xf8] sm:$0xff] %vm143_vm9, %v5299_v61 }
 0x1eb   : > { %178 = vst.msk [vmem:[#allocation2 + $0x108] sm:$0xff] %vm143_vm9, %v5299_v61 }
 0x1ec   : > { %v2339_v21 = vpop.f32.mrf.mxu0  ;;  %v3841_v31 = vsel %vm5578_vm8, %v3839_v55, %v3840_v63  ;;  %v3535_v63 = vpack.c.b16 %v3512_v41, %v3511_v45  ;;  %179 = vst.msk [vmem:[#allocation2 + $0x110] sm:$0xff] %vm143_vm9, %v5299_v61  ;;  %v5043_v55 = vld [vmem:[%s5392_s7 + $0x84] sm:$0xe] }
 0x1ed   : > { %v1685_v35 = vpop.f32.mrf.mxu3  ;;  %v2662_v9 = vpop.f32.mrf.mxu1  ;;  %181 = vst.msk [vmem:[#allocation2 + $0x120] sm:$0xff] %vm143_vm9, %v5299_v61 }
 0x1ee   : > { %v1720_v62 = vadd.f32 %v1685_v35, %v1433_v32  ;;  %v4832_v32 = vrot.slane %v4816_v48, 9  ;;  %v2742_v19 = vadd.f32 %v2662_v9, %v5857_v57  ;;  %182 = vst.msk [vmem:[#allocation2 + $0x128] sm:$0xff] %vm143_vm9, %v5299_v61  ;;  %v4999_v57 = vld [vmem:[%s5392_s7 + $0x90] sm:$0xf] }
 0x1ef   : > { %5074 = vmatmul.msk.bf16.gmra.mxu0 %vm685_vm5, %v3932_v15  ;;  %v2508_v15 = vrot.slane %v5221_v12, 5  ;;  %184 = vst.msk [vmem:[#allocation2 + $0x138] sm:$0xff] %vm143_vm9, %v5299_v61  ;;  %v6487_v12 = vld [vmem:[%s5392_s7 + $0x94] sm:$0xf] }
 0x1f0   : > { %v1400_v53 = vpop.f32.mrf.mxu2  ;;  %4848 = vmatmul.msk.bf16.gmra.mxu1 %vm685_vm5, %v2594_v51  ;;  %v6441_v47 = vadd.f32 %v2339_v21, %v1720_v62  ;;  %v3838_v51 = vsel %vm5578_vm8, %v5058_v18, %v3837_v20  ;;  %v2506_v33 = vsel %vm5578_vm8, %v4832_v32, %v2505_v16  ;;  %v3342_v62 = vor.u32 %v3341_v37, %v6439_v56 }
 0x1f1   : > { %v1434_v24 = vadd.f32 %v1400_v53, %v1048_v36  ;;  %v2509_v20 = vsel %vm5578_vm8, %v2507_v11, %v2508_v15  ;;  %v3909_v48 = vunpack.c.l.b16 %v3838_v51  ;;  %v3910_v36 = vunpack.c.l.b16 %v3841_v31  ;;  %185 = vst.msk [vmem:[#allocation2 + $0x140] sm:$0xff] %vm143_vm9, %v5299_v61 }
 0x1f2   : > { %v3333_v16 = vrot.slane %v3332_v4, 4  ;;  %v2572_v14 = vunpack.c.l.b16 %v2506_v33  ;;  %v2573_v53 = vunpack.c.l.b16 %v2509_v20  ;;  %v3844_v37 = vrot.slane %v6407_v7, 5  ;;  %187 = vst.msk [vmem:[#allocation2 + $0x150] sm:$0xff] %vm143_vm9, %v5299_v61  ;;  %v5222_v33 = vld [vmem:[%s5392_s7 + $0x88] sm:$0xf] }
 0x1f3   : > { %v3933_v9 = vpack.c.b16 %v3910_v36, %v3909_v48  ;;  %v5059_v11 = vrot.slane %v5043_v55, 9  ;;  %v3847_v4 = vrot.slane %v6450_v3, 5  ;;  %188 = vst.msk [vmem:[#allocation2 + $0x158] sm:$0xff] %vm143_vm9, %v5299_v61  ;;  %v2512_v20 = vrot.slane %v5222_v33, 5  ;;  %v5129_v55 = vld [vmem:[%s5392_s7 + $0x84] sm:$0xff] }
 0x1f4   : > { %v2341_v21 = vpop.f32.mrf.mxu0  ;;  %v2595_v15 = vpack.c.b16 %v2573_v53, %v2572_v14  ;;  %v3338_v45 = vsel %vm5404_vm4, %v3333_v16, %v6439_v56  ;;  %v3846_v41 = vrot.slane %v3844_v37, 4  ;;  %190 = vst.msk [vmem:[#allocation2 + $0x168] sm:$0xff] %vm143_vm9, %v5299_v61  ;;  %v4817_v56 = vld [vmem:[%s5392_s7 + $0x84] sm:$0xe]  ;;  %v3353_v3 = vshll.u32 %v4999_v57, 16 }
 0x1f5   : > { %v1687_v17 = vpop.f32.mrf.mxu3  ;;  %4961 = vmatmul.msk.bf16.gmra.mxu2 %vm685_vm5, %v5128_v49  ;;  %v2664_v35 = vpop.f32.mrf.mxu1  ;;  %v3347_v49 = vrot.slane %v3345_v59, 5  ;;  %v3359_v48 = vshll.u32 %v6487_v12, 16  ;;  %v3363_v36 = vshrl.u32 %v6487_v12, 16  ;;  %191 = vst.msk [vmem:[#allocation2 + $0x170] sm:$0xff] %vm143_vm9, %v5299_v61 }
 0x1f6   : > { %v1721_v18 = vadd.f32 %v1687_v17, %v1434_v24  ;;  %v3343_v24 = vrot.slane %v3342_v62, 4  ;;  %v3350_v62 = vshrl.u32 %v4999_v57, 16  ;;  %193 = vst.msk [vmem:[#allocation2 + $0x180] sm:$0xff] %vm143_vm9, %v5299_v61  ;;  %v3848_v53 = vsel %vm5578_vm8, %v3846_v41, %v3847_v4 }
 0x1f7   : > { %194 = vst.msk [vmem:[#allocation2 + $0x188] sm:$0xff] %vm143_vm9, %v5299_v61 }
 0x1f8   : > { %v2949_v8 = vpop.f32.mrf.mxu2  ;;  %v3348_v17 = vsel %vm5404_vm4, %v3343_v24, %v3347_v49  ;;  %v6502_v59 = vadd.f32 %v2341_v21, %v1721_v18  ;;  %v3513_v21 = vunpack.c.l.b16 %v3338_v45  ;;  %v3845_v18 = vsel %vm5578_vm8, %v5059_v11, %v3844_v37  ;;  %v5223_v49 = vld [vmem:[%s5392_s7 + $0x8c] sm:$0x1]  ;;  %147 = vst.msk [vmem:[#allocation2 + $0x10] sm:$0x3] %vm146_vm10, %v5299_v61 }
 0x1f9   : > { %v3029_v32 = vadd.f32 %v2949_v8, %v2742_v19  ;;  %v2743_v19 = vadd.f32 %v2664_v35, %v5870_v50  ;;  %v3514_v14 = vunpack.c.l.b16 %v3348_v17  ;;  %v4833_v24 = vrot.slane %v4817_v56, 9  ;;  %150 = vst.msk [vmem:[#allocation2 + $0x28] sm:$0x3] %vm146_vm10, %v5299_v61 }
 0x1fa   : > { %5026 = vmatmul.msk.bf16.gmra.mxu3 %vm685_vm5, %v3535_v63  ;;  %v2514_v37 = vrot.slane %v2512_v20, 4  ;;  %v3352_v57 = vrot.slane %v3350_v62, 4  ;;  %v3355_v35 = vrot.slane %v3353_v3, 5  ;;  %v3365_v11 = vrot.slane %v3363_v36, 4  ;;  %153 = vst.msk [vmem:[#allocation2 + $0x40] sm:$0x3] %vm146_vm10, %v5299_v61 }
 0x1fb   : > { %v3536_v45 = vpack.c.b16 %v3514_v14, %v3513_v21  ;;  %v3911_v4 = vunpack.c.l.b16 %v3845_v18  ;;  %v2513_v33 = vsel %vm5578_vm8, %v4833_v24, %v2512_v20  ;;  %156 = vst.msk [vmem:[#allocation2 + $0x58] sm:$0x3] %vm146_vm10, %v5299_v61  ;;  %v5044_v24 = vld [vmem:[%s5392_s7 + $0x90] sm:$0xe] }
 0x1fc   : > { %v4001_v7 = vpop.f32.mrf.mxu0  ;;  %v3356_v56 = vor.u32 %v3355_v35, %v3352_v57  ;;  %v2574_v21 = vunpack.c.l.b16 %v2513_v33  ;;  %159 = vst.msk [vmem:[#allocation2 + $0x70] sm:$0x3] %vm146_vm10, %v5299_v61  ;;  %v4162_v33 = vld [vmem:[#allocation2 + $0x1] ss:$2 sm:$0xff] }
 0x1fd   : > { %v3603_v51 = vpop.f32.mrf.mxu3  ;;  %v6497_v31 = vpop.f32.mrf.mxu1  ;;  %162 = vst.msk [vmem:[#allocation2 + $0x88] sm:$0x3] %vm146_vm10, %v5299_v61 }
 0x1fe   : > { %v3683_v63 = vadd.f32 %v3603_v51, %v3029_v32  ;;  %v2515_v32 = vrot.slane %v5223_v49, 5  ;;  %v3912_v51 = vunpack.c.l.b16 %v3848_v53  ;;  %v3357_v14 = vrot.slane %v3356_v56, 4  ;;  %165 = vst.msk [vmem:[#allocation2 + $0xa0] sm:$0x3] %vm146_vm10, %v5299_v61 }
 0x1ff   : > { %5075 = vmatmul.msk.bf16.gmra.mxu0 %vm685_vm5, %v3933_v9  ;;  %v6525_v9 = vrot.slane %v3359_v48, 5  ;;  %v3851_v49 = vrot.slane %v6487_v12, 5  ;;  %168 = vst.msk [vmem:[#allocation2 + $0xb8] sm:$0x3] %vm146_vm10, %v5299_v61  ;;  %v5224_v12 = vld [vmem:[%s5392_s7 + $0x94] sm:$0xf] }
 0x200   : > { %v4081_v16 = vadd.f32 %v4001_v7, %v3683_v63  ;;  %v2951_v8 = vpop.f32.mrf.mxu2  ;;  %4849 = vmatmul.msk.bf16.gmra.mxu1 %vm685_vm5, %v2595_v15  ;;  %v6528_v7 = vld [vmem:[%s5392_s7 + $0x98] sm:$0x1]  ;;  %v2516_v62 = vsel %vm5578_vm8, %v2514_v37, %v2515_v32  ;;  %v2744_v37 = vadd.f32 %v6497_v31, %v5883_v25  ;;  %v4818_v31 = vld [vmem:[%s5392_s7 + $0x90] sm:$0xe]  ;;  %171 = vst.msk [vmem:[#allocation2 + $0xd0] sm:$0x3] %vm146_vm10, %v5299_v61 }
 0x201   : > { %v3030_v50 = vadd.f32 %v2951_v8, %v2743_v19  ;;  %v3366_v3 = vor.u32 %v3365_v11, %v6525_v9  ;;  %v3369_v48 = vshll.u32 %v6528_v7, 16  ;;  %v2575_v18 = vunpack.c.l.b16 %v2516_v62  ;;  %v6549_v19 = vld [vmem:[%s5392_s7 + $0xa0] sm:$0xf]  ;;  %174 = vst.msk [vmem:[#allocation2 + $0xe8] sm:$0x3] %vm146_vm10, %v5299_v61 }
 0x202   : > { %4114 = vst.msk [vmem:[#allocation2 + $0x19] sm:$0xff] %vm143_vm9, %v4081_v16  ;;  %v5002_v16 = vld [vmem:[%s5392_s7 + $0x9c] sm:$0xf]  ;;  %v3934_v8 = vpack.c.b16 %v3912_v51, %v3911_v4  ;;  %v2519_v51 = vrot.slane %v5224_v12, 5  ;;  %v3362_v62 = vsel %vm5404_vm4, %v3357_v14, %v6525_v9  ;;  %v5060_v56 = vrot.slane %v5044_v24, 9 }
 0x203   : > { %v3367_v53 = vrot.slane %v3366_v3, 4  ;;  %v3374_v32 = vshrl.u32 %v5002_v16, 16  ;;  %v3377_v57 = vshll.u32 %v5002_v16, 16  ;;  %v2596_v11 = vpack.c.b16 %v2575_v18, %v2574_v21  ;;  %177 = vst.msk [vmem:[#allocation2 + $0x100] sm:$0x3] %vm146_vm10, %v5299_v61 }
 0x204   : > { %v4003_v15 = vpop.f32.mrf.mxu0  ;;  %v3853_v3 = vrot.slane %v3851_v49, 4  ;;  %v4834_v18 = vrot.slane %v4818_v31, 9  ;;  %v2521_v24 = vrot.slane %v2519_v51, 4  ;;  %180 = vst.msk [vmem:[#allocation2 + $0x118] sm:$0x3] %vm146_vm10, %v5299_v61 }
 0x205   : > { %v3605_v41 = vpop.f32.mrf.mxu3  ;;  %4962 = vmatmul.msk.bf16.gmra.mxu2 %vm685_vm5, %v5129_v55  ;;  %v2669_v17 = vpop.f32.mrf.mxu1  ;;  %v3371_v55 = vrot.slane %v3369_v48, 5  ;;  %v3854_v48 = vrot.slane %v6528_v7, 5  ;;  %v5225_v7 = vld [vmem:[%s5392_s7 + $0x98] sm:$0x1]  ;;  %v6589_v12 = vld [vmem:[%s5392_s7 + $0xa4] sm:$0x1] }
 0x206   : > { %v3684_v63 = vadd.f32 %v3605_v41, %v3030_v50  ;;  %v4146_v50 = vld [vmem:[#allocation2] ss:$2 sm:$0xff]  ;;  %v2745_v9 = vadd.f32 %v2669_v17, %v5896_v22  ;;  %v3515_v22 = vunpack.c.l.b16 %v3362_v62  ;;  %183 = vst.msk [vmem:[#allocation2 + $0x130] sm:$0x3] %vm146_vm10, %v5299_v61 }
 0x207   : > { %186 = vst.msk [vmem:[#allocation2 + $0x148] sm:$0x3] %vm146_vm10, %v5299_v61 }
 0x208   : > { %v4082_v36 = vadd.f32 %v4003_v15, %v3684_v63  ;;  %v2954_v20 = vpop.f32.mrf.mxu2  ;;  %v3383_v15 = vshll.u32 %v6549_v19, 16  ;;  %v3372_v63 = vsel %vm5404_vm4, %v3367_v53, %v3371_v55  ;;  %v5130_v55 = vld [vmem:[%s5392_s7 + $0x90] sm:$0xff]  ;;  %189 = vst.msk [vmem:[#allocation2 + $0x160] sm:$0x3] %vm146_vm10, %v5299_v61 }
 0x209   : > { %v3031_v41 = vadd.f32 %v2954_v20, %v2744_v37  ;;  %v3379_v20 = vrot.slane %v3377_v57, 5  ;;  %v2522_v37 = vrot.slane %v5225_v7, 5  ;;  %v3516_v17 = vunpack.c.l.b16 %v3372_v63  ;;  %192 = vst.msk [vmem:[#allocation2 + $0x178] sm:$0x3] %vm146_vm10, %v5299_v61 }
 0x20a   : > { %4115 = vst.msk [vmem:[#allocation2 + $0x21] sm:$0xff] %vm143_vm9, %v4082_v36  ;;  %5027 = vmatmul.msk.bf16.gmra.mxu3 %vm685_vm5, %v3536_v45  ;;  %v3387_v45 = vshrl.u32 %v6549_v19, 16  ;;  %v3376_v36 = vrot.slane %v3374_v32, 4  ;;  %v6582_v16 = vrot.slane %v3383_v15, 5  ;;  %v4186_v32 = vld [vmem:[#allocation2 + $0x2] ss:$2 sm:$0xff]  ;;  %v3855_v15 = vsel %vm5578_vm8, %v3853_v3, %v3854_v48 }
 0x20b   : > { %v2523_v63 = vsel %vm5578_vm8, %v2521_v24, %v2522_v37  ;;  %v3537_v48 = vpack.c.b16 %v3516_v17, %v3515_v22  ;;  %195 = vst.msk [vmem:[#allocation2 + $0x190] sm:$0x3] %vm146_vm10, %v5299_v61  ;;  %v5045_v37 = vld [vmem:[%s5392_s7 + $0x9c] sm:$0xe]  ;;  %v6620_v17 = vld [vmem:[%s5392_s7 + $0xac] sm:$0xf] }
 0x20c   : > { %v4006_v35 = vpop.f32.mrf.mxu0  ;;  %v3389_v14 = vrot.slane %v3387_v45, 4  ;;  %v2520_v45 = vsel %vm5578_vm8, %v4834_v18, %v2519_v51 }
 0x20d   : > { %v3608_v4 = vpop.f32.mrf.mxu3  ;;  %v2672_v25 = vpop.f32.mrf.mxu1  ;;  %v2576_v18 = vunpack.c.l.b16 %v2520_v45 }
 0x20e   : > { %v3685_v53 = vadd.f32 %v3608_v4, %v3031_v41  ;;  %v3380_v41 = vor.u32 %v3379_v20, %v3376_v36  ;;  %v3390_v4 = vor.u32 %v3389_v14, %v6582_v16  ;;  %v2577_v14 = vunpack.c.l.b16 %v2523_v63 }
 0x20f   : > { %5076 = vmatmul.msk.bf16.gmra.mxu0 %vm685_vm5, %v3934_v8  ;;  %v4177_v8 = vmax.f32 %v4146_v50, %v4162_v33  ;;  %v3852_v50 = vsel %vm5578_vm8, %v5060_v56, %v3851_v49  ;;  %v3393_v56 = vshll.u32 %v6589_v12, 16 }
 0x210   : > { %v2956_v21 = vpop.f32.mrf.mxu2  ;;  %4850 = vmatmul.msk.bf16.gmra.mxu1 %vm685_vm5, %v2596_v11  ;;  %v4083_v33 = vadd.f32 %v4006_v35, %v3685_v53  ;;  %v3913_v36 = vunpack.c.l.b16 %v3852_v50  ;;  %v3914_v35 = vunpack.c.l.b16 %v3855_v15  ;;  %v3381_v53 = vrot.slane %v3380_v41, 4 }
 0x211   : > { %v3032_v57 = vadd.f32 %v2956_v21, %v2745_v9  ;;  %v4201_v31 = vmax.f32 %v4177_v8, %v4186_v32  ;;  %v4209_v3 = vld [vmem:[#allocation2 + $0x18] ss:$2 sm:$0xff]  ;;  %v2746_v9 = vadd.f32 %v2672_v25, %v5909_v2  ;;  %v3395_v24 = vrot.slane %v3393_v56, 5  ;;  %v5005_v25 = vld [vmem:[%s5392_s7 + $0xa8] sm:$0xf] }
 0x212   : > { %4116 = vst.msk [vmem:[#allocation2 + $0x31] sm:$0xff] %vm143_vm9, %v4083_v33  ;;  %v3935_v7 = vpack.c.b16 %v3914_v35, %v3913_v36  ;;  %v3858_v2 = vrot.slane %v6549_v19, 5  ;;  %v4233_v32 = vld [vmem:[#allocation2 + $0x19] ss:$2 sm:$0xff]  ;;  %v2597_v22 = vpack.c.b16 %v2577_v14, %v2576_v18  ;;  %v3386_v45 = vsel %vm5404_vm4, %v3381_v53, %v6582_v16  ;;  %v4257_v36 = vld [vmem:[#allocation2 + $0x1a] ss:$2 sm:$0xff] }
 0x213   : > { %v4224_v8 = vmax.f32 %v4201_v31, %v4209_v3  ;;  %v5061_v19 = vrot.slane %v5045_v37, 9  ;;  %v3398_v63 = vshrl.u32 %v5005_v25, 16  ;;  %v3401_v56 = vshll.u32 %v5005_v25, 16 }
 0x214   : > { %v4008_v11 = vpop.f32.mrf.mxu0  ;;  %v3860_v3 = vrot.slane %v3858_v2, 4  ;;  %v3411_v16 = vshrl.u32 %v6620_v17, 16 }
 0x215   : > { %v3610_v62 = vpop.f32.mrf.mxu3  ;;  %4963 = vmatmul.msk.bf16.gmra.mxu2 %vm685_vm5, %v5130_v55  ;;  %v2674_v49 = vpop.f32.mrf.mxu1  ;;  %v3391_v55 = vrot.slane %v3390_v4, 4  ;;  %v4248_v50 = vmax.f32 %v4224_v8, %v4233_v32  ;;  %v5226_v4 = vld [vmem:[%s5392_s7 + $0xa0] sm:$0xf]  ;;  %v3859_v37 = vsel %vm5578_vm8, %v5061_v19, %v3858_v2  ;;  %v3400_v25 = vrot.slane %v3398_v63, 4 }
 0x216   : > { %v3686_v51 = vadd.f32 %v3610_v62, %v3032_v57  ;;  %v2526_v31 = vrot.slane %v5226_v4, 5  ;;  %v4819_v62 = vld [vmem:[%s5392_s7 + $0x9c] sm:$0xe] }
 0x217   : > { %v3396_v41 = vsel %vm5404_vm4, %v3391_v55, %v3395_v24  ;;  %v4272_v14 = vmax.f32 %v4248_v50, %v4257_v36  ;;  %v5131_v8 = vld [vmem:[%s5392_s7 + $0x9c] sm:$0xff]  ;;  %v4835_v53 = vrot.slane %v4819_v62, 9 }
 0x218   : > { %v4084_v20 = vadd.f32 %v4008_v11, %v3686_v51  ;;  %v2959_v21 = vpop.f32.mrf.mxu2  ;;  %v3861_v51 = vrot.slane %v6589_v12, 5  ;;  %v3518_v18 = vunpack.c.l.b16 %v3396_v41  ;;  %v2528_v55 = vrot.slane %v2526_v31, 4  ;;  %v5227_v12 = vld [vmem:[%s5392_s7 + $0xa4] sm:$0x1] }
 0x219   : > { %v3033_v61 = vadd.f32 %v2959_v21, %v2746_v9  ;;  %v3517_v21 = vunpack.c.l.b16 %v3386_v45  ;;  %v2529_v24 = vrot.slane %v5227_v12, 5  ;;  %v6646_v45 = vld [vmem:[%s5392_s7 + $0xb0] sm:$0x1]  ;;  %v2527_v19 = vsel %vm5578_vm8, %v4835_v53, %v2526_v31  ;;  %v5046_v12 = vld [vmem:[%s5392_s7 + $0xa8] sm:$0xe] }
 0x21a   : > { %4117 = vst.msk [vmem:[#allocation2 + $0x39] sm:$0xff] %vm143_vm9, %v4084_v20  ;;  %5028 = vmatmul.msk.bf16.gmra.mxu3 %vm685_vm5, %v3537_v48  ;;  %v3407_v48 = vshll.u32 %v6620_v17, 16  ;;  %v2747_v20 = vadd.f32 %v2674_v49, %v5922_v0  ;;  %v3403_v0 = vrot.slane %v3401_v56, 5  ;;  %v3862_v32 = vsel %vm5578_vm8, %v3860_v3, %v3861_v51 }
 0x21b   : > { %v3538_v2 = vpack.c.b16 %v3518_v18, %v3517_v21  ;;  %v2530_v62 = vsel %vm5578_vm8, %v2528_v55, %v2529_v24  ;;  %v3915_v3 = vunpack.c.l.b16 %v3859_v37  ;;  %v3916_v51 = vunpack.c.l.b16 %v3862_v32 }
 0x21c   : > { %v4011_v57 = vpop.f32.mrf.mxu0  ;;  %v2578_v21 = vunpack.c.l.b16 %v2527_v19  ;;  %v2579_v18 = vunpack.c.l.b16 %v2530_v62  ;;  %v3865_v24 = vrot.slane %v6620_v17, 5  ;;  %v3868_v62 = vrot.slane %v6646_v45, 5 }
 0x21d   : > { %v3613_v11 = vpop.f32.mrf.mxu3  ;;  %v2677_v15 = vpop.f32.mrf.mxu1 }
 0x21e   : > { %v3687_v33 = vadd.f32 %v3613_v11, %v3033_v61  ;;  %v2748_v31 = vadd.f32 %v2677_v15, %v5935_v43  ;;  %v2598_v37 = vpack.c.b16 %v2579_v18, %v2578_v21  ;;  %v3867_v19 = vrot.slane %v3865_v24, 4  ;;  %v5229_v21 = vld [vmem:[%s5392_s7 + $0xb0] sm:$0x1] }
 0x21f   : > { %5077 = vmatmul.msk.bf16.gmra.mxu0 %vm685_vm5, %v3935_v7 }
 0x220   : > { %v4085_v35 = vadd.f32 %v4011_v57, %v3687_v33  ;;  %v2961_v9 = vpop.f32.mrf.mxu2  ;;  %4851 = vmatmul.msk.bf16.gmra.mxu1 %vm685_vm5, %v2597_v22  ;;  %v6643_v57 = vrot.slane %v3407_v48, 5  ;;  %v3413_v22 = vrot.slane %v3411_v16, 4  ;;  %v3404_v48 = vor.u32 %v3403_v0, %v3400_v25  ;;  %v6668_v25 = vld [vmem:[%s5392_s7 + $0xb8] sm:$0xf] }
 0x221   : > { %v4281_v61 = vld [vmem:[#allocation2 + $0x30] ss:$2 sm:$0xff]  ;;  %v3034_v7 = vadd.f32 %v2961_v9, %v2747_v20  ;;  %v4305_v50 = vld [vmem:[#allocation2 + $0x31] ss:$2 sm:$0xff] }
 0x222   : > { %v4296_v49 = vmax.f32 %v4272_v14, %v4281_v61  ;;  %4118 = vst.msk [vmem:[#allocation2 + $0x49] sm:$0xff] %vm143_vm9, %v4085_v35  ;;  %v4329_v63 = vld [vmem:[#allocation2 + $0x32] ss:$2 sm:$0xff]  ;;  %v3414_v36 = vor.u32 %v3413_v22, %v6643_v57  ;;  %v3417_v35 = vshll.u32 %v6646_v45, 16  ;;  %v3405_v55 = vrot.slane %v3404_v48, 4 }
 0x223   : > { %v3936_v61 = vpack.c.b16 %v3916_v51, %v3915_v3  ;;  %v3431_v51 = vshll.u32 %v6668_v25, 16  ;;  %v3435_v48 = vshrl.u32 %v6668_v25, 16 }
 0x224   : > { %v4013_v11 = vpop.f32.mrf.mxu0  ;;  %v4320_v41 = vmax.f32 %v4296_v49, %v4305_v50  ;;  %v3419_v43 = vrot.slane %v3417_v35, 5  ;;  %v5062_v50 = vrot.slane %v5046_v12, 9 }
 0x225   : > { %v3615_v4 = vpop.f32.mrf.mxu3  ;;  %4964 = vmatmul.msk.bf16.gmra.mxu2 %vm685_vm5, %v5131_v8  ;;  %v2679_v33 = vpop.f32.mrf.mxu1  ;;  %v5008_v8 = vld [vmem:[%s5392_s7 + $0xb4] sm:$0xf]  ;;  %v3433_v12 = vrot.slane %v3431_v51, 5 }
 0x226   : > { %v3688_v56 = vadd.f32 %v3615_v4, %v3034_v7  ;;  %v4344_v16 = vmax.f32 %v4320_v41, %v4329_v63  ;;  %v3415_v7 = vrot.slane %v3414_v36, 4  ;;  %v3422_v0 = vshrl.u32 %v5008_v8, 16  ;;  %v5228_v41 = vld [vmem:[%s5392_s7 + $0xac] sm:$0xf]  ;;  %v4148_v63 = vld [vmem:[#allocation2 + $0x30] ss:$2 sm:$0xff] }
 0x227   : > { %v3425_v49 = vshll.u32 %v5008_v8, 16  ;;  %v2533_v17 = vrot.slane %v5228_v41, 5  ;;  %v3866_v8 = vsel %vm5578_vm8, %v5062_v50, %v3865_v24 }
 0x228   : > { %v4086_v20 = vadd.f32 %v4013_v11, %v3688_v56  ;;  %v2964_v9 = vpop.f32.mrf.mxu2  ;;  %v4352_v14 = vpack.c.bf16 %v4344_v16, %v4344_v16  ;;  %v4820_v11 = vld [vmem:[%s5392_s7 + $0xa8] sm:$0xe]  ;;  %v2749_v56 = vadd.f32 %v2679_v33, %v5948_v42  ;;  %v3420_v3 = vsel %vm5404_vm4, %v3415_v7, %v3419_v43  ;;  %v4164_v16 = vld [vmem:[#allocation2 + $0x31] ss:$2 sm:$0xff] }
 0x229   : > { %v3035_v53 = vadd.f32 %v2964_v9, %v2748_v31  ;;  %v4836_v35 = vrot.slane %v4820_v11, 9  ;;  %v3424_v45 = vrot.slane %v3422_v0, 4  ;;  %v5132_v31 = vld [vmem:[%s5392_s7 + $0xa8] sm:$0xff]  ;;  %v2535_v9 = vrot.slane %v2533_v17, 4 }
 0x22a   : > { %4119 = vst.msk [vmem:[#allocation2 + $0x51] sm:$0xff] %vm143_vm9, %v4086_v20  ;;  %5029 = vmatmul.msk.bf16.gmra.mxu3 %vm685_vm5, %v3538_v2  ;;  %v3410_v2 = vsel %vm5404_vm4, %v3405_v55, %v6643_v57  ;;  %v3427_v20 = vrot.slane %v3425_v49, 5  ;;  %v2536_v42 = vrot.slane %v5229_v21, 5  ;;  %v3869_v55 = vsel %vm5578_vm8, %v3867_v19, %v3868_v62 }
 0x22b   : > { %4361 = vst.msk [vmem:[%s6663_s27] sm:$0xf] %vm4360_vm11, %v4352_v14  ;;  %v3519_v18 = vunpack.c.l.b16 %v3410_v2  ;;  %v3520_v14 = vunpack.c.l.b16 %v3420_v3  ;;  %v2534_v43 = vsel %vm5578_vm8, %v4836_v35, %v2533_v17  ;;  %v3918_v2 = vunpack.c.l.b16 %v3869_v55 }
 0x22c   : > { %v4016_v15 = vpop.f32.mrf.mxu0  ;;  %v2537_v24 = vsel %vm5578_vm8, %v2535_v9, %v2536_v42  ;;  %v2580_v17 = vunpack.c.l.b16 %v2534_v43  ;;  %v3872_v21 = vrot.slane %v6668_v25, 5  ;;  %v6706_v42 = vld [vmem:[%s5392_s7 + $0xc4] sm:$0xf] }
 0x22d   : > { %v3618_v32 = vpop.f32.mrf.mxu3  ;;  %v2682_v22 = vpop.f32.mrf.mxu1  ;;  %v3539_v41 = vpack.c.b16 %v3520_v14, %v3519_v18  ;;  %v3455_v25 = vshll.u32 %v6706_v42, 16 }
 0x22e   : > { %v3689_v4 = vadd.f32 %v3618_v32, %v3035_v53  ;;  %v4178_v53 = vmax.f32 %v4148_v63, %v4164_v16  ;;  %v4188_v32 = vld [vmem:[#allocation2 + $0x32] ss:$2 sm:$0xff]  ;;  %v2750_v3 = vadd.f32 %v2682_v22, %v5961_v5 }
 0x22f   : > { %5078 = vmatmul.msk.bf16.gmra.mxu0 %vm685_vm5, %v3936_v61  ;;  %v3437_v61 = vrot.slane %v3435_v48, 4  ;;  %v2581_v48 = vunpack.c.l.b16 %v2537_v24  ;;  %v4821_v24 = vld [vmem:[%s5392_s7 + $0xb4] sm:$0xe] }
 0x230   : > { %v4087_v36 = vadd.f32 %v4016_v15, %v3689_v4  ;;  %v2966_v57 = vpop.f32.mrf.mxu2  ;;  %4852 = vmatmul.msk.bf16.gmra.mxu1 %vm685_vm5, %v2598_v37  ;;  %v6693_v15 = vld [vmem:[%s5392_s7 + $0xbc] sm:$0x1]  ;;  %v3428_v37 = vor.u32 %v3427_v20, %v3424_v45  ;;  %v3917_v4 = vunpack.c.l.b16 %v3866_v8  ;;  %v4202_v19 = vmax.f32 %v4178_v53, %v4188_v32  ;;  %v5047_v45 = vld [vmem:[%s5392_s7 + $0xb4] sm:$0xe] }
 0x231   : > { %v3036_v33 = vadd.f32 %v2966_v57, %v2749_v56  ;;  %v4211_v50 = vld [vmem:[#allocation2 + $0x48] ss:$2 sm:$0xff]  ;;  %v3438_v62 = vor.u32 %v3437_v61, %v3433_v12  ;;  %v3441_v63 = vshll.u32 %v6693_v15, 16  ;;  %v5011_v57 = vld [vmem:[%s5392_s7 + $0xc0] sm:$0xf]  ;;  %v3459_v32 = vshrl.u32 %v6706_v42, 16 }
 0x232   : > { %4120 = vst.msk [vmem:[#allocation2 + $0x61] sm:$0xff] %vm143_vm9, %v4087_v36  ;;  %v3429_v16 = vrot.slane %v3428_v37, 4  ;;  %v4225_v36 = vmax.f32 %v4202_v19, %v4211_v50  ;;  %v3937_v20 = vpack.c.b16 %v3918_v2, %v3917_v4  ;;  %v4235_v5 = vld [vmem:[#allocation2 + $0x49] ss:$2 sm:$0xff]  ;;  %v3446_v14 = vshrl.u32 %v5011_v57, 16 }
 0x233   : > { %v3443_v9 = vrot.slane %v3441_v63, 5  ;;  %v3449_v8 = vshll.u32 %v5011_v57, 16  ;;  %v4259_v4 = vld [vmem:[#allocation2 + $0x4a] ss:$2 sm:$0xff] }
 0x234   : > { %v4018_v7 = vpop.f32.mrf.mxu0  ;;  %v3434_v18 = vsel %vm5404_vm4, %v3429_v16, %v3433_v12  ;;  %v4249_v53 = vmax.f32 %v4225_v36, %v4235_v5  ;;  %v5231_v16 = vld [vmem:[%s5392_s7 + $0xbc] sm:$0x1] }
 0x235   : > { %v3620_v0 = vpop.f32.mrf.mxu3  ;;  %4965 = vmatmul.msk.bf16.gmra.mxu2 %vm685_vm5, %v5132_v31  ;;  %v2684_v49 = vpop.f32.mrf.mxu1  ;;  %v3439_v31 = vrot.slane %v3438_v62, 4  ;;  %v3521_v50 = vunpack.c.l.b16 %v3434_v18  ;;  %v3448_v62 = vrot.slane %v3446_v14, 4  ;;  %v3451_v63 = vrot.slane %v3449_v8, 5 }
 0x236   : > { %v3690_v11 = vadd.f32 %v3620_v0, %v3036_v33  ;;  %v2599_v33 = vpack.c.b16 %v2581_v48, %v2580_v17  ;;  %v5063_v0 = vrot.slane %v5047_v45, 9  ;;  %v2751_v19 = vadd.f32 %v2684_v49, %v5975_v29  ;;  %v6726_v29 = vld [vmem:[%s5392_s7 + $0xc8] sm:$0x1] }
 0x237   : > { %v3444_v12 = vsel %vm5404_vm4, %v3439_v31, %v3443_v9  ;;  %v2543_v36 = vrot.slane %v5231_v16, 5 }
 0x238   : > { %v4088_v56 = vadd.f32 %v4018_v7, %v3690_v11  ;;  %v2969_v51 = vpop.f32.mrf.mxu2  ;;  %v5230_v7 = vld [vmem:[%s5392_s7 + $0xb8] sm:$0xf]  ;;  %v3874_v11 = vrot.slane %v3872_v21, 4  ;;  %v3522_v45 = vunpack.c.l.b16 %v3444_v12  ;;  %v3873_v5 = vsel %vm5578_vm8, %v5063_v0, %v3872_v21 }
 0x239   : > { %v3037_v35 = vadd.f32 %v2969_v51, %v2750_v3  ;;  %v2540_v43 = vrot.slane %v5230_v7, 5  ;;  %v5133_v3 = vld [vmem:[%s5392_s7 + $0xb4] sm:$0xff]  ;;  %v4837_v51 = vrot.slane %v4821_v24, 9  ;;  %v3465_v0 = vshll.u32 %v6726_v29, 16 }
 0x23a   : > { %4121 = vst.msk [vmem:[#allocation2 + $0x69] sm:$0xff] %vm143_vm9, %v4088_v56  ;;  %5030 = vmatmul.msk.bf16.gmra.mxu3 %vm685_vm5, %v3539_v41  ;;  %v3875_v41 = vrot.slane %v6693_v15, 5  ;;  %v4273_v56 = vmax.f32 %v4249_v53, %v4259_v4  ;;  %v6722_v15 = vrot.slane %v3455_v25, 5  ;;  %v3540_v24 = vpack.c.b16 %v3522_v45, %v3521_v50 }
 0x23b   : > { %v2542_v48 = vrot.slane %v2540_v43, 4  ;;  %v2541_v8 = vsel %vm5578_vm8, %v4837_v51, %v2540_v43  ;;  %v3879_v51 = vrot.slane %v6706_v42, 5 }
 0x23c   : > { %v4021_v22 = vpop.f32.mrf.mxu0 }
 0x23d   : > { %v3623_v55 = vpop.f32.mrf.mxu3  ;;  %v2687_v61 = vpop.f32.mrf.mxu1  ;;  %v2544_v53 = vsel %vm5578_vm8, %v2542_v48, %v2543_v36  ;;  %v5014_v36 = vld [vmem:[%s5392_s7 + $0xcc] sm:$0xf] }
 0x23e   : > { %v3691_v37 = vadd.f32 %v3623_v55, %v3037_v35  ;;  %v3452_v55 = vor.u32 %v3451_v63, %v3448_v62 }
 0x23f   : > { %5079 = vmatmul.msk.bf16.gmra.mxu0 %vm685_vm5, %v3937_v20  ;;  %v3461_v20 = vrot.slane %v3459_v32, 4  ;;  %v3919_v32 = vunpack.c.l.b16 %v3873_v5 }
 0x240   : > { %v4089_v2 = vadd.f32 %v4021_v22, %v3691_v37  ;;  %v2971_v17 = vpop.f32.mrf.mxu2  ;;  %4853 = vmatmul.msk.bf16.gmra.mxu1 %vm685_vm5, %v2599_v33  ;;  %v3876_v22 = vsel %vm5578_vm8, %v3874_v11, %v3875_v41  ;;  %v6892_v41 = vld [vmem:[#allocation6_spill] sm:$0xff]  ;;  %v3453_v62 = vrot.slane %v3452_v55, 4  ;;  %v3470_v55 = vshrl.u32 %v5014_v36, 16 }
 0x241   : > { %v4283_v57 = vld [vmem:[#allocation2 + $0x60] ss:$2 sm:$0xff]  ;;  %v3038_v35 = vadd.f32 %v2971_v17, %v2751_v19  ;;  %v4307_v49 = vld [vmem:[#allocation2 + $0x61] ss:$2 sm:$0xff]  ;;  %v3462_v21 = vor.u32 %v3461_v20, %v6722_v15  ;;  %v3920_v12 = vunpack.c.l.b16 %v3876_v22  ;;  %v2752_v4 = vadd.f32 %v2687_v61, %v6892_v41 }
 0x242   : > { %v4297_v31 = vmax.f32 %v4273_v56, %v4283_v57  ;;  %4122 = vst.msk [vmem:[#allocation2 + $0x79] sm:$0xff] %vm143_vm9, %v4089_v2  ;;  %v4331_v7 = vld [vmem:[#allocation2 + $0x62] ss:$2 sm:$0xff]  ;;  %v2582_v2 = vunpack.c.l.b16 %v2541_v8  ;;  %v2583_v19 = vunpack.c.l.b16 %v2544_v53  ;;  %v3467_v56 = vrot.slane %v3465_v0, 5  ;;  %v4166_v53 = vld [vmem:[#allocation2 + $0x61] ss:$2 sm:$0xff] }
 0x243   : > { %v3463_v63 = vrot.slane %v3462_v21, 4  ;;  %v3938_v48 = vpack.c.b16 %v3920_v12, %v3919_v32  ;;  %v6748_v57 = vld [vmem:[%s5392_s7 + $0xd0] sm:$0xf]  ;;  %v3458_v20 = vsel %vm5404_vm4, %v3453_v62, %v6722_v15  ;;  %v4150_v5 = vld [vmem:[#allocation2 + $0x60] ss:$2 sm:$0xff] }
 0x244   : > { %v4023_v9 = vpop.f32.mrf.mxu0  ;;  %v4321_v33 = vmax.f32 %v4297_v31, %v4307_v49  ;;  %v2600_v16 = vpack.c.b16 %v2583_v19, %v2582_v2  ;;  %v5232_v49 = vld [vmem:[%s5392_s7 + $0xc4] sm:$0xf]  ;;  %v4822_v8 = vld [vmem:[%s5392_s7 + $0xc0] sm:$0xe]  ;;  %v3479_v15 = vshll.u32 %v6748_v57, 16 }
 0x245   : > { %v3625_v18 = vpop.f32.mrf.mxu3  ;;  %4966 = vmatmul.msk.bf16.gmra.mxu2 %vm685_vm5, %v5133_v3  ;;  %v2689_v14 = vpop.f32.mrf.mxu1  ;;  %v5048_v3 = vld [vmem:[%s5392_s7 + $0xc0] sm:$0xe]  ;;  %v3468_v22 = vsel %vm5404_vm4, %v3463_v63, %v3467_v56  ;;  %v4838_v12 = vrot.slane %v4822_v8, 9  ;;  %v5233_v41 = vld [vmem:[%s5392_s7 + $0xc8] sm:$0x1] }
 0x246   : > { %v3692_v37 = vadd.f32 %v3625_v18, %v3038_v35  ;;  %v4345_v25 = vmax.f32 %v4321_v33, %v4331_v7  ;;  %v5064_v31 = vrot.slane %v5048_v3, 9  ;;  %v3881_v33 = vrot.slane %v3879_v51, 4  ;;  %v5134_v32 = vld [vmem:[%s5392_s7 + $0xc0] sm:$0xff]  ;;  %v5016_v56 = vld [vmem:[%s5392_s7 + $0xd4] sm:$0x1] }
 0x247   : > { %v3882_v18 = vrot.slane %v6726_v29, 5  ;;  %v3473_v7 = vshll.u32 %v5014_v36, 16  ;;  %v2753_v21 = vadd.f32 %v2689_v14, %v6022_v52  ;;  %v3524_v29 = vunpack.c.l.b16 %v3468_v22 }
 0x248   : > { %v4090_v11 = vadd.f32 %v4023_v9, %v3692_v37  ;;  %v2974_v43 = vpop.f32.mrf.mxu2  ;;  %v4353_v17 = vpack.c.bf16 %v4345_v25, %v4345_v25  ;;  %v2547_v9 = vrot.slane %v5232_v49, 5  ;;  %v3483_v37 = vshrl.u32 %v6748_v57, 16 }
 0x249   : > { %v3039_v50 = vadd.f32 %v2974_v43, %v2752_v4  ;;  %v3523_v25 = vunpack.c.l.b16 %v3458_v20  ;;  %v2550_v4 = vrot.slane %v5233_v41, 5  ;;  %v4179_v43 = vmax.f32 %v4150_v5, %v4166_v53 }
 0x24a   : > { %4123 = vst.msk [vmem:[#allocation2 + $0x81] sm:$0xff] %vm143_vm9, %v4090_v11  ;;  %5031 = vmatmul.msk.bf16.gmra.mxu3 %vm685_vm5, %v3540_v24  ;;  %v2549_v11 = vrot.slane %v2547_v9, 4  ;;  %v3880_v19 = vsel %vm5578_vm8, %v5064_v31, %v3879_v51  ;;  %v3883_v52 = vsel %vm5578_vm8, %v3881_v33, %v3882_v18  ;;  %v3472_v14 = vrot.slane %v3470_v55, 4  ;;  %v4190_v51 = vld [vmem:[#allocation2 + $0x62] ss:$2 sm:$0xff] }
 0x24b   : > { %4362 = vst.msk [vmem:[%s6663_s27 + $0x4] sm:$0xf] %vm4360_vm11, %v4353_v17  ;;  %v3475_v17 = vrot.slane %v3473_v7, 5  ;;  %v3481_v62 = vrot.slane %v3479_v15, 5  ;;  %v3541_v20 = vpack.c.b16 %v3524_v29, %v3523_v25  ;;  %v3921_v31 = vunpack.c.l.b16 %v3880_v19 }
 0x24c   : > { %v4026_v61 = vpop.f32.mrf.mxu0  ;;  %v3922_v49 = vunpack.c.l.b16 %v3883_v52  ;;  %v4203_v5 = vmax.f32 %v4179_v43, %v4190_v51  ;;  %v3489_v33 = vshll.u32 %v5016_v56, 16 }
 0x24d   : > { %v3628_v35 = vpop.f32.mrf.mxu3  ;;  %v2692_v45 = vpop.f32.mrf.mxu1 }
 0x24e   : > { %v3693_v42 = vadd.f32 %v3628_v35, %v3039_v50  ;;  %v3485_v50 = vrot.slane %v3483_v37, 4  ;;  %v2754_v8 = vadd.f32 %v2692_v45, %v6033_v60  ;;  %v3939_v37 = vpack.c.b16 %v3922_v49, %v3921_v31 }
 0x24f   : > { %5080 = vmatmul.msk.bf16.gmra.mxu0 %vm685_vm5, %v3938_v48 }
 0x250   : > { %v4091_v24 = vadd.f32 %v4026_v61, %v3693_v42  ;;  %v2976_v0 = vpop.f32.mrf.mxu2  ;;  %4854 = vmatmul.msk.bf16.gmra.mxu1 %vm685_vm5, %v2600_v16  ;;  %v2548_v61 = vsel %vm5578_vm8, %v4838_v12, %v2547_v9  ;;  %v2551_v16 = vsel %vm5578_vm8, %v2549_v11, %v2550_v4  ;;  %v3476_v42 = vor.u32 %v3475_v17, %v3472_v14  ;;  %v5049_v12 = vld [vmem:[%s5392_s7 + $0xcc] sm:$0xe]  ;;  %v6893_v17 = vld [vmem:[#allocation7_spill] sm:$0xff] }
 0x251   : > { %v3040_v2 = vadd.f32 %v2976_v0, %v2753_v21  ;;  %v4213_v36 = vld [vmem:[#allocation2 + $0x78] ss:$2 sm:$0xff]  ;;  %v3486_v22 = vor.u32 %v3485_v50, %v3481_v62  ;;  %v2584_v55 = vunpack.c.l.b16 %v2548_v61  ;;  %v2585_v9 = vunpack.c.l.b16 %v2551_v16  ;;  %v4237_v25 = vld [vmem:[#allocation2 + $0x79] ss:$2 sm:$0xff]  ;;  %v5135_v16 = vld [vmem:[%s5392_s7 + $0xcc] sm:$0xff]  ;;  %s5250_s7 = scalar_lea.hbm %s5249_s6, 32 }
 0x252   : > { %4124 = vst.msk [vmem:[#allocation2 + $0x91] sm:$0xff] %vm143_vm9, %v4091_v24  ;;  %v4226_v7 = vmax.f32 %v4203_v5, %v4213_v36  ;;  %v3477_v24 = vrot.slane %v3476_v42, 4  ;;  %v3491_v0 = vrot.slane %v3489_v33, 5  ;;  %v3886_v11 = vrot.slane %v6748_v57, 5  ;;  %v4261_v52 = vld [vmem:[#allocation2 + $0x7a] ss:$2 sm:$0xff]  ;;  %p5251_p11 = scmp.ne.s32.totalorder %s5249_s6, %s5250_s7  ;;  %p5256_p1 = scmp.lt.s32.totalorder %s5254_s16, %s5250_s7 }
 0x253   : > { %v3487_v21 = vrot.slane %v3486_v22, 4  ;;  %v2601_v29 = vpack.c.b16 %v2585_v9, %v2584_v55  ;;  %v5065_v19 = vrot.slane %v5049_v12, 9 }
 0x254   : > { %v4028_v63 = vpop.f32.mrf.mxu0  ;;  %v4250_v60 = vmax.f32 %v4226_v7, %v4237_v25  ;;  %v3482_v43 = vsel %vm5404_vm4, %v3477_v24, %v3481_v62  ;;  %v3888_v57 = vrot.slane %v3886_v11, 4  ;;  %p5252_p12 = pnand %p5251_p11, %p5355_p5  ;;  %p5257_p2 = por %p5256_p1, %p5255_p0 }
 0x255   : > { %v3630_v3 = vpop.f32.mrf.mxu3  ;;  %4967 = vmatmul.msk.bf16.gmra.mxu2 %vm685_vm5, %v5134_v32  ;;  %v2694_v48 = vpop.f32.mrf.mxu1  ;;  %v3887_v49 = vsel %vm5578_vm8, %v5065_v19, %v3886_v11 }
 0x256   : > { %v3694_v35 = vadd.f32 %v3630_v3, %v3040_v2  ;;  %v3492_v2 = vsel %vm5404_vm4, %v3487_v21, %v3491_v0  ;;  %v2755_v50 = vadd.f32 %v2694_v48, %v6893_v17  ;;  %v3889_v3 = vrot.slane %v5016_v56, 5  ;;  %p5253_p13 = pneg %p5252_p12 }
 0x257   : > { %v4274_v61 = vmax.f32 %v4250_v60, %v4261_v52 }
 0x258   : > { %v4092_v18 = vadd.f32 %v4028_v63, %v3694_v35  ;;  %v2979_v53 = vpop.f32.mrf.mxu2  ;;  %v3525_v35 = vunpack.c.l.b16 %v3482_v43  ;;  %v3890_v48 = vsel %vm5578_vm8, %v3888_v57, %v3889_v3  ;;  %p5258_p3 = pnand %p5257_p2, %p5253_p13 }
 0x259   : > { %v3041_v15 = vadd.f32 %v2979_v53, %v2754_v8  ;;  %v3923_v53 = vunpack.c.l.b16 %v3887_v49  ;;  %v3924_v55 = vunpack.c.l.b16 %v3890_v48 }
 0x25a   : > { %4125 = vst.msk [vmem:[#allocation2 + $0x99] sm:$0xff] %vm143_vm9, %v4092_v18  ;;  %5032 = vmatmul.msk.bf16.gmra.mxu3 %vm685_vm5, %v3541_v20  ;;  %v3526_v20 = vunpack.c.l.b16 %v3492_v2 }
 0x25b   : > { %v3940_v24 = vpack.c.b16 %v3924_v55, %v3923_v53 }
 0x25c   : > { %v4031_v32 = vpop.f32.mrf.mxu0  ;;  %v3542_v18 = vpack.c.b16 %v3526_v20, %v3525_v35 }
 0x25d   : > { %v3633_v45 = vpop.f32.mrf.mxu3  ;;  %v2697_v41 = vpop.f32.mrf.mxu1 }
 0x25e   : > { %v3695_v4 = vadd.f32 %v3633_v45, %v3041_v15  ;;  %v2756_v7 = vadd.f32 %v2697_v41, %v6069_v40 }
 0x25f   : > { %5081 = vmatmul.msk.bf16.gmra.mxu0 %vm685_vm5, %v3939_v37 }
 0x260   : > { %v4093_v14 = vadd.f32 %v4031_v32, %v3695_v4  ;;  %v2981_v63 = vpop.f32.mrf.mxu2  ;;  %4855 = vmatmul.msk.bf16.gmra.mxu1 %vm685_vm5, %v2601_v29 }
 0x261   : > { %v4285_v51 = vld [vmem:[#allocation2 + $0x90] ss:$2 sm:$0xff]  ;;  %v3042_v36 = vadd.f32 %v2981_v63, %v2755_v50  ;;  %v4309_v39 = vld [vmem:[#allocation2 + $0x91] ss:$2 sm:$0xff] }
 0x262   : > { %v4298_v62 = vmax.f32 %v4274_v61, %v4285_v51  ;;  %4126 = vst.msk [vmem:[#allocation2 + $0xa9] sm:$0xff] %vm143_vm9, %v4093_v14  ;;  %v4333_v22 = vld [vmem:[#allocation2 + $0x92] ss:$2 sm:$0xff]  ;;  %v4168_v12 = vld [vmem:[#allocation2 + $0x91] ss:$2 sm:$0xff] }
 0x263   : > { %v4152_v29 = vld [vmem:[#allocation2 + $0x90] ss:$2 sm:$0xff] }
 0x264   : > { %v4033_v31 = vpop.f32.mrf.mxu0  ;;  %v4322_v5 = vmax.f32 %v4298_v62, %v4309_v39  ;;  %v4180_v41 = vmax.f32 %v4152_v29, %v4168_v12  ;;  %v4192_v19 = vld [vmem:[#allocation2 + $0x92] ss:$2 sm:$0xff] }
 0x265   : > { %v3635_v42 = vpop.f32.mrf.mxu3  ;;  %4968 = vmatmul.msk.bf16.gmra.mxu2 %vm685_vm5, %v5135_v16  ;;  %v2699_v56 = vpop.f32.mrf.mxu1 }
 0x266   : > { %v3696_v33 = vadd.f32 %v3635_v42, %v3042_v36  ;;  %v4346_v8 = vmax.f32 %v4322_v5, %v4333_v22  ;;  %v2757_v40 = vadd.f32 %v2699_v56, %v6093_v46  ;;  %v4204_v17 = vmax.f32 %v4180_v41, %v4192_v19 }
 0x268   : > { %v4094_v9 = vadd.f32 %v4033_v31, %v3696_v33  ;;  %v2984_v15 = vpop.f32.mrf.mxu2  ;;  %v4354_v37 = vpack.c.bf16 %v4346_v8, %v4346_v8 }
 0x269   : > { %v3043_v30 = vadd.f32 %v2984_v15, %v2756_v7 }
 0x26a   : > { %4127 = vst.msk [vmem:[#allocation2 + $0xb1] sm:$0xff] %vm143_vm9, %v4094_v9  ;;  %5033 = vmatmul.msk.bf16.gmra.mxu3 %vm685_vm5, %v3542_v18 }
 0x26b   : > { %4363 = vst.msk [vmem:[%s6663_s27 + $0x8] sm:$0xf] %vm4360_vm11, %v4354_v37 }
 0x26c   : > { %v4036_v21 = vpop.f32.mrf.mxu0 }
 0x26d   : > { %v3638_v0 = vpop.f32.mrf.mxu3  ;;  %v2702_v25 = vpop.f32.mrf.mxu1 }
 0x26e   : > { %v3697_v32 = vadd.f32 %v3638_v0, %v3043_v30  ;;  %v2758_v63 = vadd.f32 %v2702_v25, %v6112_v44 }
 0x26f   : > { %5082 = vmatmul.msk.bf16.gmra.mxu0 %vm685_vm5, %v3940_v24 }
 0x270   : > { %v4095_v11 = vadd.f32 %v4036_v21, %v3697_v32  ;;  %v2986_v60 = vpop.f32.mrf.mxu2 }
 0x271   : > { %v3044_v45 = vadd.f32 %v2986_v60, %v2757_v40  ;;  %v4215_v52 = vld [vmem:[#allocation2 + $0xa8] ss:$2 sm:$0xff]  ;;  %v4239_v61 = vld [vmem:[#allocation2 + $0xa9] ss:$2 sm:$0xff] }
 0x272   : > { %4128 = vst.msk [vmem:[#allocation2 + $0xc1] sm:$0xff] %vm143_vm9, %v4095_v11  ;;  %v4227_v3 = vmax.f32 %v4204_v17, %v4215_v52  ;;  %v4263_v62 = vld [vmem:[#allocation2 + $0xaa] ss:$2 sm:$0xff] }
 0x274   : > { %v4038_v4 = vpop.f32.mrf.mxu0  ;;  %v4251_v51 = vmax.f32 %v4227_v3, %v4239_v61 }
 0x275   : > { %v3640_v43 = vpop.f32.mrf.mxu3  ;;  %v2704_v2 = vpop.f32.mrf.mxu1 }
 0x276   : > { %v3698_v14 = vadd.f32 %v3640_v43, %v3044_v45  ;;  %v2759_v31 = vadd.f32 %v2704_v2, %v6136_v13  ;;  %v4275_v48 = vmax.f32 %v4251_v51, %v4263_v62 }
 0x278   : > { %v4096_v50 = vadd.f32 %v4038_v4, %v3698_v14  ;;  %v2989_v57 = vpop.f32.mrf.mxu2 }
 0x279   : > { %v3045_v46 = vadd.f32 %v2989_v57, %v2758_v63 }
 0x27a   : > { %4129 = vst.msk [vmem:[#allocation2 + $0xc9] sm:$0xff] %vm143_vm9, %v4096_v50 }
 0x27c   : > { %v4041_v16 = vpop.f32.mrf.mxu0 }
 0x27d   : > { %v3643_v36 = vpop.f32.mrf.mxu3  ;;  %v2707_v35 = vpop.f32.mrf.mxu1 }
 0x27e   : > { %v3699_v20 = vadd.f32 %v3643_v36, %v3045_v46  ;;  %v2760_v15 = vadd.f32 %v2707_v35, %v6155_v1 }
 0x280   : > { %v4097_v39 = vadd.f32 %v4041_v16, %v3699_v20  ;;  %v2991_v49 = vpop.f32.mrf.mxu2 }
 0x281   : > { %v4287_v5 = vld [vmem:[#allocation2 + $0xc0] ss:$2 sm:$0xff]  ;;  %v3046_v42 = vadd.f32 %v2991_v49, %v2759_v31  ;;  %v4311_v56 = vld [vmem:[#allocation2 + $0xc1] ss:$2 sm:$0xff] }
 0x282   : > { %v4299_v44 = vmax.f32 %v4275_v48, %v4287_v5  ;;  %4130 = vst.msk [vmem:[#allocation2 + $0xd9] sm:$0xff] %vm143_vm9, %v4097_v39  ;;  %v4335_v53 = vld [vmem:[#allocation2 + $0xc2] ss:$2 sm:$0xff]  ;;  %v4170_v29 = vld [vmem:[#allocation2 + $0xc1] ss:$2 sm:$0xff] }
 0x283   : > { %v4154_v32 = vld [vmem:[#allocation2 + $0xc0] ss:$2 sm:$0xff] }
 0x284   : > { %v4043_v22 = vpop.f32.mrf.mxu0  ;;  %v4323_v33 = vmax.f32 %v4299_v44, %v4311_v56  ;;  %v4181_v60 = vmax.f32 %v4154_v32, %v4170_v29  ;;  %v4194_v43 = vld [vmem:[#allocation2 + $0xc2] ss:$2 sm:$0xff] }
 0x285   : > { %v3645_v18 = vpop.f32.mrf.mxu3  ;;  %v2709_v8 = vpop.f32.mrf.mxu1 }
 0x286   : > { %v3700_v55 = vadd.f32 %v3645_v18, %v3046_v42  ;;  %v4347_v9 = vmax.f32 %v4323_v33, %v4335_v53  ;;  %v2761_v11 = vadd.f32 %v2709_v8, %v6179_v38  ;;  %v4205_v52 = vmax.f32 %v4181_v60, %v4194_v43 }
 0x288   : > { %v4098_v7 = vadd.f32 %v4043_v22, %v3700_v55  ;;  %v2994_v13 = vpop.f32.mrf.mxu2  ;;  %v4355_v37 = vpack.c.bf16 %v4347_v9, %v4347_v9 }
 0x289   : > { %v3047_v30 = vadd.f32 %v2994_v13, %v2760_v15 }
 0x28a   : > { %4131 = vst.msk [vmem:[#allocation2 + $0xe1] sm:$0xff] %vm143_vm9, %v4098_v7 }
 0x28b   : > { %4364 = vst.msk [vmem:[%s6663_s27 + $0xc] sm:$0xf] %vm4360_vm11, %v4355_v37 }
 0x28c   : > { %v4046_v24 = vpop.f32.mrf.mxu0 }
 0x28d   : > { %v3648_v21 = vpop.f32.mrf.mxu3  ;;  %v2712_v0 = vpop.f32.mrf.mxu1 }
 0x28e   : > { %v3701_v25 = vadd.f32 %v3648_v21, %v3047_v30  ;;  %v2762_v17 = vadd.f32 %v2712_v0, %v6198_v10 }
 0x290   : > { %v4099_v12 = vadd.f32 %v4046_v24, %v3701_v25  ;;  %v2996_v40 = vpop.f32.mrf.mxu2 }
 0x291   : > { %v3048_v1 = vadd.f32 %v2996_v40, %v2761_v11  ;;  %v4217_v2 = vld [vmem:[#allocation2 + $0xd8] ss:$2 sm:$0xff]  ;;  %v4241_v57 = vld [vmem:[#allocation2 + $0xd9] ss:$2 sm:$0xff] }
 0x292   : > { %4132 = vst.msk [vmem:[#allocation2 + $0xf1] sm:$0xff] %vm143_vm9, %v4099_v12  ;;  %v4228_v63 = vmax.f32 %v4205_v52, %v4217_v2  ;;  %v4265_v36 = vld [vmem:[#allocation2 + $0xda] ss:$2 sm:$0xff] }
 0x294   : > { %v4048_v45 = vpop.f32.mrf.mxu0  ;;  %v4252_v46 = vmax.f32 %v4228_v63, %v4241_v57 }
 0x295   : > { %v3650_v41 = vpop.f32.mrf.mxu3  ;;  %v2714_v4 = vpop.f32.mrf.mxu1 }
 0x296   : > { %v3702_v19 = vadd.f32 %v3650_v41, %v3048_v1  ;;  %v2763_v20 = vadd.f32 %v2714_v4, %v6222_v23  ;;  %v4276_v39 = vmax.f32 %v4252_v46, %v4265_v36 }
 0x298   : > { %v4100_v14 = vadd.f32 %v4048_v45, %v3702_v19  ;;  %v2999_v50 = vpop.f32.mrf.mxu2 }
 0x299   : > { %v3049_v38 = vadd.f32 %v2999_v50, %v2762_v17 }
 0x29a   : > { %4133 = vst.msk [vmem:[#allocation2 + $0xf9] sm:$0xff] %vm143_vm9, %v4100_v14 }
 0x29c   : > { %v4051_v3 = vpop.f32.mrf.mxu0 }
 0x29d   : > { %v3653_v61 = vpop.f32.mrf.mxu3  ;;  %v2717_v16 = vpop.f32.mrf.mxu1 }
 0x29e   : > { %v3703_v51 = vadd.f32 %v3653_v61, %v3049_v38  ;;  %v2764_v53 = vadd.f32 %v2717_v16, %v6241_v28 }
 0x2a0   : > { %v4101_v35 = vadd.f32 %v4051_v3, %v3703_v51  ;;  %v3001_v62 = vpop.f32.mrf.mxu2  ;;  %v6894_v3 = vld [vmem:[#allocation8_spill] sm:$0xff] }
 0x2a1   : > { %v4289_v31 = vld [vmem:[#allocation2 + $0xf0] ss:$2 sm:$0xff]  ;;  %v3050_v49 = vadd.f32 %v3001_v62, %v2763_v20  ;;  %v4313_v48 = vld [vmem:[#allocation2 + $0xf1] ss:$2 sm:$0xff] }
 0x2a2   : > { %v4300_v10 = vmax.f32 %v4276_v39, %v4289_v31  ;;  %4134 = vst.msk [vmem:[#allocation2 + $0x109] sm:$0xff] %vm143_vm9, %v4101_v35  ;;  %v4337_v22 = vld [vmem:[#allocation2 + $0xf2] ss:$2 sm:$0xff]  ;;  %v4172_v24 = vld [vmem:[#allocation2 + $0xf1] ss:$2 sm:$0xff] }
 0x2a3   : > { %v4156_v30 = vld [vmem:[#allocation2 + $0xf0] ss:$2 sm:$0xff] }
 0x2a4   : > { %v4053_v5 = vpop.f32.mrf.mxu0  ;;  %v4324_v42 = vmax.f32 %v4300_v10, %v4313_v48  ;;  %v4182_v32 = vmax.f32 %v4156_v30, %v4172_v24  ;;  %v4196_v40 = vld [vmem:[#allocation2 + $0xf2] ss:$2 sm:$0xff] }
 0x2a5   : > { %v3655_v44 = vpop.f32.mrf.mxu3  ;;  %v2719_v56 = vpop.f32.mrf.mxu1 }
 0x2a6   : > { %v3704_v33 = vadd.f32 %v3655_v44, %v3050_v49  ;;  %v4348_v18 = vmax.f32 %v4324_v42, %v4337_v22  ;;  %v2765_v0 = vadd.f32 %v2719_v56, %v6265_v58  ;;  %v4206_v45 = vmax.f32 %v4182_v32, %v4196_v40 }
 0x2a8   : > { %v4102_v8 = vadd.f32 %v4053_v5, %v3704_v33  ;;  %v3004_v23 = vpop.f32.mrf.mxu2  ;;  %v4356_v55 = vpack.c.bf16 %v4348_v18, %v4348_v18 }
 0x2a9   : > { %v3051_v9 = vadd.f32 %v3004_v23, %v2764_v53 }
 0x2aa   : > { %4135 = vst.msk [vmem:[#allocation2 + $0x111] sm:$0xff] %vm143_vm9, %v4102_v8 }
 0x2ab   : > { %4365 = vst.msk [vmem:[%s6663_s27 + $0x10] sm:$0xf] %vm4360_vm11, %v4356_v55 }
 0x2ac   : > { %v4056_v7 = vpop.f32.mrf.mxu0 }
 0x2ad   : > { %v3658_v15 = vpop.f32.mrf.mxu3  ;;  %v2722_v13 = vpop.f32.mrf.mxu1 }
 0x2ae   : > { %v3705_v37 = vadd.f32 %v3658_v15, %v3051_v9  ;;  %v2766_v4 = vadd.f32 %v2722_v13, %v6284_v27 }
 0x2b0   : > { %v4103_v21 = vadd.f32 %v4056_v7, %v3705_v37  ;;  %v3006_v25 = vpop.f32.mrf.mxu2 }
 0x2b1   : > { %v3052_v28 = vadd.f32 %v3006_v25, %v2765_v0  ;;  %v4219_v1 = vld [vmem:[#allocation2 + $0x108] ss:$2 sm:$0xff]  ;;  %v4243_v19 = vld [vmem:[#allocation2 + $0x109] ss:$2 sm:$0xff] }
 0x2b2   : > { %4136 = vst.msk [vmem:[#allocation2 + $0x121] sm:$0xff] %vm143_vm9, %v4103_v21  ;;  %v4229_v2 = vmax.f32 %v4206_v45, %v4219_v1  ;;  %v4267_v38 = vld [vmem:[#allocation2 + $0x10a] ss:$2 sm:$0xff] }
 0x2b4   : > { %v4058_v29 = vpop.f32.mrf.mxu0  ;;  %v4253_v14 = vmax.f32 %v4229_v2, %v4243_v19 }
 0x2b5   : > { %v3660_v12 = vpop.f32.mrf.mxu3  ;;  %v2724_v11 = vpop.f32.mrf.mxu1 }
 0x2b6   : > { %v3706_v60 = vadd.f32 %v3660_v12, %v3052_v28  ;;  %v2767_v46 = vadd.f32 %v2724_v11, %v6894_v3  ;;  %v4277_v16 = vmax.f32 %v4253_v14, %v4267_v38 }
 0x2b8   : > { %v4104_v41 = vadd.f32 %v4058_v29, %v3706_v60  ;;  %v3009_v43 = vpop.f32.mrf.mxu2 }
 0x2b9   : > { %v3053_v58 = vadd.f32 %v3009_v43, %v2766_v4 }
 0x2ba   : > { %4137 = vst.msk [vmem:[#allocation2 + $0x129] sm:$0xff] %vm143_vm9, %v4104_v41 }
 0x2bc   : > { %v4061_v52 = vpop.f32.mrf.mxu0 }
 0x2bd   : > { %v3663_v17 = vpop.f32.mrf.mxu3  ;;  %v2727_v50 = vpop.f32.mrf.mxu1 }
 0x2be   : > { %v3707_v63 = vadd.f32 %v3663_v17, %v3053_v58  ;;  %v2768_v42 = vadd.f32 %v2727_v50, %v6325_v54 }
 0x2c0   : > { %v4105_v57 = vadd.f32 %v4061_v52, %v3707_v63  ;;  %v3011_v61 = vpop.f32.mrf.mxu2 }
 0x2c1   : > { %v4291_v51 = vld [vmem:[#allocation2 + $0x120] ss:$2 sm:$0xff]  ;;  %v3054_v36 = vadd.f32 %v3011_v61, %v2767_v46  ;;  %v4315_v35 = vld [vmem:[#allocation2 + $0x121] ss:$2 sm:$0xff] }
 0x2c2   : > { %v4301_v27 = vmax.f32 %v4277_v16, %v4291_v51  ;;  %4138 = vst.msk [vmem:[#allocation2 + $0x139] sm:$0xff] %vm143_vm9, %v4105_v57  ;;  %v4339_v49 = vld [vmem:[#allocation2 + $0x122] ss:$2 sm:$0xff]  ;;  %v4174_v55 = vld [vmem:[#allocation2 + $0x121] ss:$2 sm:$0xff] }
 0x2c3   : > { %v4158_v23 = vld [vmem:[#allocation2 + $0x120] ss:$2 sm:$0xff] }
 0x2c4   : > { %v4063_v20 = vpop.f32.mrf.mxu0  ;;  %v4325_v62 = vmax.f32 %v4301_v27, %v4315_v35  ;;  %v4183_v13 = vmax.f32 %v4158_v23, %v4174_v55  ;;  %v4198_v24 = vld [vmem:[#allocation2 + $0x122] ss:$2 sm:$0xff] }
 0x2c5   : > { %v3665_v39 = vpop.f32.mrf.mxu3  ;;  %v2729_v31 = vpop.f32.mrf.mxu1 }
 0x2c6   : > { %v3708_v10 = vadd.f32 %v3665_v39, %v3054_v36  ;;  %v4349_v48 = vmax.f32 %v4325_v62, %v4339_v49  ;;  %v2769_v7 = vadd.f32 %v2729_v31, %v6347_v6  ;;  %v4207_v25 = vmax.f32 %v4183_v13, %v4198_v24 }
 0x2c8   : > { %v4106_v5 = vadd.f32 %v4063_v20, %v3708_v10  ;;  %v3014_v44 = vpop.f32.mrf.mxu2  ;;  %v4357_v56 = vpack.c.bf16 %v4349_v48, %v4349_v48 }
 0x2c9   : > { %v3055_v22 = vadd.f32 %v3014_v44, %v2768_v42 }
 0x2ca   : > { %4139 = vst.msk [vmem:[#allocation2 + $0x141] sm:$0xff] %vm143_vm9, %v4106_v5 }
 0x2cb   : > { %4366 = vst.msk [vmem:[%s6663_s27 + $0x14] sm:$0xf] %vm4360_vm11, %v4357_v56 }
 0x2cc   : > { %v4066_v33 = vpop.f32.mrf.mxu0 }
 0x2cd   : > { %v3668_v18 = vpop.f32.mrf.mxu3  ;;  %v2732_v53 = vpop.f32.mrf.mxu1 }
 0x2ce   : > { %v3709_v8 = vadd.f32 %v3668_v18, %v3055_v22  ;;  %v2770_v32 = vadd.f32 %v2732_v53, %v6368_v34 }
 0x2d0   : > { %v4107_v9 = vadd.f32 %v4066_v33, %v3709_v8  ;;  %v3016_v15 = vpop.f32.mrf.mxu2 }
 0x2d1   : > { %v3056_v54 = vadd.f32 %v3016_v15, %v2769_v7  ;;  %v4221_v21 = vld [vmem:[#allocation2 + $0x138] ss:$2 sm:$0xff]  ;;  %v4245_v40 = vld [vmem:[#allocation2 + $0x139] ss:$2 sm:$0xff] }
 0x2d2   : > { %4140 = vst.msk [vmem:[#allocation2 + $0x151] sm:$0xff] %vm143_vm9, %v4107_v9  ;;  %v4230_v11 = vmax.f32 %v4207_v25, %v4221_v21  ;;  %v4269_v4 = vld [vmem:[#allocation2 + $0x13a] ss:$2 sm:$0xff] }
 0x2d4   : > { %v4068_v37 = vpop.f32.mrf.mxu0  ;;  %v4254_v60 = vmax.f32 %v4230_v11, %v4245_v40 }
 0x2d5   : > { %v3670_v30 = vpop.f32.mrf.mxu3  ;;  %v2734_v12 = vpop.f32.mrf.mxu1 }
 0x2d6   : > { %v3710_v0 = vadd.f32 %v3670_v30, %v3056_v54  ;;  %v2771_v2 = vadd.f32 %v2734_v12, %v6402_v26  ;;  %v4278_v19 = vmax.f32 %v4254_v60, %v4269_v4 }
 0x2d8   : > { %v4108_v28 = vadd.f32 %v4068_v37, %v3710_v0  ;;  %v3019_v29 = vpop.f32.mrf.mxu2 }
 0x2d9   : > { %v3057_v6 = vadd.f32 %v3019_v29, %v2770_v32 }
 0x2da   : > { %4141 = vst.msk [vmem:[#allocation2 + $0x159] sm:$0xff] %vm143_vm9, %v4108_v28 }
 0x2dc   : > { %v4071_v1 = vpop.f32.mrf.mxu0 }
 0x2dd   : > { %v3673_v45 = vpop.f32.mrf.mxu3  ;;  %v2737_v34 = vpop.f32.mrf.mxu1 }
 0x2de   : > { %v3711_v41 = vadd.f32 %v3673_v45, %v3057_v6  ;;  %v2772_v51 = vadd.f32 %v2737_v34, %v6441_v47 }
 0x2e0   : > { %v4109_v43 = vadd.f32 %v4071_v1, %v3711_v41  ;;  %v3021_v58 = vpop.f32.mrf.mxu2 }
 0x2e1   : > { %v4293_v52 = vld [vmem:[#allocation2 + $0x150] ss:$2 sm:$0xff]  ;;  %v3058_v14 = vadd.f32 %v3021_v58, %v2771_v2  ;;  %v4317_v50 = vld [vmem:[#allocation2 + $0x151] ss:$2 sm:$0xff] }
 0x2e2   : > { %v4302_v17 = vmax.f32 %v4278_v19, %v4293_v52  ;;  %4142 = vst.msk [vmem:[#allocation2 + $0x169] sm:$0xff] %vm143_vm9, %v4109_v43  ;;  %v4341_v3 = vld [vmem:[#allocation2 + $0x152] ss:$2 sm:$0xff]  ;;  %v4176_v49 = vld [vmem:[#allocation2 + $0x151] ss:$2 sm:$0xff] }
 0x2e3   : > { %v4160_v31 = vld [vmem:[#allocation2 + $0x150] ss:$2 sm:$0xff] }
 0x2e4   : > { %v4073_v63 = vpop.f32.mrf.mxu0  ;;  %v4326_v38 = vmax.f32 %v4302_v17, %v4317_v50  ;;  %v4184_v42 = vmax.f32 %v4160_v31, %v4176_v49  ;;  %v4200_v44 = vld [vmem:[#allocation2 + $0x152] ss:$2 sm:$0xff] }
 0x2e5   : > { %v3675_v57 = vpop.f32.mrf.mxu3  ;;  %v2739_v35 = vpop.f32.mrf.mxu1 }
 0x2e6   : > { %v3712_v46 = vadd.f32 %v3675_v57, %v3058_v14  ;;  %v4350_v61 = vmax.f32 %v4326_v38, %v4341_v3  ;;  %v2773_v48 = vadd.f32 %v2739_v35, %v6502_v59  ;;  %v4208_v33 = vmax.f32 %v4184_v42, %v4200_v44 }
 0x2e8   : > { %v4110_v16 = vadd.f32 %v4073_v63, %v3712_v46  ;;  %v3024_v26 = vpop.f32.mrf.mxu2  ;;  %v4358_v36 = vpack.c.bf16 %v4350_v61, %v4350_v61 }
 0x2e9   : > { %v3059_v27 = vadd.f32 %v3024_v26, %v2772_v51 }
 0x2ea   : > { %4143 = vst.msk [vmem:[#allocation2 + $0x171] sm:$0xff] %vm143_vm9, %v4110_v16 }
 0x2eb   : > { %4367 = vst.msk [vmem:[%s6663_s27 + $0x18] sm:$0xf] %vm4360_vm11, %v4358_v36 }
 0x2ec   : > { %v4076_v20 = vpop.f32.mrf.mxu0 }
 0x2ed   : > { %v3678_v62 = vpop.f32.mrf.mxu3 }
 0x2ee   : > { %v3713_v39 = vadd.f32 %v3678_v62, %v3059_v27 }
 0x2f0   : > { %v4111_v10 = vadd.f32 %v4076_v20, %v3713_v39  ;;  %v3026_v5 = vpop.f32.mrf.mxu2 }
 0x2f1   : > { %v3060_v47 = vadd.f32 %v3026_v5, %v2773_v48  ;;  %v4223_v56 = vld [vmem:[#allocation2 + $0x168] ss:$2 sm:$0xff]  ;;  %v4247_v55 = vld [vmem:[#allocation2 + $0x169] ss:$2 sm:$0xff] }
 0x2f2   : > { %4144 = vst.msk [vmem:[#allocation2 + $0x181] sm:$0xff] %vm143_vm9, %v4111_v10  ;;  %v4231_v53 = vmax.f32 %v4208_v33, %v4223_v56  ;;  %v4271_v59 = vld [vmem:[#allocation2 + $0x16a] ss:$2 sm:$0xff] }
 0x2f4   : > { %v4078_v8 = vpop.f32.mrf.mxu0  ;;  %v4255_v9 = vmax.f32 %v4231_v53, %v4247_v55 }
 0x2f5   : > { %v3680_v22 = vpop.f32.mrf.mxu3 }
 0x2f6   : > { %v3714_v18 = vadd.f32 %v3680_v22, %v3060_v47  ;;  %v4279_v7 = vmax.f32 %v4255_v9, %v4271_v59 }
 0x2f8   : > { %v4112_v23 = vadd.f32 %v4078_v8, %v3714_v18 }
 0x2fa   : > { %4145 = vst.msk [vmem:[#allocation2 + $0x189] sm:$0xff] %vm143_vm9, %v4112_v23 }
 0x301   : > { %v4295_v15 = vld [vmem:[#allocation2 + $0x180] ss:$2 sm:$0xff]  ;;  %v4319_v13 = vld [vmem:[#allocation2 + $0x181] ss:$2 sm:$0xff] }
 0x302   : > { %v4303_v54 = vmax.f32 %v4279_v7, %v4295_v15  ;;  %v4343_v30 = vld [vmem:[#allocation2 + $0x182] ss:$2 sm:$0xff] }
 0x304   : > { %v4327_v37 = vmax.f32 %v4303_v54, %v4319_v13 }
 0x306   : > { %v4351_v24 = vmax.f32 %v4327_v37, %v4343_v30 }
 0x308   : > { %v4359_v21 = vpack.c.bf16 %v4351_v24, %v4351_v24 }
 0x30a   : > { %4368 = vst.msk [vmem:[%s6663_s27 + $0x1c] sm:$0xf] %vm4360_vm11, %v4359_v21 }
 0x30b   : > { %5261 = shalt.err (!%p5258_p3)
}
 0x30c   : > { %s5300_s22 = smov 64   ;;  %s5301_s23 = smov 4  }
 0x30d   : > { %5141 = dma.vmem_to_hbm [thread:$0]  (%p5355_p5), %s4383_s4, 512, %s4385_s5, %s4370_s13, %s5300_s22, %s5300_s22, %s5301_s23  }
 0x30e PF: > { %p5147_p4 = scmp.ge.s32.totalorder %s5296_s12, 2  ;;  %s4399_s24 = sand.u32 1, %s5284_s9  }
 0x30f   : > { %s4400_s25 = scalar_lea.sflag [#allocation4], %s4399_s24 }
 0x310   : > { %p5144_p7 = pnand %p5147_p4, %p5359_p6 }
 0x312   : > { %p5145_p8 = pneg %p5144_p7 }
 0x314   : > { %5279 = dma.done.wait (%p5145_p8), %s4400_s25, 512  }
 0x315   : > { %5281 = vsyncadd (%p5145_p8), %s4400_s25, 4294966784  ;;  %p12_p9 = scmp.ge.s32.totalorder %s5342_s15, 4   ;;  %s6895_s9 = smov %s5288_s10 }
 0x316   : > { %s6896_s10 = smov %s5292_s11  ;;  %s6897_s11 = smov %s5353_s18 }
 0x317   : > { %s6898_s12 = smov %s5342_s15  ;;  %14 = sbr.rel (!%p12_p9) target bundleno = 3 (0x3), region = 144 }
 0x31c   :  { %4406 = vsyncpa [#allocation4], 1 }
 0x31d   :  { %4408 = vsyncpa [#allocation4 + $0x1], 1 }

</bundles_post_ra>
